<compile_context>
chip_gen: v6e
topology: v6e:2x2x1
jax: 0.10.0
libtpu: 0.0.40
codegen_flags: <defaults>
</compile_context>

<pallas_src>
import math
import jax
import jax.numpy as jnp
from jax import lax
from jax.experimental import pallas as pl
from jax.experimental.pallas import tpu as pltpu

# ---- small, SmallLLM-consistent hyper-parameters -------------------------
B = 2          # batch
S = 16         # seq_len
D = 128        # d_model
H = 4          # n_heads
HD = D // H    # head_dim = 32
DFF = 256      # d_ff
V = 512        # vocab_size
NLAYERS = 2
EPS = 1e-5
M = B * S      # flattened rows


# ---- in-kernel math helpers ----------------------------------------------
def _layernorm(x, gamma, beta):
    mu = jnp.mean(x, axis=-1, keepdims=True)
    var = jnp.mean(jnp.square(x - mu), axis=-1, keepdims=True)
    return (x - mu) * lax.rsqrt(var + EPS) * gamma + beta


def _gelu_tanh(x):
    # tanh-approximate GELU (EUP-friendly); well inside the relaxed tolerance.
    c = math.sqrt(2.0 / math.pi)
    return 0.5 * x * (1.0 + jnp.tanh(c * (x + 0.044715 * x * x * x)))


def _bmm(a_f32, w_bf16):
    # bf16 MXU matmul with f32 accumulation; activation cast at the dot input.
    return jnp.dot(a_f32.astype(jnp.bfloat16), w_bf16,
                   preferred_element_type=jnp.float32)


# ---- fused forward kernel ---------------------------------------------------
def fused_forward_kernel(x_ref, cos_ref, sin1_ref, sin2_ref,
                         wqkv_ref, wo_ref,
                         g1_ref, be1_ref, g2_ref, be2_ref,
                         w1_ref, b1_ref, w2_ref, b2_ref,
                         gf_ref, bef_ref, embt_ref,
                         o_ref):
    x = x_ref[...]                     # (M, D) f32 residual stream (batch flattened)
    cos = cos_ref[...]                 # (M, D) f32
    sin1 = sin1_ref[...]               # (M, D) f32: -sin on first-half lanes, else 0
    sin2 = sin2_ref[...]               # (M, D) f32: +sin on second-half lanes, else 0

    row = lax.broadcasted_iota(jnp.int32, (S, S), 0)
    col = lax.broadcasted_iota(jnp.int32, (S, S), 1)
    causal = row >= col

    bf = jnp.bfloat16
    half = HD // 2
    nt_dims = (((1,), (1,)), ((), ()))   # contract last dim of both (q @ k^T)

    def rope(t):
        # per-head rotate_half via two static XLU lane rolls; sign & half-
        # selection are pre-folded into sin1 / sin2 in the wrapper.
        return (t * cos
                + pltpu.roll(t, D - half, axis=1) * sin1     # t[j+16] partner
                + pltpu.roll(t, half, axis=1) * sin2)        # t[j-16] partner

    for l in range(NLAYERS):           # static unroll; weights stay VMEM-resident
        # ----- attention sub-block (pre-norm) -----
        xn = _layernorm(x, g1_ref[l], be1_ref[l])
        qkv = _bmm(xn, wqkv_ref[l])                        # one (M,128)@(128,384)
        q = rope(qkv[:, 0:D]).astype(bf)                   # 1/sqrt(HD) folded in Wq
        k = rope(qkv[:, D:2 * D]).astype(bf)
        v = qkv[:, 2 * D:3 * D].astype(bf)

        seq_outs = []
        for b in range(B):                                 # causal attn per sequence
            rows = slice(b * S, (b + 1) * S)               # 16 rows = tile-aligned
            head_outs = []
            for h in range(H):
                cols = slice(h * HD, (h + 1) * HD)
                qh = q[rows, cols]
                kh = k[rows, cols]
                vh = v[rows, cols]
                s = lax.dot_general(qh, kh, nt_dims,       # bf16 NT, no kh.T copy
                                    preferred_element_type=jnp.float32)
                s = jnp.where(causal, s, -1e9)
                s = s - jnp.max(s, axis=-1, keepdims=True)
                p = jnp.exp(s)
                p = p * pl.reciprocal(jnp.sum(p, axis=-1, keepdims=True),
                                      approx=True)
                head_outs.append(jnp.dot(p.astype(bf), vh,
                                         preferred_element_type=jnp.float32))
            seq_outs.append(jnp.concatenate(head_outs, axis=-1))   # (S, D)
        attn = jnp.concatenate(seq_outs, axis=0)                   # (M, D)
        x = x + _bmm(attn, wo_ref[l])                      # single K=128 Wo matmul

        # ----- feed-forward sub-block (pre-norm) -----
        xn2 = _layernorm(x, g2_ref[l], be2_ref[l])
        h1 = _gelu_tanh(_bmm(xn2, w1_ref[l]) + b1_ref[l])
        x = x + _bmm(h1, w2_ref[l]) + b2_ref[l]

    # ----- final layernorm + tied lm_head (lane-dense V=512 output) -----
    xn = _layernorm(x, gf_ref[...], bef_ref[...])
    o_ref[...] = _bmm(xn, embt_ref[...])                   # (M, V)


# ---- wrapper ----------------------------------------------------------------
def _full_spec(a):
    zeros = (0,) * a.ndim
    return pl.BlockSpec(a.shape, lambda i, _z=zeros: _z)


def rope_tables(seq_len, dim):
    inv_freq = 1.0 / (10000.0 ** (jnp.arange(0, dim, 2, dtype=jnp.float32) / dim))
    t = jnp.arange(seq_len, dtype=jnp.float32)
    freqs = jnp.einsum("i,j->ij", t, inv_freq)
    emb = jnp.concatenate([freqs, freqs], axis=-1)      # (S, HD)
    return jnp.cos(emb), jnp.sin(emb)


def small_llm_forward(input_ids, emb, layers, final):
    x = emb[input_ids].astype(jnp.float32).reshape(M, D)   # embedding gather (glue)

    cos, sin = rope_tables(S, HD)                           # (S, HD)
    half = HD // 2
    zeros_half = jnp.zeros((S, half), jnp.float32)
    sin_first = jnp.concatenate([-sin[:, :half], zeros_half], axis=-1)   # (S, HD)
    sin_second = jnp.concatenate([zeros_half, sin[:, half:]], axis=-1)   # (S, HD)

    # tile per-head tables across heads (lanes) and batch (rows) -> (B*S, D)
    cos_flat = jnp.tile(cos, (B, H))
    sin1_flat = jnp.tile(sin_first, (B, H))
    sin2_flat = jnp.tile(sin_second, (B, H))

    scale = 1.0 / math.sqrt(HD)

    def stack(name):
        return jnp.stack([p[name] for p in layers])

    # fused QKV weight: (NLAYERS, D, 3D); 1/sqrt(HD) folded into the Q columns.
    wqkv = jnp.concatenate([stack("wq") * scale, stack("wk"), stack("wv")], axis=-1)

    bf = jnp.bfloat16
    operands = (
        x, cos_flat, sin1_flat, sin2_flat,
        wqkv.astype(bf), stack("wo").astype(bf),
        stack("g1"), stack("be1"), stack("g2"), stack("be2"),
        stack("w1").astype(bf), stack("b1"), stack("w2").astype(bf), stack("b2"),
        final["g"], final["be"], emb.T.astype(bf),
    )

    in_specs = [_full_spec(a) for a in operands]

    out = pl.pallas_call(
        fused_forward_kernel,
        out_shape=jax.ShapeDtypeStruct((M, V), jnp.float32),
        grid=(1,),
        in_specs=in_specs,
        out_specs=pl.BlockSpec((M, V), lambda i: (0, 0)),
        compiler_params=pltpu.CompilerParams(dimension_semantics=("arbitrary",)),
    )(*operands)
    return out.reshape(B, S, V)


# ---- deterministic parameter init (matches SmallLLM._init_weights) ---------
def init_params(key):
    key, k_emb = jax.random.split(key)
    emb = 0.02 * jax.random.normal(k_emb, (V, D), jnp.float32)
    layers = []
    for _ in range(NLAYERS):
        ks = jax.random.split(key, 7)
        key = ks[0]
        shapes = [(D, D), (D, D), (D, D), (D, D), (DFF, D), (D, DFF)]  # (out, in)
        wq, wk, wv, wo, w1, w2 = [0.02 * jax.random.normal(k, s, jnp.float32)
                                  for k, s in zip(ks[1:], shapes)]
        layers.append(dict(
            wq=wq.T, wk=wk.T, wv=wv.T, wo=wo.T,           # stored as (in, out)
            w1=w1.T, b1=jnp.zeros((1, DFF), jnp.float32),
            w2=w2.T, b2=jnp.zeros((1, D), jnp.float32),
            g1=jnp.ones((1, D), jnp.float32), be1=jnp.zeros((1, D), jnp.float32),
            g2=jnp.ones((1, D), jnp.float32), be2=jnp.zeros((1, D), jnp.float32)))
    final = dict(g=jnp.ones((1, D), jnp.float32), be=jnp.zeros((1, D), jnp.float32))
    return emb, layers, final


# ---- pure-JAX f32 reference (numerical sanity check) ------------------------
def reference_forward(input_ids, emb, layers, final):
    def ln(x, g, b):
        mu = x.mean(-1, keepdims=True)
        var = ((x - mu) ** 2).mean(-1, keepdims=True)
        return (x - mu) / jnp.sqrt(var + EPS) * g + b

    def rot_half(t):
        half = t.shape[-1] // 2
        return jnp.concatenate([-t[..., half:], t[..., :half]], axis=-1)

    x = emb[input_ids]
    cos, sin = rope_tables(S, HD)
    causal = jnp.tril(jnp.ones((S, S)))
    for p in layers:
        xn = ln(x, p["g1"][0], p["be1"][0])
        q = (xn @ p["wq"]).reshape(B, S, H, HD).transpose(0, 2, 1, 3)
        k = (xn @ p["wk"]).reshape(B, S, H, HD).transpose(0, 2, 1, 3)
        v = (xn @ p["wv"]).reshape(B, S, H, HD).transpose(0, 2, 1, 3)
        q = q * cos + rot_half(q) * sin
        k = k * cos + rot_half(k) * sin
        s = jnp.einsum("bhqd,bhkd->bhqk", q, k) / math.sqrt(HD)
        s = jnp.where(causal == 0, -1e9, s)
        a = jax.nn.softmax(s, axis=-1)
        o = jnp.einsum("bhqk,bhkd->bhqd", a, v).transpose(0, 2, 1, 3).reshape(B, S, D)
        x = x + o @ p["wo"]
        xn2 = ln(x, p["g2"][0], p["be2"][0])
        h1 = jax.nn.gelu(xn2 @ p["w1"] + p["b1"][0], approximate=False)
        x = x + h1 @ p["w2"] + p["b2"][0]
    xn = ln(x, final["g"][0], final["be"][0])
    return xn @ emb.T


if __name__ == "__main__":
    key = jax.random.PRNGKey(0)
    k_ids, k_params = jax.random.split(key)
    input_ids = jax.random.randint(k_ids, (B, S), 0, V, dtype=jnp.int32)
    emb, layers, final = init_params(k_params)

    fwd = jax.jit(small_llm_forward)
    logits = jax.block_until_ready(fwd(input_ids, emb, layers, final))
    assert logits.shape == (B, S, V)

    with jax.default_matmul_precision("highest"):
        ref = jax.block_until_ready(reference_forward(input_ids, emb, layers, final))

    # bf16 MXU inputs + tanh-GELU + approx reciprocal vs an exact-f32 reference:
    # relaxed tolerance (logit scale ~0.2; structural bugs produce O(0.1-1) errors).
    err = float(jnp.max(jnp.abs(logits - ref)))
    if err > 5e-2:
        raise AssertionError(f"kernel vs reference mismatch: max abs err = {err}")
    print("KERNEL_OK")
</pallas_src>

<mosaic_0001>
module attributes {stable_mosaic.version = 11 : i64} {
  func.func @fused_forward_kernel(%arg0: i32, %arg1: memref<32x128xf32, #tpu.memory_space<vmem>>, %arg2: memref<32x128xf32, #tpu.memory_space<vmem>>, %arg3: memref<32x128xf32, #tpu.memory_space<vmem>>, %arg4: memref<32x128xf32, #tpu.memory_space<vmem>>, %arg5: memref<2x128x384xbf16, #tpu.memory_space<vmem>>, %arg6: memref<2x128x128xbf16, #tpu.memory_space<vmem>>, %arg7: memref<2x1x128xf32, #tpu.memory_space<vmem>>, %arg8: memref<2x1x128xf32, #tpu.memory_space<vmem>>, %arg9: memref<2x1x128xf32, #tpu.memory_space<vmem>>, %arg10: memref<2x1x128xf32, #tpu.memory_space<vmem>>, %arg11: memref<2x128x256xbf16, #tpu.memory_space<vmem>>, %arg12: memref<2x1x256xf32, #tpu.memory_space<vmem>>, %arg13: memref<2x256x128xbf16, #tpu.memory_space<vmem>>, %arg14: memref<2x1x128xf32, #tpu.memory_space<vmem>>, %arg15: memref<1x128xf32, #tpu.memory_space<vmem>>, %arg16: memref<1x128xf32, #tpu.memory_space<vmem>>, %arg17: memref<128x512xbf16, #tpu.memory_space<vmem>>, %arg18: memref<32x512xf32, #tpu.memory_space<vmem>>) attributes {dimension_semantics = [#tpu.dimension_semantics<arbitrary>], iteration_bounds = array<i64: 1>, scalar_prefetch = 0 : i64, scratch_operands = 0 : i64, tpu.core_type = #tpu.core_type<tc>, window_params = [{pipeline_mode = #tpu.pipeline_mode<synchronous>, transform_indices = @transform_0, window_bounds = array<i64: 32, 128>}, {pipeline_mode = #tpu.pipeline_mode<synchronous>, transform_indices = @transform_1, window_bounds = array<i64: 32, 128>}, {pipeline_mode = #tpu.pipeline_mode<synchronous>, transform_indices = @transform_2, window_bounds = array<i64: 32, 128>}, {pipeline_mode = #tpu.pipeline_mode<synchronous>, transform_indices = @transform_3, window_bounds = array<i64: 32, 128>}, {pipeline_mode = #tpu.pipeline_mode<synchronous>, transform_indices = @transform_4, window_bounds = array<i64: 2, 128, 384>}, {pipeline_mode = #tpu.pipeline_mode<synchronous>, transform_indices = @transform_5, window_bounds = array<i64: 2, 128, 128>}, {pipeline_mode = #tpu.pipeline_mode<synchronous>, transform_indices = @transform_6, window_bounds = array<i64: 2, 1, 128>}, {pipeline_mode = #tpu.pipeline_mode<synchronous>, transform_indices = @transform_7, window_bounds = array<i64: 2, 1, 128>}, {pipeline_mode = #tpu.pipeline_mode<synchronous>, transform_indices = @transform_8, window_bounds = array<i64: 2, 1, 128>}, {pipeline_mode = #tpu.pipeline_mode<synchronous>, transform_indices = @transform_9, window_bounds = array<i64: 2, 1, 128>}, {pipeline_mode = #tpu.pipeline_mode<synchronous>, transform_indices = @transform_10, window_bounds = array<i64: 2, 128, 256>}, {pipeline_mode = #tpu.pipeline_mode<synchronous>, transform_indices = @transform_11, window_bounds = array<i64: 2, 1, 256>}, {pipeline_mode = #tpu.pipeline_mode<synchronous>, transform_indices = @transform_12, window_bounds = array<i64: 2, 256, 128>}, {pipeline_mode = #tpu.pipeline_mode<synchronous>, transform_indices = @transform_13, window_bounds = array<i64: 2, 1, 128>}, {pipeline_mode = #tpu.pipeline_mode<synchronous>, transform_indices = @transform_14, window_bounds = array<i64: 1, 128>}, {pipeline_mode = #tpu.pipeline_mode<synchronous>, transform_indices = @transform_15, window_bounds = array<i64: 1, 128>}, {pipeline_mode = #tpu.pipeline_mode<synchronous>, transform_indices = @transform_16, window_bounds = array<i64: 128, 512>}, {pipeline_mode = #tpu.pipeline_mode<synchronous>, transform_indices = @transform_17, window_bounds = array<i64: 32, 512>}]} {
    %c0 = arith.constant 0 : index
    %c0_0 = arith.constant 0 : index
    %0 = vector.load %arg1[%c0, %c0_0] : memref<32x128xf32, #tpu.memory_space<vmem>>, vector<32x128xf32>
    %c0_1 = arith.constant 0 : index
    %c0_2 = arith.constant 0 : index
    %1 = vector.load %arg2[%c0_1, %c0_2] : memref<32x128xf32, #tpu.memory_space<vmem>>, vector<32x128xf32>
    %c0_3 = arith.constant 0 : index
    %c0_4 = arith.constant 0 : index
    %2 = vector.load %arg3[%c0_3, %c0_4] : memref<32x128xf32, #tpu.memory_space<vmem>>, vector<32x128xf32>
    %c0_5 = arith.constant 0 : index
    %c0_6 = arith.constant 0 : index
    %3 = vector.load %arg4[%c0_5, %c0_6] : memref<32x128xf32, #tpu.memory_space<vmem>>, vector<32x128xf32>
    %4 = tpu.iota {dimensions = array<i32: 0>} : vector<16x16xi32>
    %5 = tpu.iota {dimensions = array<i32: 1>} : vector<16x16xi32>
    %6 = arith.cmpi sge, %4, %5 : vector<16x16xi32>
    %c0_7 = arith.constant 0 : index
    %c0_8 = arith.constant 0 : index
    %c0_9 = arith.constant 0 : index
    %7 = vector.load %arg7[%c0_7, %c0_8, %c0_9] : memref<2x1x128xf32, #tpu.memory_space<vmem>>, vector<1x1x128xf32>
    %8 = vector.shape_cast %7 : vector<1x1x128xf32> to vector<1x128xf32>
    %c0_10 = arith.constant 0 : index
    %c0_11 = arith.constant 0 : index
    %c0_12 = arith.constant 0 : index
    %9 = vector.load %arg8[%c0_10, %c0_11, %c0_12] : memref<2x1x128xf32, #tpu.memory_space<vmem>>, vector<1x1x128xf32>
    %10 = vector.shape_cast %9 : vector<1x1x128xf32> to vector<1x128xf32>
    %cst = arith.constant dense<0.000000e+00> : vector<32xf32>
    %11 = vector.multi_reduction <add>, %0, %cst [1] : vector<32x128xf32> to vector<32xf32>
    %12 = vector.shape_cast %11 : vector<32xf32> to vector<32x1xf32>
    %cst_13 = arith.constant 1.280000e+02 : f32
    %13 = vector.broadcast %cst_13 : f32 to vector<32x1xf32>
    %14 = arith.divf %12, %13 : vector<32x1xf32>
    %15 = vector.broadcast %14 : vector<32x1xf32> to vector<32x128xf32>
    %16 = arith.subf %0, %15 : vector<32x128xf32>
    %17 = arith.mulf %16, %16 : vector<32x128xf32>
    %cst_14 = arith.constant dense<0.000000e+00> : vector<32xf32>
    %18 = vector.multi_reduction <add>, %17, %cst_14 [1] : vector<32x128xf32> to vector<32xf32>
    %19 = vector.shape_cast %18 : vector<32xf32> to vector<32x1xf32>
    %cst_15 = arith.constant 1.280000e+02 : f32
    %20 = vector.broadcast %cst_15 : f32 to vector<32x1xf32>
    %21 = arith.divf %19, %20 : vector<32x1xf32>
    %22 = vector.broadcast %14 : vector<32x1xf32> to vector<32x128xf32>
    %23 = arith.subf %0, %22 : vector<32x128xf32>
    %cst_16 = arith.constant 9.99999974E-6 : f32
    %24 = vector.broadcast %cst_16 : f32 to vector<32x1xf32>
    %25 = arith.addf %21, %24 : vector<32x1xf32>
    %26 = math.rsqrt %25 : vector<32x1xf32>
    %27 = vector.broadcast %26 : vector<32x1xf32> to vector<32x128xf32>
    %28 = arith.mulf %23, %27 : vector<32x128xf32>
    %29 = vector.broadcast %8 : vector<1x128xf32> to vector<32x128xf32>
    %30 = arith.mulf %28, %29 : vector<32x128xf32>
    %31 = vector.broadcast %10 : vector<1x128xf32> to vector<32x128xf32>
    %32 = arith.addf %30, %31 : vector<32x128xf32>
    %c0_17 = arith.constant 0 : index
    %c0_18 = arith.constant 0 : index
    %c0_19 = arith.constant 0 : index
    %33 = vector.load %arg5[%c0_17, %c0_18, %c0_19] : memref<2x128x384xbf16, #tpu.memory_space<vmem>>, vector<1x128x384xbf16>
    %34 = vector.shape_cast %33 : vector<1x128x384xbf16> to vector<128x384xbf16>
    %35 = arith.truncf %32 : vector<32x128xf32> to vector<32x128xbf16>
    %cst_20 = arith.constant dense<0.000000e+00> : vector<32x384xf32>
    %36 = tpu.matmul %35, %34, %cst_20 {dimension_numbers = #tpu.dot_dimension_numbers<[1], [0], [0], [1], [0, 0, 1, 1], [], []>} : vector<32x128xbf16>, vector<128x384xbf16>, vector<32x384xf32> -> vector<32x384xf32>
    %37 = vector.extract_strided_slice %36 {offsets = [0, 0], sizes = [32, 128], strides = [1, 1]} : vector<32x384xf32> to vector<32x128xf32>
    %38 = arith.mulf %37, %1 : vector<32x128xf32>
    %c112_i32 = arith.constant 112 : i32
    %39 = tpu.dynamic_rotate %37 by %c112_i32 dim 1 : vector<32x128xf32>, i32 -> vector<32x128xf32>
    %40 = arith.mulf %39, %2 : vector<32x128xf32>
    %41 = arith.addf %38, %40 : vector<32x128xf32>
    %c16_i32 = arith.constant 16 : i32
    %42 = tpu.dynamic_rotate %37 by %c16_i32 dim 1 : vector<32x128xf32>, i32 -> vector<32x128xf32>
    %43 = arith.mulf %42, %3 : vector<32x128xf32>
    %44 = arith.addf %41, %43 : vector<32x128xf32>
    %45 = arith.truncf %44 : vector<32x128xf32> to vector<32x128xbf16>
    %46 = vector.extract_strided_slice %36 {offsets = [0, 128], sizes = [32, 128], strides = [1, 1]} : vector<32x384xf32> to vector<32x128xf32>
    %47 = arith.mulf %46, %1 : vector<32x128xf32>
    %c112_i32_21 = arith.constant 112 : i32
    %48 = tpu.dynamic_rotate %46 by %c112_i32_21 dim 1 : vector<32x128xf32>, i32 -> vector<32x128xf32>
    %49 = arith.mulf %48, %2 : vector<32x128xf32>
    %50 = arith.addf %47, %49 : vector<32x128xf32>
    %c16_i32_22 = arith.constant 16 : i32
    %51 = tpu.dynamic_rotate %46 by %c16_i32_22 dim 1 : vector<32x128xf32>, i32 -> vector<32x128xf32>
    %52 = arith.mulf %51, %3 : vector<32x128xf32>
    %53 = arith.addf %50, %52 : vector<32x128xf32>
    %54 = arith.truncf %53 : vector<32x128xf32> to vector<32x128xbf16>
    %55 = vector.extract_strided_slice %36 {offsets = [0, 256], sizes = [32, 128], strides = [1, 1]} : vector<32x384xf32> to vector<32x128xf32>
    %56 = arith.truncf %55 : vector<32x128xf32> to vector<32x128xbf16>
    %57 = vector.extract_strided_slice %45 {offsets = [0, 0], sizes = [16, 32], strides = [1, 1]} : vector<32x128xbf16> to vector<16x32xbf16>
    %58 = vector.extract_strided_slice %54 {offsets = [0, 0], sizes = [16, 32], strides = [1, 1]} : vector<32x128xbf16> to vector<16x32xbf16>
    %59 = vector.extract_strided_slice %56 {offsets = [0, 0], sizes = [16, 32], strides = [1, 1]} : vector<32x128xbf16> to vector<16x32xbf16>
    %cst_23 = arith.constant dense<0.000000e+00> : vector<16x16xf32>
    %60 = tpu.matmul %57, %58, %cst_23 {dimension_numbers = #tpu.dot_dimension_numbers<[1], [1], [0], [0], [0, 0, 1, 0], [], []>} : vector<16x32xbf16>, vector<16x32xbf16>, vector<16x16xf32> -> vector<16x16xf32>
    %cst_24 = arith.constant -1.000000e+09 : f32
    %61 = vector.broadcast %cst_24 : f32 to vector<16x16xf32>
    %62 = arith.select %6, %60, %61 : vector<16x16xi1>, vector<16x16xf32>
    %cst_25 = arith.constant dense<0xFF800000> : vector<16xf32>
    %63 = vector.multi_reduction <maximumf>, %62, %cst_25 [1] : vector<16x16xf32> to vector<16xf32>
    %64 = vector.shape_cast %63 : vector<16xf32> to vector<16x1xf32>
    %65 = vector.broadcast %64 : vector<16x1xf32> to vector<16x16xf32>
    %66 = arith.subf %62, %65 : vector<16x16xf32>
    %67 = math.exp %66 : vector<16x16xf32>
    %cst_26 = arith.constant dense<0.000000e+00> : vector<16xf32>
    %68 = vector.multi_reduction <add>, %67, %cst_26 [1] : vector<16x16xf32> to vector<16xf32>
    %69 = vector.shape_cast %68 : vector<16xf32> to vector<16x1xf32>
    %70 = tpu.reciprocal %69 {approx = true} : vector<16x1xf32> -> vector<16x1xf32>
    %71 = vector.broadcast %70 : vector<16x1xf32> to vector<16x16xf32>
    %72 = arith.mulf %67, %71 : vector<16x16xf32>
    %73 = arith.truncf %72 : vector<16x16xf32> to vector<16x16xbf16>
    %cst_27 = arith.constant dense<0.000000e+00> : vector<16x32xf32>
    %74 = tpu.matmul %73, %59, %cst_27 {dimension_numbers = #tpu.dot_dimension_numbers<[1], [0], [0], [1], [0, 0, 1, 1], [], []>} : vector<16x16xbf16>, vector<16x32xbf16>, vector<16x32xf32> -> vector<16x32xf32>
    %75 = vector.extract_strided_slice %45 {offsets = [0, 32], sizes = [16, 32], strides = [1, 1]} : vector<32x128xbf16> to vector<16x32xbf16>
    %76 = vector.extract_strided_slice %54 {offsets = [0, 32], sizes = [16, 32], strides = [1, 1]} : vector<32x128xbf16> to vector<16x32xbf16>
    %77 = vector.extract_strided_slice %56 {offsets = [0, 32], sizes = [16, 32], strides = [1, 1]} : vector<32x128xbf16> to vector<16x32xbf16>
    %cst_28 = arith.constant dense<0.000000e+00> : vector<16x16xf32>
    %78 = tpu.matmul %75, %76, %cst_28 {dimension_numbers = #tpu.dot_dimension_numbers<[1], [1], [0], [0], [0, 0, 1, 0], [], []>} : vector<16x32xbf16>, vector<16x32xbf16>, vector<16x16xf32> -> vector<16x16xf32>
    %cst_29 = arith.constant -1.000000e+09 : f32
    %79 = vector.broadcast %cst_29 : f32 to vector<16x16xf32>
    %80 = arith.select %6, %78, %79 : vector<16x16xi1>, vector<16x16xf32>
    %cst_30 = arith.constant dense<0xFF800000> : vector<16xf32>
    %81 = vector.multi_reduction <maximumf>, %80, %cst_30 [1] : vector<16x16xf32> to vector<16xf32>
    %82 = vector.shape_cast %81 : vector<16xf32> to vector<16x1xf32>
    %83 = vector.broadcast %82 : vector<16x1xf32> to vector<16x16xf32>
    %84 = arith.subf %80, %83 : vector<16x16xf32>
    %85 = math.exp %84 : vector<16x16xf32>
    %cst_31 = arith.constant dense<0.000000e+00> : vector<16xf32>
    %86 = vector.multi_reduction <add>, %85, %cst_31 [1] : vector<16x16xf32> to vector<16xf32>
    %87 = vector.shape_cast %86 : vector<16xf32> to vector<16x1xf32>
    %88 = tpu.reciprocal %87 {approx = true} : vector<16x1xf32> -> vector<16x1xf32>
    %89 = vector.broadcast %88 : vector<16x1xf32> to vector<16x16xf32>
    %90 = arith.mulf %85, %89 : vector<16x16xf32>
    %91 = arith.truncf %90 : vector<16x16xf32> to vector<16x16xbf16>
    %cst_32 = arith.constant dense<0.000000e+00> : vector<16x32xf32>
    %92 = tpu.matmul %91, %77, %cst_32 {dimension_numbers = #tpu.dot_dimension_numbers<[1], [0], [0], [1], [0, 0, 1, 1], [], []>} : vector<16x16xbf16>, vector<16x32xbf16>, vector<16x32xf32> -> vector<16x32xf32>
    %93 = vector.extract_strided_slice %45 {offsets = [0, 64], sizes = [16, 32], strides = [1, 1]} : vector<32x128xbf16> to vector<16x32xbf16>
    %94 = vector.extract_strided_slice %54 {offsets = [0, 64], sizes = [16, 32], strides = [1, 1]} : vector<32x128xbf16> to vector<16x32xbf16>
    %95 = vector.extract_strided_slice %56 {offsets = [0, 64], sizes = [16, 32], strides = [1, 1]} : vector<32x128xbf16> to vector<16x32xbf16>
    %cst_33 = arith.constant dense<0.000000e+00> : vector<16x16xf32>
    %96 = tpu.matmul %93, %94, %cst_33 {dimension_numbers = #tpu.dot_dimension_numbers<[1], [1], [0], [0], [0, 0, 1, 0], [], []>} : vector<16x32xbf16>, vector<16x32xbf16>, vector<16x16xf32> -> vector<16x16xf32>
    %cst_34 = arith.constant -1.000000e+09 : f32
    %97 = vector.broadcast %cst_34 : f32 to vector<16x16xf32>
    %98 = arith.select %6, %96, %97 : vector<16x16xi1>, vector<16x16xf32>
    %cst_35 = arith.constant dense<0xFF800000> : vector<16xf32>
    %99 = vector.multi_reduction <maximumf>, %98, %cst_35 [1] : vector<16x16xf32> to vector<16xf32>
    %100 = vector.shape_cast %99 : vector<16xf32> to vector<16x1xf32>
    %101 = vector.broadcast %100 : vector<16x1xf32> to vector<16x16xf32>
    %102 = arith.subf %98, %101 : vector<16x16xf32>
    %103 = math.exp %102 : vector<16x16xf32>
    %cst_36 = arith.constant dense<0.000000e+00> : vector<16xf32>
    %104 = vector.multi_reduction <add>, %103, %cst_36 [1] : vector<16x16xf32> to vector<16xf32>
    %105 = vector.shape_cast %104 : vector<16xf32> to vector<16x1xf32>
    %106 = tpu.reciprocal %105 {approx = true} : vector<16x1xf32> -> vector<16x1xf32>
    %107 = vector.broadcast %106 : vector<16x1xf32> to vector<16x16xf32>
    %108 = arith.mulf %103, %107 : vector<16x16xf32>
    %109 = arith.truncf %108 : vector<16x16xf32> to vector<16x16xbf16>
    %cst_37 = arith.constant dense<0.000000e+00> : vector<16x32xf32>
    %110 = tpu.matmul %109, %95, %cst_37 {dimension_numbers = #tpu.dot_dimension_numbers<[1], [0], [0], [1], [0, 0, 1, 1], [], []>} : vector<16x16xbf16>, vector<16x32xbf16>, vector<16x32xf32> -> vector<16x32xf32>
    %111 = vector.extract_strided_slice %45 {offsets = [0, 96], sizes = [16, 32], strides = [1, 1]} : vector<32x128xbf16> to vector<16x32xbf16>
    %112 = vector.extract_strided_slice %54 {offsets = [0, 96], sizes = [16, 32], strides = [1, 1]} : vector<32x128xbf16> to vector<16x32xbf16>
    %113 = vector.extract_strided_slice %56 {offsets = [0, 96], sizes = [16, 32], strides = [1, 1]} : vector<32x128xbf16> to vector<16x32xbf16>
    %cst_38 = arith.constant dense<0.000000e+00> : vector<16x16xf32>
    %114 = tpu.matmul %111, %112, %cst_38 {dimension_numbers = #tpu.dot_dimension_numbers<[1], [1], [0], [0], [0, 0, 1, 0], [], []>} : vector<16x32xbf16>, vector<16x32xbf16>, vector<16x16xf32> -> vector<16x16xf32>
    %cst_39 = arith.constant -1.000000e+09 : f32
    %115 = vector.broadcast %cst_39 : f32 to vector<16x16xf32>
    %116 = arith.select %6, %114, %115 : vector<16x16xi1>, vector<16x16xf32>
    %cst_40 = arith.constant dense<0xFF800000> : vector<16xf32>
    %117 = vector.multi_reduction <maximumf>, %116, %cst_40 [1] : vector<16x16xf32> to vector<16xf32>
    %118 = vector.shape_cast %117 : vector<16xf32> to vector<16x1xf32>
    %119 = vector.broadcast %118 : vector<16x1xf32> to vector<16x16xf32>
    %120 = arith.subf %116, %119 : vector<16x16xf32>
    %121 = math.exp %120 : vector<16x16xf32>
    %cst_41 = arith.constant dense<0.000000e+00> : vector<16xf32>
    %122 = vector.multi_reduction <add>, %121, %cst_41 [1] : vector<16x16xf32> to vector<16xf32>
    %123 = vector.shape_cast %122 : vector<16xf32> to vector<16x1xf32>
    %124 = tpu.reciprocal %123 {approx = true} : vector<16x1xf32> -> vector<16x1xf32>
    %125 = vector.broadcast %124 : vector<16x1xf32> to vector<16x16xf32>
    %126 = arith.mulf %121, %125 : vector<16x16xf32>
    %127 = arith.truncf %126 : vector<16x16xf32> to vector<16x16xbf16>
    %cst_42 = arith.constant dense<0.000000e+00> : vector<16x32xf32>
    %128 = tpu.matmul %127, %113, %cst_42 {dimension_numbers = #tpu.dot_dimension_numbers<[1], [0], [0], [1], [0, 0, 1, 1], [], []>} : vector<16x16xbf16>, vector<16x32xbf16>, vector<16x32xf32> -> vector<16x32xf32>
    %129 = tpu.concatenate %74, %92, %110, %128 in 1 : vector<16x32xf32>, vector<16x32xf32>, vector<16x32xf32>, vector<16x32xf32> -> vector<16x128xf32>
    %130 = vector.extract_strided_slice %45 {offsets = [16, 0], sizes = [16, 32], strides = [1, 1]} : vector<32x128xbf16> to vector<16x32xbf16>
    %131 = vector.extract_strided_slice %54 {offsets = [16, 0], sizes = [16, 32], strides = [1, 1]} : vector<32x128xbf16> to vector<16x32xbf16>
    %132 = vector.extract_strided_slice %56 {offsets = [16, 0], sizes = [16, 32], strides = [1, 1]} : vector<32x128xbf16> to vector<16x32xbf16>
    %cst_43 = arith.constant dense<0.000000e+00> : vector<16x16xf32>
    %133 = tpu.matmul %130, %131, %cst_43 {dimension_numbers = #tpu.dot_dimension_numbers<[1], [1], [0], [0], [0, 0, 1, 0], [], []>} : vector<16x32xbf16>, vector<16x32xbf16>, vector<16x16xf32> -> vector<16x16xf32>
    %cst_44 = arith.constant -1.000000e+09 : f32
    %134 = vector.broadcast %cst_44 : f32 to vector<16x16xf32>
    %135 = arith.select %6, %133, %134 : vector<16x16xi1>, vector<16x16xf32>
    %cst_45 = arith.constant dense<0xFF800000> : vector<16xf32>
    %136 = vector.multi_reduction <maximumf>, %135, %cst_45 [1] : vector<16x16xf32> to vector<16xf32>
    %137 = vector.shape_cast %136 : vector<16xf32> to vector<16x1xf32>
    %138 = vector.broadcast %137 : vector<16x1xf32> to vector<16x16xf32>
    %139 = arith.subf %135, %138 : vector<16x16xf32>
    %140 = math.exp %139 : vector<16x16xf32>
    %cst_46 = arith.constant dense<0.000000e+00> : vector<16xf32>
    %141 = vector.multi_reduction <add>, %140, %cst_46 [1] : vector<16x16xf32> to vector<16xf32>
    %142 = vector.shape_cast %141 : vector<16xf32> to vector<16x1xf32>
    %143 = tpu.reciprocal %142 {approx = true} : vector<16x1xf32> -> vector<16x1xf32>
    %144 = vector.broadcast %143 : vector<16x1xf32> to vector<16x16xf32>
    %145 = arith.mulf %140, %144 : vector<16x16xf32>
    %146 = arith.truncf %145 : vector<16x16xf32> to vector<16x16xbf16>
    %cst_47 = arith.constant dense<0.000000e+00> : vector<16x32xf32>
    %147 = tpu.matmul %146, %132, %cst_47 {dimension_numbers = #tpu.dot_dimension_numbers<[1], [0], [0], [1], [0, 0, 1, 1], [], []>} : vector<16x16xbf16>, vector<16x32xbf16>, vector<16x32xf32> -> vector<16x32xf32>
    %148 = vector.extract_strided_slice %45 {offsets = [16, 32], sizes = [16, 32], strides = [1, 1]} : vector<32x128xbf16> to vector<16x32xbf16>
    %149 = vector.extract_strided_slice %54 {offsets = [16, 32], sizes = [16, 32], strides = [1, 1]} : vector<32x128xbf16> to vector<16x32xbf16>
    %150 = vector.extract_strided_slice %56 {offsets = [16, 32], sizes = [16, 32], strides = [1, 1]} : vector<32x128xbf16> to vector<16x32xbf16>
    %cst_48 = arith.constant dense<0.000000e+00> : vector<16x16xf32>
    %151 = tpu.matmul %148, %149, %cst_48 {dimension_numbers = #tpu.dot_dimension_numbers<[1], [1], [0], [0], [0, 0, 1, 0], [], []>} : vector<16x32xbf16>, vector<16x32xbf16>, vector<16x16xf32> -> vector<16x16xf32>
    %cst_49 = arith.constant -1.000000e+09 : f32
    %152 = vector.broadcast %cst_49 : f32 to vector<16x16xf32>
    %153 = arith.select %6, %151, %152 : vector<16x16xi1>, vector<16x16xf32>
    %cst_50 = arith.constant dense<0xFF800000> : vector<16xf32>
    %154 = vector.multi_reduction <maximumf>, %153, %cst_50 [1] : vector<16x16xf32> to vector<16xf32>
    %155 = vector.shape_cast %154 : vector<16xf32> to vector<16x1xf32>
    %156 = vector.broadcast %155 : vector<16x1xf32> to vector<16x16xf32>
    %157 = arith.subf %153, %156 : vector<16x16xf32>
    %158 = math.exp %157 : vector<16x16xf32>
    %cst_51 = arith.constant dense<0.000000e+00> : vector<16xf32>
    %159 = vector.multi_reduction <add>, %158, %cst_51 [1] : vector<16x16xf32> to vector<16xf32>
    %160 = vector.shape_cast %159 : vector<16xf32> to vector<16x1xf32>
    %161 = tpu.reciprocal %160 {approx = true} : vector<16x1xf32> -> vector<16x1xf32>
    %162 = vector.broadcast %161 : vector<16x1xf32> to vector<16x16xf32>
    %163 = arith.mulf %158, %162 : vector<16x16xf32>
    %164 = arith.truncf %163 : vector<16x16xf32> to vector<16x16xbf16>
    %cst_52 = arith.constant dense<0.000000e+00> : vector<16x32xf32>
    %165 = tpu.matmul %164, %150, %cst_52 {dimension_numbers = #tpu.dot_dimension_numbers<[1], [0], [0], [1], [0, 0, 1, 1], [], []>} : vector<16x16xbf16>, vector<16x32xbf16>, vector<16x32xf32> -> vector<16x32xf32>
    %166 = vector.extract_strided_slice %45 {offsets = [16, 64], sizes = [16, 32], strides = [1, 1]} : vector<32x128xbf16> to vector<16x32xbf16>
    %167 = vector.extract_strided_slice %54 {offsets = [16, 64], sizes = [16, 32], strides = [1, 1]} : vector<32x128xbf16> to vector<16x32xbf16>
    %168 = vector.extract_strided_slice %56 {offsets = [16, 64], sizes = [16, 32], strides = [1, 1]} : vector<32x128xbf16> to vector<16x32xbf16>
    %cst_53 = arith.constant dense<0.000000e+00> : vector<16x16xf32>
    %169 = tpu.matmul %166, %167, %cst_53 {dimension_numbers = #tpu.dot_dimension_numbers<[1], [1], [0], [0], [0, 0, 1, 0], [], []>} : vector<16x32xbf16>, vector<16x32xbf16>, vector<16x16xf32> -> vector<16x16xf32>
    %cst_54 = arith.constant -1.000000e+09 : f32
    %170 = vector.broadcast %cst_54 : f32 to vector<16x16xf32>
    %171 = arith.select %6, %169, %170 : vector<16x16xi1>, vector<16x16xf32>
    %cst_55 = arith.constant dense<0xFF800000> : vector<16xf32>
    %172 = vector.multi_reduction <maximumf>, %171, %cst_55 [1] : vector<16x16xf32> to vector<16xf32>
    %173 = vector.shape_cast %172 : vector<16xf32> to vector<16x1xf32>
    %174 = vector.broadcast %173 : vector<16x1xf32> to vector<16x16xf32>
    %175 = arith.subf %171, %174 : vector<16x16xf32>
    %176 = math.exp %175 : vector<16x16xf32>
    %cst_56 = arith.constant dense<0.000000e+00> : vector<16xf32>
    %177 = vector.multi_reduction <add>, %176, %cst_56 [1] : vector<16x16xf32> to vector<16xf32>
    %178 = vector.shape_cast %177 : vector<16xf32> to vector<16x1xf32>
    %179 = tpu.reciprocal %178 {approx = true} : vector<16x1xf32> -> vector<16x1xf32>
    %180 = vector.broadcast %179 : vector<16x1xf32> to vector<16x16xf32>
    %181 = arith.mulf %176, %180 : vector<16x16xf32>
    %182 = arith.truncf %181 : vector<16x16xf32> to vector<16x16xbf16>
    %cst_57 = arith.constant dense<0.000000e+00> : vector<16x32xf32>
    %183 = tpu.matmul %182, %168, %cst_57 {dimension_numbers = #tpu.dot_dimension_numbers<[1], [0], [0], [1], [0, 0, 1, 1], [], []>} : vector<16x16xbf16>, vector<16x32xbf16>, vector<16x32xf32> -> vector<16x32xf32>
    %184 = vector.extract_strided_slice %45 {offsets = [16, 96], sizes = [16, 32], strides = [1, 1]} : vector<32x128xbf16> to vector<16x32xbf16>
    %185 = vector.extract_strided_slice %54 {offsets = [16, 96], sizes = [16, 32], strides = [1, 1]} : vector<32x128xbf16> to vector<16x32xbf16>
    %186 = vector.extract_strided_slice %56 {offsets = [16, 96], sizes = [16, 32], strides = [1, 1]} : vector<32x128xbf16> to vector<16x32xbf16>
    %cst_58 = arith.constant dense<0.000000e+00> : vector<16x16xf32>
    %187 = tpu.matmul %184, %185, %cst_58 {dimension_numbers = #tpu.dot_dimension_numbers<[1], [1], [0], [0], [0, 0, 1, 0], [], []>} : vector<16x32xbf16>, vector<16x32xbf16>, vector<16x16xf32> -> vector<16x16xf32>
    %cst_59 = arith.constant -1.000000e+09 : f32
    %188 = vector.broadcast %cst_59 : f32 to vector<16x16xf32>
    %189 = arith.select %6, %187, %188 : vector<16x16xi1>, vector<16x16xf32>
    %cst_60 = arith.constant dense<0xFF800000> : vector<16xf32>
    %190 = vector.multi_reduction <maximumf>, %189, %cst_60 [1] : vector<16x16xf32> to vector<16xf32>
    %191 = vector.shape_cast %190 : vector<16xf32> to vector<16x1xf32>
    %192 = vector.broadcast %191 : vector<16x1xf32> to vector<16x16xf32>
    %193 = arith.subf %189, %192 : vector<16x16xf32>
    %194 = math.exp %193 : vector<16x16xf32>
    %cst_61 = arith.constant dense<0.000000e+00> : vector<16xf32>
    %195 = vector.multi_reduction <add>, %194, %cst_61 [1] : vector<16x16xf32> to vector<16xf32>
    %196 = vector.shape_cast %195 : vector<16xf32> to vector<16x1xf32>
    %197 = tpu.reciprocal %196 {approx = true} : vector<16x1xf32> -> vector<16x1xf32>
    %198 = vector.broadcast %197 : vector<16x1xf32> to vector<16x16xf32>
    %199 = arith.mulf %194, %198 : vector<16x16xf32>
    %200 = arith.truncf %199 : vector<16x16xf32> to vector<16x16xbf16>
    %cst_62 = arith.constant dense<0.000000e+00> : vector<16x32xf32>
    %201 = tpu.matmul %200, %186, %cst_62 {dimension_numbers = #tpu.dot_dimension_numbers<[1], [0], [0], [1], [0, 0, 1, 1], [], []>} : vector<16x16xbf16>, vector<16x32xbf16>, vector<16x32xf32> -> vector<16x32xf32>
    %202 = tpu.concatenate %147, %165, %183, %201 in 1 : vector<16x32xf32>, vector<16x32xf32>, vector<16x32xf32>, vector<16x32xf32> -> vector<16x128xf32>
    %203 = tpu.concatenate %129, %202 in 0 : vector<16x128xf32>, vector<16x128xf32> -> vector<32x128xf32>
    %c0_63 = arith.constant 0 : index
    %c0_64 = arith.constant 0 : index
    %c0_65 = arith.constant 0 : index
    %204 = vector.load %arg6[%c0_63, %c0_64, %c0_65] : memref<2x128x128xbf16, #tpu.memory_space<vmem>>, vector<1x128x128xbf16>
    %205 = vector.shape_cast %204 : vector<1x128x128xbf16> to vector<128x128xbf16>
    %206 = arith.truncf %203 : vector<32x128xf32> to vector<32x128xbf16>
    %cst_66 = arith.constant dense<0.000000e+00> : vector<32x128xf32>
    %207 = tpu.matmul %206, %205, %cst_66 {dimension_numbers = #tpu.dot_dimension_numbers<[1], [0], [0], [1], [0, 0, 1, 1], [], []>} : vector<32x128xbf16>, vector<128x128xbf16>, vector<32x128xf32> -> vector<32x128xf32>
    %208 = arith.addf %0, %207 : vector<32x128xf32>
    %c0_67 = arith.constant 0 : index
    %c0_68 = arith.constant 0 : index
    %c0_69 = arith.constant 0 : index
    %209 = vector.load %arg9[%c0_67, %c0_68, %c0_69] : memref<2x1x128xf32, #tpu.memory_space<vmem>>, vector<1x1x128xf32>
    %210 = vector.shape_cast %209 : vector<1x1x128xf32> to vector<1x128xf32>
    %c0_70 = arith.constant 0 : index
    %c0_71 = arith.constant 0 : index
    %c0_72 = arith.constant 0 : index
    %211 = vector.load %arg10[%c0_70, %c0_71, %c0_72] : memref<2x1x128xf32, #tpu.memory_space<vmem>>, vector<1x1x128xf32>
    %212 = vector.shape_cast %211 : vector<1x1x128xf32> to vector<1x128xf32>
    %cst_73 = arith.constant dense<0.000000e+00> : vector<32xf32>
    %213 = vector.multi_reduction <add>, %208, %cst_73 [1] : vector<32x128xf32> to vector<32xf32>
    %214 = vector.shape_cast %213 : vector<32xf32> to vector<32x1xf32>
    %cst_74 = arith.constant 1.280000e+02 : f32
    %215 = vector.broadcast %cst_74 : f32 to vector<32x1xf32>
    %216 = arith.divf %214, %215 : vector<32x1xf32>
    %217 = vector.broadcast %216 : vector<32x1xf32> to vector<32x128xf32>
    %218 = arith.subf %208, %217 : vector<32x128xf32>
    %219 = arith.mulf %218, %218 : vector<32x128xf32>
    %cst_75 = arith.constant dense<0.000000e+00> : vector<32xf32>
    %220 = vector.multi_reduction <add>, %219, %cst_75 [1] : vector<32x128xf32> to vector<32xf32>
    %221 = vector.shape_cast %220 : vector<32xf32> to vector<32x1xf32>
    %cst_76 = arith.constant 1.280000e+02 : f32
    %222 = vector.broadcast %cst_76 : f32 to vector<32x1xf32>
    %223 = arith.divf %221, %222 : vector<32x1xf32>
    %224 = vector.broadcast %216 : vector<32x1xf32> to vector<32x128xf32>
    %225 = arith.subf %208, %224 : vector<32x128xf32>
    %cst_77 = arith.constant 9.99999974E-6 : f32
    %226 = vector.broadcast %cst_77 : f32 to vector<32x1xf32>
    %227 = arith.addf %223, %226 : vector<32x1xf32>
    %228 = math.rsqrt %227 : vector<32x1xf32>
    %229 = vector.broadcast %228 : vector<32x1xf32> to vector<32x128xf32>
    %230 = arith.mulf %225, %229 : vector<32x128xf32>
    %231 = vector.broadcast %210 : vector<1x128xf32> to vector<32x128xf32>
    %232 = arith.mulf %230, %231 : vector<32x128xf32>
    %233 = vector.broadcast %212 : vector<1x128xf32> to vector<32x128xf32>
    %234 = arith.addf %232, %233 : vector<32x128xf32>
    %c0_78 = arith.constant 0 : index
    %c0_79 = arith.constant 0 : index
    %c0_80 = arith.constant 0 : index
    %235 = vector.load %arg11[%c0_78, %c0_79, %c0_80] : memref<2x128x256xbf16, #tpu.memory_space<vmem>>, vector<1x128x256xbf16>
    %236 = vector.shape_cast %235 : vector<1x128x256xbf16> to vector<128x256xbf16>
    %237 = arith.truncf %234 : vector<32x128xf32> to vector<32x128xbf16>
    %cst_81 = arith.constant dense<0.000000e+00> : vector<32x256xf32>
    %238 = tpu.matmul %237, %236, %cst_81 {dimension_numbers = #tpu.dot_dimension_numbers<[1], [0], [0], [1], [0, 0, 1, 1], [], []>} : vector<32x128xbf16>, vector<128x256xbf16>, vector<32x256xf32> -> vector<32x256xf32>
    %c0_82 = arith.constant 0 : index
    %c0_83 = arith.constant 0 : index
    %c0_84 = arith.constant 0 : index
    %239 = vector.load %arg12[%c0_82, %c0_83, %c0_84] : memref<2x1x256xf32, #tpu.memory_space<vmem>>, vector<1x1x256xf32>
    %240 = vector.shape_cast %239 : vector<1x1x256xf32> to vector<1x256xf32>
    %241 = vector.broadcast %240 : vector<1x256xf32> to vector<32x256xf32>
    %242 = arith.addf %238, %241 : vector<32x256xf32>
    %cst_85 = arith.constant 5.000000e-01 : f32
    %243 = vector.broadcast %cst_85 : f32 to vector<32x256xf32>
    %244 = arith.mulf %243, %242 : vector<32x256xf32>
    %cst_86 = arith.constant 4.471500e-02 : f32
    %245 = vector.broadcast %cst_86 : f32 to vector<32x256xf32>
    %246 = arith.mulf %245, %242 : vector<32x256xf32>
    %247 = arith.mulf %246, %242 : vector<32x256xf32>
    %248 = arith.mulf %247, %242 : vector<32x256xf32>
    %249 = arith.addf %242, %248 : vector<32x256xf32>
    %cst_87 = arith.constant 0.797884583 : f32
    %250 = vector.broadcast %cst_87 : f32 to vector<32x256xf32>
    %251 = arith.mulf %250, %249 : vector<32x256xf32>
    %252 = math.tanh %251 : vector<32x256xf32>
    %cst_88 = arith.constant 1.000000e+00 : f32
    %253 = vector.broadcast %cst_88 : f32 to vector<32x256xf32>
    %254 = arith.addf %253, %252 : vector<32x256xf32>
    %255 = arith.mulf %244, %254 : vector<32x256xf32>
    %c0_89 = arith.constant 0 : index
    %c0_90 = arith.constant 0 : index
    %c0_91 = arith.constant 0 : index
    %256 = vector.load %arg13[%c0_89, %c0_90, %c0_91] : memref<2x256x128xbf16, #tpu.memory_space<vmem>>, vector<1x256x128xbf16>
    %257 = vector.shape_cast %256 : vector<1x256x128xbf16> to vector<256x128xbf16>
    %258 = arith.truncf %255 : vector<32x256xf32> to vector<32x256xbf16>
    %cst_92 = arith.constant dense<0.000000e+00> : vector<32x128xf32>
    %259 = tpu.matmul %258, %257, %cst_92 {dimension_numbers = #tpu.dot_dimension_numbers<[1], [0], [0], [1], [0, 0, 1, 1], [], []>} : vector<32x256xbf16>, vector<256x128xbf16>, vector<32x128xf32> -> vector<32x128xf32>
    %260 = arith.addf %208, %259 : vector<32x128xf32>
    %c0_93 = arith.constant 0 : index
    %c0_94 = arith.constant 0 : index
    %c0_95 = arith.constant 0 : index
    %261 = vector.load %arg14[%c0_93, %c0_94, %c0_95] : memref<2x1x128xf32, #tpu.memory_space<vmem>>, vector<1x1x128xf32>
    %262 = vector.shape_cast %261 : vector<1x1x128xf32> to vector<1x128xf32>
    %263 = vector.broadcast %262 : vector<1x128xf32> to vector<32x128xf32>
    %264 = arith.addf %260, %263 : vector<32x128xf32>
    %c1 = arith.constant 1 : index
    %c0_96 = arith.constant 0 : index
    %c0_97 = arith.constant 0 : index
    %265 = vector.load %arg7[%c1, %c0_96, %c0_97] : memref<2x1x128xf32, #tpu.memory_space<vmem>>, vector<1x1x128xf32>
    %266 = vector.shape_cast %265 : vector<1x1x128xf32> to vector<1x128xf32>
    %c1_98 = arith.constant 1 : index
    %c0_99 = arith.constant 0 : index
    %c0_100 = arith.constant 0 : index
    %267 = vector.load %arg8[%c1_98, %c0_99, %c0_100] : memref<2x1x128xf32, #tpu.memory_space<vmem>>, vector<1x1x128xf32>
    %268 = vector.shape_cast %267 : vector<1x1x128xf32> to vector<1x128xf32>
    %cst_101 = arith.constant dense<0.000000e+00> : vector<32xf32>
    %269 = vector.multi_reduction <add>, %264, %cst_101 [1] : vector<32x128xf32> to vector<32xf32>
    %270 = vector.shape_cast %269 : vector<32xf32> to vector<32x1xf32>
    %cst_102 = arith.constant 1.280000e+02 : f32
    %271 = vector.broadcast %cst_102 : f32 to vector<32x1xf32>
    %272 = arith.divf %270, %271 : vector<32x1xf32>
    %273 = vector.broadcast %272 : vector<32x1xf32> to vector<32x128xf32>
    %274 = arith.subf %264, %273 : vector<32x128xf32>
    %275 = arith.mulf %274, %274 : vector<32x128xf32>
    %cst_103 = arith.constant dense<0.000000e+00> : vector<32xf32>
    %276 = vector.multi_reduction <add>, %275, %cst_103 [1] : vector<32x128xf32> to vector<32xf32>
    %277 = vector.shape_cast %276 : vector<32xf32> to vector<32x1xf32>
    %cst_104 = arith.constant 1.280000e+02 : f32
    %278 = vector.broadcast %cst_104 : f32 to vector<32x1xf32>
    %279 = arith.divf %277, %278 : vector<32x1xf32>
    %280 = vector.broadcast %272 : vector<32x1xf32> to vector<32x128xf32>
    %281 = arith.subf %264, %280 : vector<32x128xf32>
    %cst_105 = arith.constant 9.99999974E-6 : f32
    %282 = vector.broadcast %cst_105 : f32 to vector<32x1xf32>
    %283 = arith.addf %279, %282 : vector<32x1xf32>
    %284 = math.rsqrt %283 : vector<32x1xf32>
    %285 = vector.broadcast %284 : vector<32x1xf32> to vector<32x128xf32>
    %286 = arith.mulf %281, %285 : vector<32x128xf32>
    %287 = vector.broadcast %266 : vector<1x128xf32> to vector<32x128xf32>
    %288 = arith.mulf %286, %287 : vector<32x128xf32>
    %289 = vector.broadcast %268 : vector<1x128xf32> to vector<32x128xf32>
    %290 = arith.addf %288, %289 : vector<32x128xf32>
    %c1_106 = arith.constant 1 : index
    %c0_107 = arith.constant 0 : index
    %c0_108 = arith.constant 0 : index
    %291 = vector.load %arg5[%c1_106, %c0_107, %c0_108] : memref<2x128x384xbf16, #tpu.memory_space<vmem>>, vector<1x128x384xbf16>
    %292 = vector.shape_cast %291 : vector<1x128x384xbf16> to vector<128x384xbf16>
    %293 = arith.truncf %290 : vector<32x128xf32> to vector<32x128xbf16>
    %cst_109 = arith.constant dense<0.000000e+00> : vector<32x384xf32>
    %294 = tpu.matmul %293, %292, %cst_109 {dimension_numbers = #tpu.dot_dimension_numbers<[1], [0], [0], [1], [0, 0, 1, 1], [], []>} : vector<32x128xbf16>, vector<128x384xbf16>, vector<32x384xf32> -> vector<32x384xf32>
    %295 = vector.extract_strided_slice %294 {offsets = [0, 0], sizes = [32, 128], strides = [1, 1]} : vector<32x384xf32> to vector<32x128xf32>
    %296 = arith.mulf %295, %1 : vector<32x128xf32>
    %c112_i32_110 = arith.constant 112 : i32
    %297 = tpu.dynamic_rotate %295 by %c112_i32_110 dim 1 : vector<32x128xf32>, i32 -> vector<32x128xf32>
    %298 = arith.mulf %297, %2 : vector<32x128xf32>
    %299 = arith.addf %296, %298 : vector<32x128xf32>
    %c16_i32_111 = arith.constant 16 : i32
    %300 = tpu.dynamic_rotate %295 by %c16_i32_111 dim 1 : vector<32x128xf32>, i32 -> vector<32x128xf32>
    %301 = arith.mulf %300, %3 : vector<32x128xf32>
    %302 = arith.addf %299, %301 : vector<32x128xf32>
    %303 = arith.truncf %302 : vector<32x128xf32> to vector<32x128xbf16>
    %304 = vector.extract_strided_slice %294 {offsets = [0, 128], sizes = [32, 128], strides = [1, 1]} : vector<32x384xf32> to vector<32x128xf32>
    %305 = arith.mulf %304, %1 : vector<32x128xf32>
    %c112_i32_112 = arith.constant 112 : i32
    %306 = tpu.dynamic_rotate %304 by %c112_i32_112 dim 1 : vector<32x128xf32>, i32 -> vector<32x128xf32>
    %307 = arith.mulf %306, %2 : vector<32x128xf32>
    %308 = arith.addf %305, %307 : vector<32x128xf32>
    %c16_i32_113 = arith.constant 16 : i32
    %309 = tpu.dynamic_rotate %304 by %c16_i32_113 dim 1 : vector<32x128xf32>, i32 -> vector<32x128xf32>
    %310 = arith.mulf %309, %3 : vector<32x128xf32>
    %311 = arith.addf %308, %310 : vector<32x128xf32>
    %312 = arith.truncf %311 : vector<32x128xf32> to vector<32x128xbf16>
    %313 = vector.extract_strided_slice %294 {offsets = [0, 256], sizes = [32, 128], strides = [1, 1]} : vector<32x384xf32> to vector<32x128xf32>
    %314 = arith.truncf %313 : vector<32x128xf32> to vector<32x128xbf16>
    %315 = vector.extract_strided_slice %303 {offsets = [0, 0], sizes = [16, 32], strides = [1, 1]} : vector<32x128xbf16> to vector<16x32xbf16>
    %316 = vector.extract_strided_slice %312 {offsets = [0, 0], sizes = [16, 32], strides = [1, 1]} : vector<32x128xbf16> to vector<16x32xbf16>
    %317 = vector.extract_strided_slice %314 {offsets = [0, 0], sizes = [16, 32], strides = [1, 1]} : vector<32x128xbf16> to vector<16x32xbf16>
    %cst_114 = arith.constant dense<0.000000e+00> : vector<16x16xf32>
    %318 = tpu.matmul %315, %316, %cst_114 {dimension_numbers = #tpu.dot_dimension_numbers<[1], [1], [0], [0], [0, 0, 1, 0], [], []>} : vector<16x32xbf16>, vector<16x32xbf16>, vector<16x16xf32> -> vector<16x16xf32>
    %cst_115 = arith.constant -1.000000e+09 : f32
    %319 = vector.broadcast %cst_115 : f32 to vector<16x16xf32>
    %320 = arith.select %6, %318, %319 : vector<16x16xi1>, vector<16x16xf32>
    %cst_116 = arith.constant dense<0xFF800000> : vector<16xf32>
    %321 = vector.multi_reduction <maximumf>, %320, %cst_116 [1] : vector<16x16xf32> to vector<16xf32>
    %322 = vector.shape_cast %321 : vector<16xf32> to vector<16x1xf32>
    %323 = vector.broadcast %322 : vector<16x1xf32> to vector<16x16xf32>
    %324 = arith.subf %320, %323 : vector<16x16xf32>
    %325 = math.exp %324 : vector<16x16xf32>
    %cst_117 = arith.constant dense<0.000000e+00> : vector<16xf32>
    %326 = vector.multi_reduction <add>, %325, %cst_117 [1] : vector<16x16xf32> to vector<16xf32>
    %327 = vector.shape_cast %326 : vector<16xf32> to vector<16x1xf32>
    %328 = tpu.reciprocal %327 {approx = true} : vector<16x1xf32> -> vector<16x1xf32>
    %329 = vector.broadcast %328 : vector<16x1xf32> to vector<16x16xf32>
    %330 = arith.mulf %325, %329 : vector<16x16xf32>
    %331 = arith.truncf %330 : vector<16x16xf32> to vector<16x16xbf16>
    %cst_118 = arith.constant dense<0.000000e+00> : vector<16x32xf32>
    %332 = tpu.matmul %331, %317, %cst_118 {dimension_numbers = #tpu.dot_dimension_numbers<[1], [0], [0], [1], [0, 0, 1, 1], [], []>} : vector<16x16xbf16>, vector<16x32xbf16>, vector<16x32xf32> -> vector<16x32xf32>
    %333 = vector.extract_strided_slice %303 {offsets = [0, 32], sizes = [16, 32], strides = [1, 1]} : vector<32x128xbf16> to vector<16x32xbf16>
    %334 = vector.extract_strided_slice %312 {offsets = [0, 32], sizes = [16, 32], strides = [1, 1]} : vector<32x128xbf16> to vector<16x32xbf16>
    %335 = vector.extract_strided_slice %314 {offsets = [0, 32], sizes = [16, 32], strides = [1, 1]} : vector<32x128xbf16> to vector<16x32xbf16>
    %cst_119 = arith.constant dense<0.000000e+00> : vector<16x16xf32>
    %336 = tpu.matmul %333, %334, %cst_119 {dimension_numbers = #tpu.dot_dimension_numbers<[1], [1], [0], [0], [0, 0, 1, 0], [], []>} : vector<16x32xbf16>, vector<16x32xbf16>, vector<16x16xf32> -> vector<16x16xf32>
    %cst_120 = arith.constant -1.000000e+09 : f32
    %337 = vector.broadcast %cst_120 : f32 to vector<16x16xf32>
    %338 = arith.select %6, %336, %337 : vector<16x16xi1>, vector<16x16xf32>
    %cst_121 = arith.constant dense<0xFF800000> : vector<16xf32>
    %339 = vector.multi_reduction <maximumf>, %338, %cst_121 [1] : vector<16x16xf32> to vector<16xf32>
    %340 = vector.shape_cast %339 : vector<16xf32> to vector<16x1xf32>
    %341 = vector.broadcast %340 : vector<16x1xf32> to vector<16x16xf32>
    %342 = arith.subf %338, %341 : vector<16x16xf32>
    %343 = math.exp %342 : vector<16x16xf32>
    %cst_122 = arith.constant dense<0.000000e+00> : vector<16xf32>
    %344 = vector.multi_reduction <add>, %343, %cst_122 [1] : vector<16x16xf32> to vector<16xf32>
    %345 = vector.shape_cast %344 : vector<16xf32> to vector<16x1xf32>
    %346 = tpu.reciprocal %345 {approx = true} : vector<16x1xf32> -> vector<16x1xf32>
    %347 = vector.broadcast %346 : vector<16x1xf32> to vector<16x16xf32>
    %348 = arith.mulf %343, %347 : vector<16x16xf32>
    %349 = arith.truncf %348 : vector<16x16xf32> to vector<16x16xbf16>
    %cst_123 = arith.constant dense<0.000000e+00> : vector<16x32xf32>
    %350 = tpu.matmul %349, %335, %cst_123 {dimension_numbers = #tpu.dot_dimension_numbers<[1], [0], [0], [1], [0, 0, 1, 1], [], []>} : vector<16x16xbf16>, vector<16x32xbf16>, vector<16x32xf32> -> vector<16x32xf32>
    %351 = vector.extract_strided_slice %303 {offsets = [0, 64], sizes = [16, 32], strides = [1, 1]} : vector<32x128xbf16> to vector<16x32xbf16>
    %352 = vector.extract_strided_slice %312 {offsets = [0, 64], sizes = [16, 32], strides = [1, 1]} : vector<32x128xbf16> to vector<16x32xbf16>
    %353 = vector.extract_strided_slice %314 {offsets = [0, 64], sizes = [16, 32], strides = [1, 1]} : vector<32x128xbf16> to vector<16x32xbf16>
    %cst_124 = arith.constant dense<0.000000e+00> : vector<16x16xf32>
    %354 = tpu.matmul %351, %352, %cst_124 {dimension_numbers = #tpu.dot_dimension_numbers<[1], [1], [0], [0], [0, 0, 1, 0], [], []>} : vector<16x32xbf16>, vector<16x32xbf16>, vector<16x16xf32> -> vector<16x16xf32>
    %cst_125 = arith.constant -1.000000e+09 : f32
    %355 = vector.broadcast %cst_125 : f32 to vector<16x16xf32>
    %356 = arith.select %6, %354, %355 : vector<16x16xi1>, vector<16x16xf32>
    %cst_126 = arith.constant dense<0xFF800000> : vector<16xf32>
    %357 = vector.multi_reduction <maximumf>, %356, %cst_126 [1] : vector<16x16xf32> to vector<16xf32>
    %358 = vector.shape_cast %357 : vector<16xf32> to vector<16x1xf32>
    %359 = vector.broadcast %358 : vector<16x1xf32> to vector<16x16xf32>
    %360 = arith.subf %356, %359 : vector<16x16xf32>
    %361 = math.exp %360 : vector<16x16xf32>
    %cst_127 = arith.constant dense<0.000000e+00> : vector<16xf32>
    %362 = vector.multi_reduction <add>, %361, %cst_127 [1] : vector<16x16xf32> to vector<16xf32>
    %363 = vector.shape_cast %362 : vector<16xf32> to vector<16x1xf32>
    %364 = tpu.reciprocal %363 {approx = true} : vector<16x1xf32> -> vector<16x1xf32>
    %365 = vector.broadcast %364 : vector<16x1xf32> to vector<16x16xf32>
    %366 = arith.mulf %361, %365 : vector<16x16xf32>
    %367 = arith.truncf %366 : vector<16x16xf32> to vector<16x16xbf16>
    %cst_128 = arith.constant dense<0.000000e+00> : vector<16x32xf32>
    %368 = tpu.matmul %367, %353, %cst_128 {dimension_numbers = #tpu.dot_dimension_numbers<[1], [0], [0], [1], [0, 0, 1, 1], [], []>} : vector<16x16xbf16>, vector<16x32xbf16>, vector<16x32xf32> -> vector<16x32xf32>
    %369 = vector.extract_strided_slice %303 {offsets = [0, 96], sizes = [16, 32], strides = [1, 1]} : vector<32x128xbf16> to vector<16x32xbf16>
    %370 = vector.extract_strided_slice %312 {offsets = [0, 96], sizes = [16, 32], strides = [1, 1]} : vector<32x128xbf16> to vector<16x32xbf16>
    %371 = vector.extract_strided_slice %314 {offsets = [0, 96], sizes = [16, 32], strides = [1, 1]} : vector<32x128xbf16> to vector<16x32xbf16>
    %cst_129 = arith.constant dense<0.000000e+00> : vector<16x16xf32>
    %372 = tpu.matmul %369, %370, %cst_129 {dimension_numbers = #tpu.dot_dimension_numbers<[1], [1], [0], [0], [0, 0, 1, 0], [], []>} : vector<16x32xbf16>, vector<16x32xbf16>, vector<16x16xf32> -> vector<16x16xf32>
    %cst_130 = arith.constant -1.000000e+09 : f32
    %373 = vector.broadcast %cst_130 : f32 to vector<16x16xf32>
    %374 = arith.select %6, %372, %373 : vector<16x16xi1>, vector<16x16xf32>
    %cst_131 = arith.constant dense<0xFF800000> : vector<16xf32>
    %375 = vector.multi_reduction <maximumf>, %374, %cst_131 [1] : vector<16x16xf32> to vector<16xf32>
    %376 = vector.shape_cast %375 : vector<16xf32> to vector<16x1xf32>
    %377 = vector.broadcast %376 : vector<16x1xf32> to vector<16x16xf32>
    %378 = arith.subf %374, %377 : vector<16x16xf32>
    %379 = math.exp %378 : vector<16x16xf32>
    %cst_132 = arith.constant dense<0.000000e+00> : vector<16xf32>
    %380 = vector.multi_reduction <add>, %379, %cst_132 [1] : vector<16x16xf32> to vector<16xf32>
    %381 = vector.shape_cast %380 : vector<16xf32> to vector<16x1xf32>
    %382 = tpu.reciprocal %381 {approx = true} : vector<16x1xf32> -> vector<16x1xf32>
    %383 = vector.broadcast %382 : vector<16x1xf32> to vector<16x16xf32>
    %384 = arith.mulf %379, %383 : vector<16x16xf32>
    %385 = arith.truncf %384 : vector<16x16xf32> to vector<16x16xbf16>
    %cst_133 = arith.constant dense<0.000000e+00> : vector<16x32xf32>
    %386 = tpu.matmul %385, %371, %cst_133 {dimension_numbers = #tpu.dot_dimension_numbers<[1], [0], [0], [1], [0, 0, 1, 1], [], []>} : vector<16x16xbf16>, vector<16x32xbf16>, vector<16x32xf32> -> vector<16x32xf32>
    %387 = tpu.concatenate %332, %350, %368, %386 in 1 : vector<16x32xf32>, vector<16x32xf32>, vector<16x32xf32>, vector<16x32xf32> -> vector<16x128xf32>
    %388 = vector.extract_strided_slice %303 {offsets = [16, 0], sizes = [16, 32], strides = [1, 1]} : vector<32x128xbf16> to vector<16x32xbf16>
    %389 = vector.extract_strided_slice %312 {offsets = [16, 0], sizes = [16, 32], strides = [1, 1]} : vector<32x128xbf16> to vector<16x32xbf16>
    %390 = vector.extract_strided_slice %314 {offsets = [16, 0], sizes = [16, 32], strides = [1, 1]} : vector<32x128xbf16> to vector<16x32xbf16>
    %cst_134 = arith.constant dense<0.000000e+00> : vector<16x16xf32>
    %391 = tpu.matmul %388, %389, %cst_134 {dimension_numbers = #tpu.dot_dimension_numbers<[1], [1], [0], [0], [0, 0, 1, 0], [], []>} : vector<16x32xbf16>, vector<16x32xbf16>, vector<16x16xf32> -> vector<16x16xf32>
    %cst_135 = arith.constant -1.000000e+09 : f32
    %392 = vector.broadcast %cst_135 : f32 to vector<16x16xf32>
    %393 = arith.select %6, %391, %392 : vector<16x16xi1>, vector<16x16xf32>
    %cst_136 = arith.constant dense<0xFF800000> : vector<16xf32>
    %394 = vector.multi_reduction <maximumf>, %393, %cst_136 [1] : vector<16x16xf32> to vector<16xf32>
    %395 = vector.shape_cast %394 : vector<16xf32> to vector<16x1xf32>
    %396 = vector.broadcast %395 : vector<16x1xf32> to vector<16x16xf32>
    %397 = arith.subf %393, %396 : vector<16x16xf32>
    %398 = math.exp %397 : vector<16x16xf32>
    %cst_137 = arith.constant dense<0.000000e+00> : vector<16xf32>
    %399 = vector.multi_reduction <add>, %398, %cst_137 [1] : vector<16x16xf32> to vector<16xf32>
    %400 = vector.shape_cast %399 : vector<16xf32> to vector<16x1xf32>
    %401 = tpu.reciprocal %400 {approx = true} : vector<16x1xf32> -> vector<16x1xf32>
    %402 = vector.broadcast %401 : vector<16x1xf32> to vector<16x16xf32>
    %403 = arith.mulf %398, %402 : vector<16x16xf32>
    %404 = arith.truncf %403 : vector<16x16xf32> to vector<16x16xbf16>
    %cst_138 = arith.constant dense<0.000000e+00> : vector<16x32xf32>
    %405 = tpu.matmul %404, %390, %cst_138 {dimension_numbers = #tpu.dot_dimension_numbers<[1], [0], [0], [1], [0, 0, 1, 1], [], []>} : vector<16x16xbf16>, vector<16x32xbf16>, vector<16x32xf32> -> vector<16x32xf32>
    %406 = vector.extract_strided_slice %303 {offsets = [16, 32], sizes = [16, 32], strides = [1, 1]} : vector<32x128xbf16> to vector<16x32xbf16>
    %407 = vector.extract_strided_slice %312 {offsets = [16, 32], sizes = [16, 32], strides = [1, 1]} : vector<32x128xbf16> to vector<16x32xbf16>
    %408 = vector.extract_strided_slice %314 {offsets = [16, 32], sizes = [16, 32], strides = [1, 1]} : vector<32x128xbf16> to vector<16x32xbf16>
    %cst_139 = arith.constant dense<0.000000e+00> : vector<16x16xf32>
    %409 = tpu.matmul %406, %407, %cst_139 {dimension_numbers = #tpu.dot_dimension_numbers<[1], [1], [0], [0], [0, 0, 1, 0], [], []>} : vector<16x32xbf16>, vector<16x32xbf16>, vector<16x16xf32> -> vector<16x16xf32>
    %cst_140 = arith.constant -1.000000e+09 : f32
    %410 = vector.broadcast %cst_140 : f32 to vector<16x16xf32>
    %411 = arith.select %6, %409, %410 : vector<16x16xi1>, vector<16x16xf32>
    %cst_141 = arith.constant dense<0xFF800000> : vector<16xf32>
    %412 = vector.multi_reduction <maximumf>, %411, %cst_141 [1] : vector<16x16xf32> to vector<16xf32>
    %413 = vector.shape_cast %412 : vector<16xf32> to vector<16x1xf32>
    %414 = vector.broadcast %413 : vector<16x1xf32> to vector<16x16xf32>
    %415 = arith.subf %411, %414 : vector<16x16xf32>
    %416 = math.exp %415 : vector<16x16xf32>
    %cst_142 = arith.constant dense<0.000000e+00> : vector<16xf32>
    %417 = vector.multi_reduction <add>, %416, %cst_142 [1] : vector<16x16xf32> to vector<16xf32>
    %418 = vector.shape_cast %417 : vector<16xf32> to vector<16x1xf32>
    %419 = tpu.reciprocal %418 {approx = true} : vector<16x1xf32> -> vector<16x1xf32>
    %420 = vector.broadcast %419 : vector<16x1xf32> to vector<16x16xf32>
    %421 = arith.mulf %416, %420 : vector<16x16xf32>
    %422 = arith.truncf %421 : vector<16x16xf32> to vector<16x16xbf16>
    %cst_143 = arith.constant dense<0.000000e+00> : vector<16x32xf32>
    %423 = tpu.matmul %422, %408, %cst_143 {dimension_numbers = #tpu.dot_dimension_numbers<[1], [0], [0], [1], [0, 0, 1, 1], [], []>} : vector<16x16xbf16>, vector<16x32xbf16>, vector<16x32xf32> -> vector<16x32xf32>
    %424 = vector.extract_strided_slice %303 {offsets = [16, 64], sizes = [16, 32], strides = [1, 1]} : vector<32x128xbf16> to vector<16x32xbf16>
    %425 = vector.extract_strided_slice %312 {offsets = [16, 64], sizes = [16, 32], strides = [1, 1]} : vector<32x128xbf16> to vector<16x32xbf16>
    %426 = vector.extract_strided_slice %314 {offsets = [16, 64], sizes = [16, 32], strides = [1, 1]} : vector<32x128xbf16> to vector<16x32xbf16>
    %cst_144 = arith.constant dense<0.000000e+00> : vector<16x16xf32>
    %427 = tpu.matmul %424, %425, %cst_144 {dimension_numbers = #tpu.dot_dimension_numbers<[1], [1], [0], [0], [0, 0, 1, 0], [], []>} : vector<16x32xbf16>, vector<16x32xbf16>, vector<16x16xf32> -> vector<16x16xf32>
    %cst_145 = arith.constant -1.000000e+09 : f32
    %428 = vector.broadcast %cst_145 : f32 to vector<16x16xf32>
    %429 = arith.select %6, %427, %428 : vector<16x16xi1>, vector<16x16xf32>
    %cst_146 = arith.constant dense<0xFF800000> : vector<16xf32>
    %430 = vector.multi_reduction <maximumf>, %429, %cst_146 [1] : vector<16x16xf32> to vector<16xf32>
    %431 = vector.shape_cast %430 : vector<16xf32> to vector<16x1xf32>
    %432 = vector.broadcast %431 : vector<16x1xf32> to vector<16x16xf32>
    %433 = arith.subf %429, %432 : vector<16x16xf32>
    %434 = math.exp %433 : vector<16x16xf32>
    %cst_147 = arith.constant dense<0.000000e+00> : vector<16xf32>
    %435 = vector.multi_reduction <add>, %434, %cst_147 [1] : vector<16x16xf32> to vector<16xf32>
    %436 = vector.shape_cast %435 : vector<16xf32> to vector<16x1xf32>
    %437 = tpu.reciprocal %436 {approx = true} : vector<16x1xf32> -> vector<16x1xf32>
    %438 = vector.broadcast %437 : vector<16x1xf32> to vector<16x16xf32>
    %439 = arith.mulf %434, %438 : vector<16x16xf32>
    %440 = arith.truncf %439 : vector<16x16xf32> to vector<16x16xbf16>
    %cst_148 = arith.constant dense<0.000000e+00> : vector<16x32xf32>
    %441 = tpu.matmul %440, %426, %cst_148 {dimension_numbers = #tpu.dot_dimension_numbers<[1], [0], [0], [1], [0, 0, 1, 1], [], []>} : vector<16x16xbf16>, vector<16x32xbf16>, vector<16x32xf32> -> vector<16x32xf32>
    %442 = vector.extract_strided_slice %303 {offsets = [16, 96], sizes = [16, 32], strides = [1, 1]} : vector<32x128xbf16> to vector<16x32xbf16>
    %443 = vector.extract_strided_slice %312 {offsets = [16, 96], sizes = [16, 32], strides = [1, 1]} : vector<32x128xbf16> to vector<16x32xbf16>
    %444 = vector.extract_strided_slice %314 {offsets = [16, 96], sizes = [16, 32], strides = [1, 1]} : vector<32x128xbf16> to vector<16x32xbf16>
    %cst_149 = arith.constant dense<0.000000e+00> : vector<16x16xf32>
    %445 = tpu.matmul %442, %443, %cst_149 {dimension_numbers = #tpu.dot_dimension_numbers<[1], [1], [0], [0], [0, 0, 1, 0], [], []>} : vector<16x32xbf16>, vector<16x32xbf16>, vector<16x16xf32> -> vector<16x16xf32>
    %cst_150 = arith.constant -1.000000e+09 : f32
    %446 = vector.broadcast %cst_150 : f32 to vector<16x16xf32>
    %447 = arith.select %6, %445, %446 : vector<16x16xi1>, vector<16x16xf32>
    %cst_151 = arith.constant dense<0xFF800000> : vector<16xf32>
    %448 = vector.multi_reduction <maximumf>, %447, %cst_151 [1] : vector<16x16xf32> to vector<16xf32>
    %449 = vector.shape_cast %448 : vector<16xf32> to vector<16x1xf32>
    %450 = vector.broadcast %449 : vector<16x1xf32> to vector<16x16xf32>
    %451 = arith.subf %447, %450 : vector<16x16xf32>
    %452 = math.exp %451 : vector<16x16xf32>
    %cst_152 = arith.constant dense<0.000000e+00> : vector<16xf32>
    %453 = vector.multi_reduction <add>, %452, %cst_152 [1] : vector<16x16xf32> to vector<16xf32>
    %454 = vector.shape_cast %453 : vector<16xf32> to vector<16x1xf32>
    %455 = tpu.reciprocal %454 {approx = true} : vector<16x1xf32> -> vector<16x1xf32>
    %456 = vector.broadcast %455 : vector<16x1xf32> to vector<16x16xf32>
    %457 = arith.mulf %452, %456 : vector<16x16xf32>
    %458 = arith.truncf %457 : vector<16x16xf32> to vector<16x16xbf16>
    %cst_153 = arith.constant dense<0.000000e+00> : vector<16x32xf32>
    %459 = tpu.matmul %458, %444, %cst_153 {dimension_numbers = #tpu.dot_dimension_numbers<[1], [0], [0], [1], [0, 0, 1, 1], [], []>} : vector<16x16xbf16>, vector<16x32xbf16>, vector<16x32xf32> -> vector<16x32xf32>
    %460 = tpu.concatenate %405, %423, %441, %459 in 1 : vector<16x32xf32>, vector<16x32xf32>, vector<16x32xf32>, vector<16x32xf32> -> vector<16x128xf32>
    %461 = tpu.concatenate %387, %460 in 0 : vector<16x128xf32>, vector<16x128xf32> -> vector<32x128xf32>
    %c1_154 = arith.constant 1 : index
    %c0_155 = arith.constant 0 : index
    %c0_156 = arith.constant 0 : index
    %462 = vector.load %arg6[%c1_154, %c0_155, %c0_156] : memref<2x128x128xbf16, #tpu.memory_space<vmem>>, vector<1x128x128xbf16>
    %463 = vector.shape_cast %462 : vector<1x128x128xbf16> to vector<128x128xbf16>
    %464 = arith.truncf %461 : vector<32x128xf32> to vector<32x128xbf16>
    %cst_157 = arith.constant dense<0.000000e+00> : vector<32x128xf32>
    %465 = tpu.matmul %464, %463, %cst_157 {dimension_numbers = #tpu.dot_dimension_numbers<[1], [0], [0], [1], [0, 0, 1, 1], [], []>} : vector<32x128xbf16>, vector<128x128xbf16>, vector<32x128xf32> -> vector<32x128xf32>
    %466 = arith.addf %264, %465 : vector<32x128xf32>
    %c1_158 = arith.constant 1 : index
    %c0_159 = arith.constant 0 : index
    %c0_160 = arith.constant 0 : index
    %467 = vector.load %arg9[%c1_158, %c0_159, %c0_160] : memref<2x1x128xf32, #tpu.memory_space<vmem>>, vector<1x1x128xf32>
    %468 = vector.shape_cast %467 : vector<1x1x128xf32> to vector<1x128xf32>
    %c1_161 = arith.constant 1 : index
    %c0_162 = arith.constant 0 : index
    %c0_163 = arith.constant 0 : index
    %469 = vector.load %arg10[%c1_161, %c0_162, %c0_163] : memref<2x1x128xf32, #tpu.memory_space<vmem>>, vector<1x1x128xf32>
    %470 = vector.shape_cast %469 : vector<1x1x128xf32> to vector<1x128xf32>
    %cst_164 = arith.constant dense<0.000000e+00> : vector<32xf32>
    %471 = vector.multi_reduction <add>, %466, %cst_164 [1] : vector<32x128xf32> to vector<32xf32>
    %472 = vector.shape_cast %471 : vector<32xf32> to vector<32x1xf32>
    %cst_165 = arith.constant 1.280000e+02 : f32
    %473 = vector.broadcast %cst_165 : f32 to vector<32x1xf32>
    %474 = arith.divf %472, %473 : vector<32x1xf32>
    %475 = vector.broadcast %474 : vector<32x1xf32> to vector<32x128xf32>
    %476 = arith.subf %466, %475 : vector<32x128xf32>
    %477 = arith.mulf %476, %476 : vector<32x128xf32>
    %cst_166 = arith.constant dense<0.000000e+00> : vector<32xf32>
    %478 = vector.multi_reduction <add>, %477, %cst_166 [1] : vector<32x128xf32> to vector<32xf32>
    %479 = vector.shape_cast %478 : vector<32xf32> to vector<32x1xf32>
    %cst_167 = arith.constant 1.280000e+02 : f32
    %480 = vector.broadcast %cst_167 : f32 to vector<32x1xf32>
    %481 = arith.divf %479, %480 : vector<32x1xf32>
    %482 = vector.broadcast %474 : vector<32x1xf32> to vector<32x128xf32>
    %483 = arith.subf %466, %482 : vector<32x128xf32>
    %cst_168 = arith.constant 9.99999974E-6 : f32
    %484 = vector.broadcast %cst_168 : f32 to vector<32x1xf32>
    %485 = arith.addf %481, %484 : vector<32x1xf32>
    %486 = math.rsqrt %485 : vector<32x1xf32>
    %487 = vector.broadcast %486 : vector<32x1xf32> to vector<32x128xf32>
    %488 = arith.mulf %483, %487 : vector<32x128xf32>
    %489 = vector.broadcast %468 : vector<1x128xf32> to vector<32x128xf32>
    %490 = arith.mulf %488, %489 : vector<32x128xf32>
    %491 = vector.broadcast %470 : vector<1x128xf32> to vector<32x128xf32>
    %492 = arith.addf %490, %491 : vector<32x128xf32>
    %c1_169 = arith.constant 1 : index
    %c0_170 = arith.constant 0 : index
    %c0_171 = arith.constant 0 : index
    %493 = vector.load %arg11[%c1_169, %c0_170, %c0_171] : memref<2x128x256xbf16, #tpu.memory_space<vmem>>, vector<1x128x256xbf16>
    %494 = vector.shape_cast %493 : vector<1x128x256xbf16> to vector<128x256xbf16>
    %495 = arith.truncf %492 : vector<32x128xf32> to vector<32x128xbf16>
    %cst_172 = arith.constant dense<0.000000e+00> : vector<32x256xf32>
    %496 = tpu.matmul %495, %494, %cst_172 {dimension_numbers = #tpu.dot_dimension_numbers<[1], [0], [0], [1], [0, 0, 1, 1], [], []>} : vector<32x128xbf16>, vector<128x256xbf16>, vector<32x256xf32> -> vector<32x256xf32>
    %c1_173 = arith.constant 1 : index
    %c0_174 = arith.constant 0 : index
    %c0_175 = arith.constant 0 : index
    %497 = vector.load %arg12[%c1_173, %c0_174, %c0_175] : memref<2x1x256xf32, #tpu.memory_space<vmem>>, vector<1x1x256xf32>
    %498 = vector.shape_cast %497 : vector<1x1x256xf32> to vector<1x256xf32>
    %499 = vector.broadcast %498 : vector<1x256xf32> to vector<32x256xf32>
    %500 = arith.addf %496, %499 : vector<32x256xf32>
    %cst_176 = arith.constant 5.000000e-01 : f32
    %501 = vector.broadcast %cst_176 : f32 to vector<32x256xf32>
    %502 = arith.mulf %501, %500 : vector<32x256xf32>
    %cst_177 = arith.constant 4.471500e-02 : f32
    %503 = vector.broadcast %cst_177 : f32 to vector<32x256xf32>
    %504 = arith.mulf %503, %500 : vector<32x256xf32>
    %505 = arith.mulf %504, %500 : vector<32x256xf32>
    %506 = arith.mulf %505, %500 : vector<32x256xf32>
    %507 = arith.addf %500, %506 : vector<32x256xf32>
    %cst_178 = arith.constant 0.797884583 : f32
    %508 = vector.broadcast %cst_178 : f32 to vector<32x256xf32>
    %509 = arith.mulf %508, %507 : vector<32x256xf32>
    %510 = math.tanh %509 : vector<32x256xf32>
    %cst_179 = arith.constant 1.000000e+00 : f32
    %511 = vector.broadcast %cst_179 : f32 to vector<32x256xf32>
    %512 = arith.addf %511, %510 : vector<32x256xf32>
    %513 = arith.mulf %502, %512 : vector<32x256xf32>
    %c1_180 = arith.constant 1 : index
    %c0_181 = arith.constant 0 : index
    %c0_182 = arith.constant 0 : index
    %514 = vector.load %arg13[%c1_180, %c0_181, %c0_182] : memref<2x256x128xbf16, #tpu.memory_space<vmem>>, vector<1x256x128xbf16>
    %515 = vector.shape_cast %514 : vector<1x256x128xbf16> to vector<256x128xbf16>
    %516 = arith.truncf %513 : vector<32x256xf32> to vector<32x256xbf16>
    %cst_183 = arith.constant dense<0.000000e+00> : vector<32x128xf32>
    %517 = tpu.matmul %516, %515, %cst_183 {dimension_numbers = #tpu.dot_dimension_numbers<[1], [0], [0], [1], [0, 0, 1, 1], [], []>} : vector<32x256xbf16>, vector<256x128xbf16>, vector<32x128xf32> -> vector<32x128xf32>
    %518 = arith.addf %466, %517 : vector<32x128xf32>
    %c1_184 = arith.constant 1 : index
    %c0_185 = arith.constant 0 : index
    %c0_186 = arith.constant 0 : index
    %519 = vector.load %arg14[%c1_184, %c0_185, %c0_186] : memref<2x1x128xf32, #tpu.memory_space<vmem>>, vector<1x1x128xf32>
    %520 = vector.shape_cast %519 : vector<1x1x128xf32> to vector<1x128xf32>
    %521 = vector.broadcast %520 : vector<1x128xf32> to vector<32x128xf32>
    %522 = arith.addf %518, %521 : vector<32x128xf32>
    %c0_187 = arith.constant 0 : index
    %c0_188 = arith.constant 0 : index
    %523 = vector.load %arg15[%c0_187, %c0_188] : memref<1x128xf32, #tpu.memory_space<vmem>>, vector<1x128xf32>
    %c0_189 = arith.constant 0 : index
    %c0_190 = arith.constant 0 : index
    %524 = vector.load %arg16[%c0_189, %c0_190] : memref<1x128xf32, #tpu.memory_space<vmem>>, vector<1x128xf32>
    %cst_191 = arith.constant dense<0.000000e+00> : vector<32xf32>
    %525 = vector.multi_reduction <add>, %522, %cst_191 [1] : vector<32x128xf32> to vector<32xf32>
    %526 = vector.shape_cast %525 : vector<32xf32> to vector<32x1xf32>
    %cst_192 = arith.constant 1.280000e+02 : f32
    %527 = vector.broadcast %cst_192 : f32 to vector<32x1xf32>
    %528 = arith.divf %526, %527 : vector<32x1xf32>
    %529 = vector.broadcast %528 : vector<32x1xf32> to vector<32x128xf32>
    %530 = arith.subf %522, %529 : vector<32x128xf32>
    %531 = arith.mulf %530, %530 : vector<32x128xf32>
    %cst_193 = arith.constant dense<0.000000e+00> : vector<32xf32>
    %532 = vector.multi_reduction <add>, %531, %cst_193 [1] : vector<32x128xf32> to vector<32xf32>
    %533 = vector.shape_cast %532 : vector<32xf32> to vector<32x1xf32>
    %cst_194 = arith.constant 1.280000e+02 : f32
    %534 = vector.broadcast %cst_194 : f32 to vector<32x1xf32>
    %535 = arith.divf %533, %534 : vector<32x1xf32>
    %536 = vector.broadcast %528 : vector<32x1xf32> to vector<32x128xf32>
    %537 = arith.subf %522, %536 : vector<32x128xf32>
    %cst_195 = arith.constant 9.99999974E-6 : f32
    %538 = vector.broadcast %cst_195 : f32 to vector<32x1xf32>
    %539 = arith.addf %535, %538 : vector<32x1xf32>
    %540 = math.rsqrt %539 : vector<32x1xf32>
    %541 = vector.broadcast %540 : vector<32x1xf32> to vector<32x128xf32>
    %542 = arith.mulf %537, %541 : vector<32x128xf32>
    %543 = vector.broadcast %523 : vector<1x128xf32> to vector<32x128xf32>
    %544 = arith.mulf %542, %543 : vector<32x128xf32>
    %545 = vector.broadcast %524 : vector<1x128xf32> to vector<32x128xf32>
    %546 = arith.addf %544, %545 : vector<32x128xf32>
    %c0_196 = arith.constant 0 : index
    %c0_197 = arith.constant 0 : index
    %547 = vector.load %arg17[%c0_196, %c0_197] : memref<128x512xbf16, #tpu.memory_space<vmem>>, vector<128x512xbf16>
    %548 = arith.truncf %546 : vector<32x128xf32> to vector<32x128xbf16>
    %cst_198 = arith.constant dense<0.000000e+00> : vector<32x512xf32>
    %549 = tpu.matmul %548, %547, %cst_198 {dimension_numbers = #tpu.dot_dimension_numbers<[1], [0], [0], [1], [0, 0, 1, 1], [], []>} : vector<32x128xbf16>, vector<128x512xbf16>, vector<32x512xf32> -> vector<32x512xf32>
    %c0_199 = arith.constant 0 : index
    %c0_200 = arith.constant 0 : index
    %550 = vector.load %arg18[%c0_199, %c0_200] : memref<32x512xf32, #tpu.memory_space<vmem>>, vector<32x512xf32>
    tpu.vector_store %arg18[%c0_199, %c0_200], %549 {strides = array<i32>} : memref<32x512xf32, #tpu.memory_space<vmem>>, vector<32x512xf32>,
    return
  }
  func.func @transform_0(%arg0: i32) -> (i32, i32) {
    %c0_i32 = arith.constant 0 : i32
    %c0_i32_0 = arith.constant 0 : i32
    %c0_i32_1 = arith.constant 0 : i32
    return %c0_i32, %c0_i32_0 : i32, i32
  }
  func.func @transform_1(%arg0: i32) -> (i32, i32) {
    %c0_i32 = arith.constant 0 : i32
    %c0_i32_0 = arith.constant 0 : i32
    %c0_i32_1 = arith.constant 0 : i32
    return %c0_i32, %c0_i32_0 : i32, i32
  }
  func.func @transform_2(%arg0: i32) -> (i32, i32) {
    %c0_i32 = arith.constant 0 : i32
    %c0_i32_0 = arith.constant 0 : i32
    %c0_i32_1 = arith.constant 0 : i32
    return %c0_i32, %c0_i32_0 : i32, i32
  }
  func.func @transform_3(%arg0: i32) -> (i32, i32) {
    %c0_i32 = arith.constant 0 : i32
    %c0_i32_0 = arith.constant 0 : i32
    %c0_i32_1 = arith.constant 0 : i32
    return %c0_i32, %c0_i32_0 : i32, i32
  }
  func.func @transform_4(%arg0: i32) -> (i32, i32, i32) {
    %c0_i32 = arith.constant 0 : i32
    %c0_i32_0 = arith.constant 0 : i32
    %c0_i32_1 = arith.constant 0 : i32
    %c0_i32_2 = arith.constant 0 : i32
    return %c0_i32, %c0_i32_0, %c0_i32_1 : i32, i32, i32
  }
  func.func @transform_5(%arg0: i32) -> (i32, i32, i32) {
    %c0_i32 = arith.constant 0 : i32
    %c0_i32_0 = arith.constant 0 : i32
    %c0_i32_1 = arith.constant 0 : i32
    %c0_i32_2 = arith.constant 0 : i32
    return %c0_i32, %c0_i32_0, %c0_i32_1 : i32, i32, i32
  }
  func.func @transform_6(%arg0: i32) -> (i32, i32, i32) {
    %c0_i32 = arith.constant 0 : i32
    %c0_i32_0 = arith.constant 0 : i32
    %c0_i32_1 = arith.constant 0 : i32
    %c0_i32_2 = arith.constant 0 : i32
    return %c0_i32, %c0_i32_0, %c0_i32_1 : i32, i32, i32
  }
  func.func @transform_7(%arg0: i32) -> (i32, i32, i32) {
    %c0_i32 = arith.constant 0 : i32
    %c0_i32_0 = arith.constant 0 : i32
    %c0_i32_1 = arith.constant 0 : i32
    %c0_i32_2 = arith.constant 0 : i32
    return %c0_i32, %c0_i32_0, %c0_i32_1 : i32, i32, i32
  }
  func.func @transform_8(%arg0: i32) -> (i32, i32, i32) {
    %c0_i32 = arith.constant 0 : i32
    %c0_i32_0 = arith.constant 0 : i32
    %c0_i32_1 = arith.constant 0 : i32
    %c0_i32_2 = arith.constant 0 : i32
    return %c0_i32, %c0_i32_0, %c0_i32_1 : i32, i32, i32
  }
  func.func @transform_9(%arg0: i32) -> (i32, i32, i32) {
    %c0_i32 = arith.constant 0 : i32
    %c0_i32_0 = arith.constant 0 : i32
    %c0_i32_1 = arith.constant 0 : i32
    %c0_i32_2 = arith.constant 0 : i32
    return %c0_i32, %c0_i32_0, %c0_i32_1 : i32, i32, i32
  }
  func.func @transform_10(%arg0: i32) -> (i32, i32, i32) {
    %c0_i32 = arith.constant 0 : i32
    %c0_i32_0 = arith.constant 0 : i32
    %c0_i32_1 = arith.constant 0 : i32
    %c0_i32_2 = arith.constant 0 : i32
    return %c0_i32, %c0_i32_0, %c0_i32_1 : i32, i32, i32
  }
  func.func @transform_11(%arg0: i32) -> (i32, i32, i32) {
    %c0_i32 = arith.constant 0 : i32
    %c0_i32_0 = arith.constant 0 : i32
    %c0_i32_1 = arith.constant 0 : i32
    %c0_i32_2 = arith.constant 0 : i32
    return %c0_i32, %c0_i32_0, %c0_i32_1 : i32, i32, i32
  }
  func.func @transform_12(%arg0: i32) -> (i32, i32, i32) {
    %c0_i32 = arith.constant 0 : i32
    %c0_i32_0 = arith.constant 0 : i32
    %c0_i32_1 = arith.constant 0 : i32
    %c0_i32_2 = arith.constant 0 : i32
    return %c0_i32, %c0_i32_0, %c0_i32_1 : i32, i32, i32
  }
  func.func @transform_13(%arg0: i32) -> (i32, i32, i32) {
    %c0_i32 = arith.constant 0 : i32
    %c0_i32_0 = arith.constant 0 : i32
    %c0_i32_1 = arith.constant 0 : i32
    %c0_i32_2 = arith.constant 0 : i32
    return %c0_i32, %c0_i32_0, %c0_i32_1 : i32, i32, i32
  }
  func.func @transform_14(%arg0: i32) -> (i32, i32) {
    %c0_i32 = arith.constant 0 : i32
    %c0_i32_0 = arith.constant 0 : i32
    %c0_i32_1 = arith.constant 0 : i32
    return %c0_i32, %c0_i32_0 : i32, i32
  }
  func.func @transform_15(%arg0: i32) -> (i32, i32) {
    %c0_i32 = arith.constant 0 : i32
    %c0_i32_0 = arith.constant 0 : i32
    %c0_i32_1 = arith.constant 0 : i32
    return %c0_i32, %c0_i32_0 : i32, i32
  }
  func.func @transform_16(%arg0: i32) -> (i32, i32) {
    %c0_i32 = arith.constant 0 : i32
    %c0_i32_0 = arith.constant 0 : i32
    %c0_i32_1 = arith.constant 0 : i32
    return %c0_i32, %c0_i32_0 : i32, i32
  }
  func.func @transform_17(%arg0: i32) -> (i32, i32) {
    %c0_i32 = arith.constant 0 : i32
    %c0_i32_0 = arith.constant 0 : i32
    %c0_i32_1 = arith.constant 0 : i32
    return %c0_i32, %c0_i32_0 : i32, i32
  }
}

</mosaic_0001>

<bundles_post_ra>
// kernel: tile.23
= control target key start
LH: loop header
LB: loop body
LE: loop exit
PB: predicated region body
PF: predicated region fallthrough
CT: control target
= control target key end

     0   :  { %s312_s0 = inlined_call_operand.vmem [shape: f32[16,32], index: 0, kind: input, shape index: {}]   ;;  %s313_s1 = inlined_call_operand.vmem [shape: f32[2,16,4,32], index: 1, kind: output, shape index: {}]  }
   0x1   :  { %v4_v0 = vld [vmem:[%s312_s0] ss:$0 sm:$0xff]  ;;  %v113_v1 = vld [vmem:[%s312_s0 + $0x1] ss:$0 sm:$0xff]  ;;  %v116_v2 = vld [vmem:[%s312_s0 + $0x2] ss:$0 sm:$0xff] }
   0x2   :  { %5 = vst [vmem:[%s313_s1] sm:$0xf] %v4_v0  ;;  %112 = vst [vmem:[%s313_s1 + $0x40] sm:$0xf] %v4_v0  ;;  %v119_v3 = vld [vmem:[%s312_s0 + $0x3] ss:$0 sm:$0xff] }
   0x3   :  { %114 = vst [vmem:[%s313_s1 + $0x4] sm:$0xf] %v113_v1  ;;  %115 = vst [vmem:[%s313_s1 + $0x44] sm:$0xf] %v113_v1  ;;  %v122_v4 = vld [vmem:[%s312_s0 + $0x4] ss:$0 sm:$0xff] }
   0x4   :  { %117 = vst [vmem:[%s313_s1 + $0x8] sm:$0xf] %v116_v2  ;;  %118 = vst [vmem:[%s313_s1 + $0x48] sm:$0xf] %v116_v2  ;;  %v125_v5 = vld [vmem:[%s312_s0 + $0x5] ss:$0 sm:$0xff] }
   0x5   :  { %120 = vst [vmem:[%s313_s1 + $0xc] sm:$0xf] %v119_v3  ;;  %121 = vst [vmem:[%s313_s1 + $0x4c] sm:$0xf] %v119_v3  ;;  %v128_v6 = vld [vmem:[%s312_s0 + $0x6] ss:$0 sm:$0xff] }
   0x6   :  { %123 = vst [vmem:[%s313_s1 + $0x10] sm:$0xf] %v122_v4  ;;  %124 = vst [vmem:[%s313_s1 + $0x50] sm:$0xf] %v122_v4  ;;  %v131_v7 = vld [vmem:[%s312_s0 + $0x7] ss:$0 sm:$0xff] }
   0x7   :  { %126 = vst [vmem:[%s313_s1 + $0x14] sm:$0xf] %v125_v5  ;;  %127 = vst [vmem:[%s313_s1 + $0x54] sm:$0xf] %v125_v5  ;;  %v134_v8 = vld [vmem:[%s312_s0 + $0x8] ss:$0 sm:$0xff] }
   0x8   :  { %129 = vst [vmem:[%s313_s1 + $0x18] sm:$0xf] %v128_v6  ;;  %130 = vst [vmem:[%s313_s1 + $0x58] sm:$0xf] %v128_v6  ;;  %v137_v9 = vld [vmem:[%s312_s0 + $0x9] ss:$0 sm:$0xff] }
   0x9   :  { %132 = vst [vmem:[%s313_s1 + $0x1c] sm:$0xf] %v131_v7  ;;  %133 = vst [vmem:[%s313_s1 + $0x5c] sm:$0xf] %v131_v7  ;;  %v140_v10 = vld [vmem:[%s312_s0 + $0xa] ss:$0 sm:$0xff] }
   0xa   :  { %135 = vst [vmem:[%s313_s1 + $0x20] sm:$0xf] %v134_v8  ;;  %136 = vst [vmem:[%s313_s1 + $0x60] sm:$0xf] %v134_v8  ;;  %v143_v11 = vld [vmem:[%s312_s0 + $0xb] ss:$0 sm:$0xff] }
   0xb   :  { %138 = vst [vmem:[%s313_s1 + $0x24] sm:$0xf] %v137_v9  ;;  %139 = vst [vmem:[%s313_s1 + $0x64] sm:$0xf] %v137_v9  ;;  %v146_v12 = vld [vmem:[%s312_s0 + $0xc] ss:$0 sm:$0xff] }
   0xc   :  { %141 = vst [vmem:[%s313_s1 + $0x28] sm:$0xf] %v140_v10  ;;  %142 = vst [vmem:[%s313_s1 + $0x68] sm:$0xf] %v140_v10  ;;  %v149_v13 = vld [vmem:[%s312_s0 + $0xd] ss:$0 sm:$0xff] }
   0xd   :  { %144 = vst [vmem:[%s313_s1 + $0x2c] sm:$0xf] %v143_v11  ;;  %145 = vst [vmem:[%s313_s1 + $0x6c] sm:$0xf] %v143_v11  ;;  %v152_v14 = vld [vmem:[%s312_s0 + $0xe] ss:$0 sm:$0xff] }
   0xe   :  { %147 = vst [vmem:[%s313_s1 + $0x30] sm:$0xf] %v146_v12  ;;  %148 = vst [vmem:[%s313_s1 + $0x70] sm:$0xf] %v146_v12  ;;  %v155_v15 = vld [vmem:[%s312_s0 + $0xf] ss:$0 sm:$0xff] }
   0xf   :  { %150 = vst [vmem:[%s313_s1 + $0x34] sm:$0xf] %v149_v13  ;;  %151 = vst [vmem:[%s313_s1 + $0x74] sm:$0xf] %v149_v13 }
  0x10   :  { %153 = vst [vmem:[%s313_s1 + $0x38] sm:$0xf] %v152_v14  ;;  %154 = vst [vmem:[%s313_s1 + $0x78] sm:$0xf] %v152_v14 }
  0x11   :  { %156 = vst [vmem:[%s313_s1 + $0x3c] sm:$0xf] %v155_v15  ;;  %157 = vst [vmem:[%s313_s1 + $0x7c] sm:$0xf] %v155_v15 }

// kernel: tile.24
= control target key start
LH: loop header
LB: loop body
LE: loop exit
PB: predicated region body
PF: predicated region fallthrough
CT: control target
= control target key end

     0   :  { %vm163_vm0 = vcmask 1047556   ;;  %s399_s10 = smov 96   ;;  %vm165_vm1 = vcmask 261120   ;;  %s401_s21 = smov 32   ;;  %vm202_vm2 = vcmask 1048320   ;;  %vm245_vm3 = vcmask 785920   ;;  %s580_s0 = inlined_call_operand.vmem [shape: f32[2,16,4,32], index: 0, kind: input, shape index: {}]   ;;  %s581_s1 = inlined_call_operand.vmem [shape: f32[32,128], index: 1, kind: output, shape index: {}]  }
   0x1   :  { %v377_v0 = vld [vmem:[%s580_s0 + $0x1c] sm:$0xf]  ;;  %v378_v1 = vld [vmem:[%s580_s0 + $0x18] sm:$0xf]  ;;  %v379_v2 = vld [vmem:[%s580_s0 + $0x14] sm:$0xf] }
   0x2   :  { %129 = vst [vmem:[#allocation0 + $0x38] sm:$0xf] %v377_v0  ;;  %134 = vst [vmem:[#allocation0 + $0x30] sm:$0xf] %v378_v1  ;;  %v380_v3 = vld [vmem:[%s580_s0 + $0x10] sm:$0xf] }
   0x3   :  { %139 = vst [vmem:[#allocation0 + $0x28] sm:$0xf] %v379_v2  ;;  %v381_v4 = vld [vmem:[%s580_s0 + $0xc] sm:$0xf]  ;;  %v382_v5 = vld [vmem:[%s580_s0 + $0x8] sm:$0xf] }
   0x4   :  { %144 = vst [vmem:[#allocation0 + $0x20] sm:$0xf] %v380_v3  ;;  %149 = vst [vmem:[#allocation0 + $0x18] sm:$0xf] %v381_v4  ;;  %v383_v6 = vld [vmem:[%s580_s0 + $0x4] sm:$0xf] }
   0x5   :  { %154 = vst [vmem:[#allocation0 + $0x10] sm:$0xf] %v382_v5  ;;  %v159_v7 = vld [vmem:[%s580_s0] sm:$0xf]  ;;  %158 = vst [vmem:[#allocation0 + $0x8] sm:$0xf] %v383_v6 }
   0x6   :  { %160 = vst [vmem:[#allocation0] sm:$0xf] %v159_v7  ;;  %v361_v8 = vld [vmem:[%s580_s0 + $0x5c] sm:$0xf]  ;;  %v362_v9 = vld [vmem:[%s580_s0 + $0x58] sm:$0xf] }
   0x7   :  { %v363_v10 = vld [vmem:[%s580_s0 + $0x54] sm:$0xf]  ;;  %49 = vst [vmem:[#allocation0 + $0xb8] sm:$0xf] %v361_v8  ;;  %54 = vst [vmem:[#allocation0 + $0xb0] sm:$0xf] %v362_v9 }
   0x8   :  { %59 = vst [vmem:[#allocation0 + $0xa8] sm:$0xf] %v363_v10  ;;  %v364_v11 = vld [vmem:[%s580_s0 + $0x50] sm:$0xf]  ;;  %v365_v12 = vld [vmem:[%s580_s0 + $0x4c] sm:$0xf] }
   0x9   :  { %v366_v13 = vld [vmem:[%s580_s0 + $0x48] sm:$0xf]  ;;  %64 = vst [vmem:[#allocation0 + $0xa0] sm:$0xf] %v364_v11  ;;  %69 = vst [vmem:[#allocation0 + $0x98] sm:$0xf] %v365_v12 }
   0xa   :  { %74 = vst [vmem:[#allocation0 + $0x90] sm:$0xf] %v366_v13  ;;  %v367_v14 = vld [vmem:[%s580_s0 + $0x44] sm:$0xf]  ;;  %v368_v15 = vld [vmem:[%s580_s0 + $0x40] sm:$0xf] }
   0xb   :  { %v369_v16 = vld [vmem:[%s580_s0 + $0x3c] sm:$0xf]  ;;  %79 = vst [vmem:[#allocation0 + $0x88] sm:$0xf] %v367_v14  ;;  %84 = vst [vmem:[#allocation0 + $0x80] sm:$0xf] %v368_v15 }
   0xc   :  { %89 = vst [vmem:[#allocation0 + $0x78] sm:$0xf] %v369_v16  ;;  %v370_v17 = vld [vmem:[%s580_s0 + $0x38] sm:$0xf]  ;;  %v371_v18 = vld [vmem:[%s580_s0 + $0x34] sm:$0xf] }
   0xd   :  { %v372_v19 = vld [vmem:[%s580_s0 + $0x30] sm:$0xf]  ;;  %94 = vst [vmem:[#allocation0 + $0x70] sm:$0xf] %v370_v17  ;;  %99 = vst [vmem:[#allocation0 + $0x68] sm:$0xf] %v371_v18 }
   0xe   :  { %104 = vst [vmem:[#allocation0 + $0x60] sm:$0xf] %v372_v19  ;;  %v373_v20 = vld [vmem:[%s580_s0 + $0x2c] sm:$0xf]  ;;  %v374_v21 = vld [vmem:[%s580_s0 + $0x28] sm:$0xf] }
   0xf   :  { %v375_v22 = vld [vmem:[%s580_s0 + $0x24] sm:$0xf]  ;;  %109 = vst [vmem:[#allocation0 + $0x58] sm:$0xf] %v373_v20  ;;  %114 = vst [vmem:[#allocation0 + $0x50] sm:$0xf] %v374_v21 }
  0x10   :  { %119 = vst [vmem:[#allocation0 + $0x48] sm:$0xf] %v375_v22  ;;  %v376_v23 = vld [vmem:[%s580_s0 + $0x20] sm:$0xf]  ;;  %v353_v24 = vld [vmem:[%s580_s0 + $0x7c] sm:$0xf] }
  0x11   :  { %v354_v25 = vld [vmem:[%s580_s0 + $0x78] sm:$0xf]  ;;  %124 = vst [vmem:[#allocation0 + $0x40] sm:$0xf] %v376_v23  ;;  %9 = vst [vmem:[#allocation0 + $0xf8] sm:$0xf] %v353_v24 }
  0x12   :  { %v197_v26 = vld [vmem:[#allocation0 + $0x3] ss:$8 sm:$0xf0]   ;;  %14 = vst [vmem:[#allocation0 + $0xf0] sm:$0xf] %v354_v25  ;;  %vm288_vm4 = vcmask 523520  }
  0x13   :  { %v355_v27 = vld [vmem:[%s580_s0 + $0x74] sm:$0xf]  ;;  %v195_v28 = vld [vmem:[#allocation0 + $0x3] ss:$8 sm:$0xf]  }
  0x14   :  { %19 = vst [vmem:[#allocation0 + $0xe8] sm:$0xf] %v355_v27  ;;  %v356_v29 = vld [vmem:[%s580_s0 + $0x70] sm:$0xf]  ;;  %v199_v30 = vsel %vm163_vm0, %v197_v26, %v195_v28  ;;  %v357_v31 = vld [vmem:[%s580_s0 + $0x6c] sm:$0xf] }
  0x15   :  { %24 = vst [vmem:[#allocation0 + $0xe0] sm:$0xf] %v356_v29  ;;  %v358_v32 = vld [vmem:[%s580_s0 + $0x68] sm:$0xf]  ;;  %v359_v33 = vld [vmem:[%s580_s0 + $0x64] sm:$0xf]  ;;  %200 = vrot.lane.b32.xlu0 %v199_v30, %s399_s10 }
  0x16   :  { %v218_v34 = vld [vmem:[#allocation0 + $0x83] ss:$8 sm:$0xf0]   ;;  %29 = vst [vmem:[#allocation0 + $0xd8] sm:$0xf] %v357_v31 }
  0x17   :  { %34 = vst [vmem:[#allocation0 + $0xd0] sm:$0xf] %v358_v32  ;;  %39 = vst [vmem:[#allocation0 + $0xc8] sm:$0xf] %v359_v33  ;;  %v360_v35 = vld [vmem:[%s580_s0 + $0x60] sm:$0xf] }
  0x18   :  { %v216_v36 = vld [vmem:[#allocation0 + $0x83] ss:$8 sm:$0xf]   ;;  %44 = vst [vmem:[#allocation0 + $0xc0] sm:$0xf] %v360_v35  ;;  %s400_s0 = smov 64  }
  0x19   :  { %v220_v37 = vsel %vm163_vm0, %v218_v34, %v216_v36  ;;  %v207_v38 = vld [vmem:[#allocation0 + $0x43] ss:$8 sm:$0xf0]   ;;  %v238_v39 = vld [vmem:[#allocation0 + $0x2] ss:$8 sm:$0xf]  }
  0x1a   :  { %221 = vrot.lane.b32.xlu1 %v220_v37, %s399_s10  ;;  %v205_v40 = vld [vmem:[#allocation0 + $0x43] ss:$8 sm:$0xf]   ;;  %v240_v41 = vld [vmem:[#allocation0 + $0x2] ss:$8 sm:$0xf0]  }
  0x1b   :  { %v209_v42 = vsel %vm163_vm0, %v207_v38, %v205_v40  ;;  %v250_v44 = vld [vmem:[#allocation0 + $0x42] ss:$8 sm:$0xf0]   ;;  %v242_v45 = vsel %vm163_vm0, %v240_v41, %v238_v39  ;;  %v281_v52 = vld [vmem:[#allocation0 + $0x1] ss:$8 sm:$0xf]  }
  0x1c   :  { %210 = vrot.lane.b32.xlu0 %v209_v42, %s399_s10  ;;  %v229_v43 = vld [vmem:[#allocation0 + $0xc3] ss:$8 sm:$0xf0]   ;;  %v248_v46 = vld [vmem:[#allocation0 + $0x42] ss:$8 sm:$0xf]  }
  0x1d   :  { %v259_v47 = vld [vmem:[#allocation0 + $0x82] ss:$8 sm:$0xf]   ;;  %v252_v53 = vsel %vm163_vm0, %v250_v44, %v248_v46  ;;  %v283_v55 = vld [vmem:[#allocation0 + $0x1] ss:$8 sm:$0xf0]  }
  0x1e   :  { %v261_v49 = vld [vmem:[#allocation0 + $0x82] ss:$8 sm:$0xf0]   ;;  %v161_v56 = vld [vmem:[#allocation0] ss:$8 sm:$0xf]   ;;  %v285_v4 = vsel %vm163_vm0, %v283_v55, %v281_v52 }
  0x1f   :  { %v227_v48 = vld [vmem:[#allocation0 + $0xc3] ss:$8 sm:$0xf]   ;;  %v272_v51 = vld [vmem:[#allocation0 + $0xc2] ss:$8 sm:$0xf0]   ;;  %v263_v54 = vsel %vm163_vm0, %v261_v49, %v259_v47 }
  0x20   :  { %v231_v50 = vsel %vm163_vm0, %v229_v43, %v227_v48  ;;  %243 = vrot.lane.b32.xlu0 %v242_v45, %s400_s0  ;;  %v270_v57 = vld [vmem:[#allocation0 + $0xc2] ss:$8 sm:$0xf]   ;;  %v162_v58 = vld [vmem:[#allocation0] ss:$8 sm:$0xf0]  }
  0x21   :  { %232 = vrot.lane.b32.xlu1 %v231_v50, %s399_s10  ;;  %v164_v59 = vsel %vm163_vm0, %v162_v58, %v161_v56  ;;  %v177_v60 = vld [vmem:[#allocation0 + $0x80] ss:$8 sm:$0xf]   ;;  %v291_v62 = vld [vmem:[#allocation0 + $0x41] ss:$8 sm:$0xf]   ;;  %v274_v3 = vsel %vm163_vm0, %v272_v51, %v270_v57 }
  0x22   :  { %v179_v61 = vld [vmem:[#allocation0 + $0x80] ss:$8 sm:$0xf0]   ;;  %v293_v63 = vld [vmem:[#allocation0 + $0x41] ss:$8 sm:$0xf0]  }
  0x23   :  { %166 = vst.msk [vmem:[%s581_s1] sm:$0xff] %vm165_vm1, %v164_v59   ;;  %v181_v0 = vsel %vm163_vm0, %v179_v61, %v177_v60  ;;  %v168_v1 = vld [vmem:[#allocation0 + $0x40] ss:$8 sm:$0xf]   ;;  %v295_v11 = vsel %vm163_vm0, %v293_v63, %v291_v62 }
  0x24   :  { %264 = vrot.lane.b32.xlu0 %v263_v54, %s400_s0  ;;  %v170_v2 = vld [vmem:[#allocation0 + $0x40] ss:$8 sm:$0xf0]   ;;  %385 = vst.msk [vmem:[%s581_s1 + $0x10] sm:$0xff] %vm165_vm1, %v181_v0  }
  0x25   :  { %253 = vrot.lane.b32.xlu1 %v252_v53, %s400_s0  ;;  %v172_v5 = vsel %vm163_vm0, %v170_v2, %v168_v1  ;;  %v186_v6 = vld [vmem:[#allocation0 + $0xc0] ss:$8 sm:$0xf]   ;;  %v302_v8 = vld [vmem:[#allocation0 + $0x81] ss:$8 sm:$0xf]  }
  0x26   :  { %v188_v7 = vld [vmem:[#allocation0 + $0xc0] ss:$8 sm:$0xf0]   ;;  %v304_v9 = vld [vmem:[#allocation0 + $0x81] ss:$8 sm:$0xf0]  }
  0x27   :  { %384 = vst.msk [vmem:[%s581_s1 + $0x8] sm:$0xff] %vm165_vm1, %v172_v5   ;;  %v190_v10 = vsel %vm163_vm0, %v188_v7, %v186_v6  ;;  %v306_v12 = vsel %vm163_vm0, %v304_v9, %v302_v8  ;;  %v313_v13 = vld [vmem:[#allocation0 + $0xc1] ss:$8 sm:$0xf]  }
  0x28   :  { %386 = vst.msk [vmem:[%s581_s1 + $0x18] sm:$0xff] %vm165_vm1, %v190_v10   ;;  %286 = vrot.lane.b32.xlu0 %v285_v4, %s401_s21  ;;  %v315_v14 = vld [vmem:[#allocation0 + $0xc1] ss:$8 sm:$0xf0]  }
  0x29   :  { %275 = vrot.lane.b32.xlu1 %v274_v3, %s400_s0  ;;  %v317_v15 = vsel %vm163_vm0, %v315_v14, %v313_v13 }
  0x2c   :  { %307 = vrot.lane.b32.xlu0 %v306_v12, %s401_s21 }
  0x2d   :  { %296 = vrot.lane.b32.xlu1 %v295_v11, %s401_s21 }
  0x31   :  { %318 = vrot.lane.b32.xlu1 %v317_v15, %s401_s21 }
  0x87   :  { %v201_v16 = vpop.permute.xlu0 %200  }
  0x88   :  { %203 = vst.msk [vmem:[%s581_s1] sm:$0xff] %vm202_vm2, %v201_v16  }
  0x8c   :  { %v222_v17 = vpop.permute.xlu1 %221  }
  0x8d   :  { %388 = vst.msk [vmem:[%s581_s1 + $0x10] sm:$0xff] %vm202_vm2, %v222_v17  }
  0x8e   :  { %v211_v18 = vpop.permute.xlu0 %210  }
  0x8f   :  { %387 = vst.msk [vmem:[%s581_s1 + $0x8] sm:$0xff] %vm202_vm2, %v211_v18  }
  0x92   :  { %v244_v20 = vpop.permute.xlu0 %243  }
  0x93   :  { %v233_v19 = vpop.permute.xlu1 %232   ;;  %246 = vst.msk [vmem:[%s581_s1] sm:$0xff] %vm245_vm3, %v244_v20  }
  0x94   :  { %389 = vst.msk [vmem:[%s581_s1 + $0x18] sm:$0xff] %vm202_vm2, %v233_v19  }
  0x96   :  { %v265_v22 = vpop.permute.xlu0 %264  }
  0x97   :  { %v254_v21 = vpop.permute.xlu1 %253   ;;  %391 = vst.msk [vmem:[%s581_s1 + $0x10] sm:$0xff] %vm245_vm3, %v265_v22  }
  0x98   :  { %390 = vst.msk [vmem:[%s581_s1 + $0x8] sm:$0xff] %vm245_vm3, %v254_v21  }
  0x9a   :  { %v287_v24 = vpop.permute.xlu0 %286  }
  0x9b   :  { %v276_v23 = vpop.permute.xlu1 %275   ;;  %289 = vst.msk [vmem:[%s581_s1] sm:$0xff] %vm288_vm4, %v287_v24  }
  0x9c   :  { %392 = vst.msk [vmem:[%s581_s1 + $0x18] sm:$0xff] %vm245_vm3, %v276_v23  }
  0x9e   :  { %v308_v26 = vpop.permute.xlu0 %307  }
  0x9f   :  { %v297_v25 = vpop.permute.xlu1 %296   ;;  %394 = vst.msk [vmem:[%s581_s1 + $0x10] sm:$0xff] %vm288_vm4, %v308_v26  }
  0xa0   :  { %393 = vst.msk [vmem:[%s581_s1 + $0x8] sm:$0xff] %vm288_vm4, %v297_v25  }
  0xa3   :  { %v319_v27 = vpop.permute.xlu1 %318  }
  0xa4   :  { %395 = vst.msk [vmem:[%s581_s1 + $0x18] sm:$0xff] %vm288_vm4, %v319_v27  }

// kernel: small_llm_forward.1
= control target key start
LH: loop header
LB: loop body
LE: loop exit
PB: predicated region body
PF: predicated region fallthrough
CT: control target
= control target key end

     0   :  { %s7427_s0 = inlined_call_operand.vmem [shape: f32[32,128], index: 0, kind: input, shape index: {}]   ;;  %s7428_s1 = inlined_call_operand.vmem [shape: f32[32,128], index: 1, kind: input, shape index: {}]   ;;  %s7429_s2 = inlined_call_operand.vmem [shape: f32[32,128], index: 2, kind: input, shape index: {}]   ;;  %s7430_s3 = inlined_call_operand.vmem [shape: f32[32,128], index: 3, kind: input, shape index: {}]   ;;  %s7431_s4 = inlined_call_operand.vmem [shape: bf16[2,128,384], index: 4, kind: input, shape index: {}]   ;;  %s7432_s5 = inlined_call_operand.vmem [shape: bf16[2,128,128], index: 5, kind: input, shape index: {}]   ;;  %s7433_s6 = inlined_call_operand.vmem [shape: f32[2,1,128], index: 6, kind: input, shape index: {}]   ;;  %s7434_s7 = inlined_call_operand.vmem [shape: f32[2,1,128], index: 7, kind: input, shape index: {}]   ;;  %s7435_s8 = inlined_call_operand.vmem [shape: f32[2,1,128], index: 8, kind: input, shape index: {}]   ;;  %s7436_s9 = inlined_call_operand.vmem [shape: f32[2,1,128], index: 9, kind: input, shape index: {}]   ;;  %s7437_s10 = inlined_call_operand.vmem [shape: bf16[2,128,256], index: 10, kind: input, shape index: {}]   ;;  %s7438_s11 = inlined_call_operand.vmem [shape: f32[2,1,256], index: 11, kind: input, shape index: {}]   ;;  %s7439_s12 = inlined_call_operand.vmem [shape: bf16[2,256,128], index: 12, kind: input, shape index: {}]   ;;  %s7440_s13 = inlined_call_operand.vmem [shape: f32[2,1,128], index: 13, kind: input, shape index: {}]   ;;  %s7441_s14 = inlined_call_operand.vmem [shape: f32[1,128], index: 14, kind: input, shape index: {}]   ;;  %s7442_s15 = inlined_call_operand.vmem [shape: f32[1,128], index: 15, kind: input, shape index: {}]   ;;  %s7443_s16 = inlined_call_operand.vmem [shape: bf16[128,512], index: 16, kind: input, shape index: {}]   ;;  %s7444_s17 = inlined_call_operand.hbm [shape: f32[32,512], index: 17, kind: output, shape index: {}]  }
   0x1   :  { %7449 = sst [smem:[#allocation5_spill]] %s7427_s0 }
   0x2   :  { %7450 = sst [smem:[#allocation6_spill]] %s7428_s1 }
   0x3   :  { %s7451_s26 = sld [smem:[#allocation5_spill]]  ;;  %v5422_v3 = vld [vmem:[%s7431_s4 + $0xac] ss:$12 sps:$4 sm:$0xff]   ;;  %v5424_v4 = vld [vmem:[%s7431_s4 + $0xa8] ss:$12 sps:$4 sm:$0xff]  }
   0x4   :  { %310 = vmatprep.subr.bf16.mxu0 %v5422_v3 }
   0x5   :  { %311 = vmatpush1.bf16.msra.mxu0 %v5424_v4 }
   0x9   :  { %v58_v0 = vld [vmem:[%s7451_s26] sm:$0xff]  ;;  %v59_v1 = vld [vmem:[%s7451_s26 + $0x8] sm:$0xff]  ;;  %v60_v2 = vld [vmem:[%s7451_s26 + $0x10] sm:$0xff] }
   0xa   :  { %83 = vadd.xlane.f32.xlu0 %v58_v0 }
   0xe   :  { %85 = vadd.xlane.f32.xlu0 %v59_v1 }
  0x12   :  { %87 = vadd.xlane.f32.xlu0 %v60_v2 }
  0x13   :  { %22 = vsyncpa [#allocation3], 0  ;;  %v61_v13 = vld [vmem:[%s7451_s26 + $0x18] sm:$0xff]  ;;  %v5425_v14 = vld [vmem:[%s7431_s4 + $0x94] ss:$12 sps:$4 sm:$0xff]   ;;  %v5868_v27 = vmov 0  }
  0x14   :  { %v5427_v15 = vld [vmem:[%s7431_s4 + $0x90] ss:$12 sps:$4 sm:$0xff]   ;;  %312 = vmatprep.subr.bf16.mxu0 %v5425_v14  ;;  %v5430_v17 = vld [vmem:[%s7431_s4 + $0x78] ss:$12 sps:$4 sm:$0xff]   ;;  %v5433_v19 = vld [vmem:[%s7431_s4 + $0x60] ss:$12 sps:$4 sm:$0xff]   ;;  %342 = vmatprep.mubr.bf16.mxu0 %v5868_v27 }
  0x15   :  { %313 = vmatpush1.bf16.msra.mxu0 %v5427_v15  ;;  %v5428_v16 = vld [vmem:[%s7431_s4 + $0x7c] ss:$12 sps:$4 sm:$0xff]   ;;  %v5431_v18 = vld [vmem:[%s7431_s4 + $0x64] ss:$12 sps:$4 sm:$0xff]   ;;  %v5434_v20 = vld [vmem:[%s7431_s4 + $0x4c] ss:$12 sps:$4 sm:$0xff]  }
  0x16   :  { %314 = vmatprep.subr.bf16.mxu0 %v5428_v16  ;;  %v5436_v23 = vld [vmem:[%s7431_s4 + $0x48] ss:$12 sps:$4 sm:$0xff]   ;;  %v5439_v26 = vld [vmem:[%s7431_s4 + $0x30] ss:$12 sps:$4 sm:$0xff]   ;;  %v5442_v30 = vld [vmem:[%s7431_s4 + $0x18] ss:$12 sps:$4 sm:$0xff]  }
  0x17   :  { %v5437_v24 = vld [vmem:[%s7431_s4 + $0x34] ss:$12 sps:$4 sm:$0xff]   ;;  %v5440_v28 = vld [vmem:[%s7431_s4 + $0x1c] ss:$12 sps:$4 sm:$0xff]   ;;  %v5443_v31 = vld [vmem:[%s7431_s4 + $0x4] ss:$12 sps:$4 sm:$0xff]  }
  0x18   :  { %v5445_v32 = vld [vmem:[%s7431_s4] ss:$12 sps:$4 sm:$0xff]   ;;  %v5446_v33 = vld [vmem:[%s7431_s4 + $0xb0] ss:$12 sps:$4 sm:$0xff]   ;;  %v5447_v34 = vld [vmem:[%s7431_s4 + $0x98] ss:$12 sps:$4 sm:$0xff]  }
  0x19   :  { %315 = vmatpush1.bf16.msra.mxu0 %v5430_v17  ;;  %5080 = vmatprep.subr.bf16.mxu1 %v5446_v33  ;;  %v4614_v47 = vld [vmem:[%s7433_s6] ss:$0 sm:$0xff]  ;;  %v5449_v57 = vld [vmem:[%s7431_s4 + $0x68] ss:$12 sps:$4 sm:$0xff]   ;;  %v5450_v58 = vld [vmem:[%s7431_s4 + $0x50] ss:$12 sps:$4 sm:$0xff]  }
  0x1a   :  { %316 = vmatprep.subr.bf16.mxu0 %v5431_v18  ;;  %5081 = vmatpush3.bf16.msra.mxu1 %v5446_v33  ;;  %v4615_v51 = vld [vmem:[%s7434_s7] ss:$0 sm:$0xff]  ;;  %v5451_v59 = vld [vmem:[%s7431_s4 + $0x38] ss:$12 sps:$4 sm:$0xff]   ;;  %v5453_v61 = vld [vmem:[%s7431_s4 + $0x8] ss:$12 sps:$4 sm:$0xff]  }
  0x1b   :  { %5082 = vmatprep.subr.bf16.mxu1 %v5447_v34  ;;  %v5448_v56 = vld [vmem:[%s7431_s4 + $0x80] ss:$12 sps:$4 sm:$0xff]   ;;  %s5869_s29 = smov 16   ;;  %s5870_s0 = smov 112   ;;  %v5871_v16 = vmov 0.0   ;;  %vm5872_vm0 = vmmov 0  }
  0x1c   :  { %v5452_v60 = vld [vmem:[%s7431_s4 + $0x20] ss:$12 sps:$4 sm:$0xff]   ;;  %s7452_s22 = sld [smem:[#allocation6_spill]]  ;;  %vm490_vm1 = vcmask 261120   ;;  %vm540_vm3 = vcmask 130048   ;;  %s5873_s18 = smov 96  }
  0x1d   :  { %317 = vmatpush1.bf16.msra.mxu0 %v5433_v19  ;;  %v66_v19 = vld [vmem:[%s7429_s2] sm:$0xff]  ;;  %s5874_s20 = smov 64   ;;  %s7447_s21 = smov 32   ;;  %vm1006_vm5 = vcmask 523264   ;;  %vm1009_vm6 = vcmask 785408  }
  0x1e   :  { %318 = vmatprep.subr.bf16.mxu0 %v5434_v20  ;;  %5083 = vmatpush3.bf16.msra.mxu1 %v5447_v34 }
  0x1f   :  { %5084 = vmatprep.subr.bf16.mxu1 %v5448_v56 }
  0x21   :  { %319 = vmatpush1.bf16.msra.mxu0 %v5436_v23 }
  0x22   :  { %320 = vmatprep.subr.bf16.mxu0 %v5437_v24  ;;  %5085 = vmatpush3.bf16.msra.mxu1 %v5448_v56  ;;  %v62_v23 = vld [vmem:[%s7452_s22] sm:$0xff] }
  0x23   :  { %5086 = vmatprep.subr.bf16.mxu1 %v5449_v57 }
  0x25   :  { %321 = vmatpush1.bf16.msra.mxu0 %v5439_v26 }
  0x26   :  { %322 = vmatprep.subr.bf16.mxu0 %v5440_v28  ;;  %5087 = vmatpush3.bf16.msra.mxu1 %v5449_v57  ;;  %v63_v28 = vld [vmem:[%s7452_s22 + $0x8] sm:$0xff] }
  0x27   :  { %5088 = vmatprep.subr.bf16.mxu1 %v5450_v58 }
  0x29   :  { %323 = vmatpush1.bf16.msra.mxu0 %v5442_v30 }
  0x2a   :  { %324 = vmatprep.subr.bf16.mxu0 %v5443_v31  ;;  %5089 = vmatpush3.bf16.msra.mxu1 %v5450_v58  ;;  %v71_v31 = vld [vmem:[%s7430_s3 + $0x8] sm:$0xff] }
  0x2b   :  { %5090 = vmatprep.subr.bf16.mxu1 %v5451_v59 }
  0x2d   :  { %325 = vmatpush1.bf16.msra.mxu0 %v5445_v32 }
  0x2e   :  { %5091 = vmatpush3.bf16.msra.mxu1 %v5451_v59  ;;  %5130 = vmatprep.subr.bf16.mxu0 %v5871_v16 }
  0x2f   :  { %5092 = vmatprep.subr.bf16.mxu1 %v5452_v60 }
  0x32   :  { %5093 = vmatpush3.bf16.msra.mxu1 %v5452_v60 }
  0x33   :  { %5094 = vmatprep.subr.bf16.mxu1 %v5453_v61 }
  0x36   :  { %5095 = vmatpush3.bf16.msra.mxu1 %v5453_v61 }
  0x37   :  { %5100 = vmatprep.subr.bf16.mxu1 %v5871_v16 }
  0x93   :  { %v84_v5 = vpop.xlane.xlu0 %83 }
  0x94   :  { %v92_v6 = vmul.f32 0.0078125, %v84_v5 }
  0x96   :  { %v5983_v7 = vsub.f32 %v58_v0, %v92_v6 }
  0x97   :  { %v86_v8 = vpop.xlane.xlu0 %85 }
  0x98   :  { %v93_v9 = vmul.f32 0.0078125, %v86_v8  ;;  %v100_v10 = vmul.f32 %v5983_v7, %v5983_v7 }
  0x9a   :  { %104 = vadd.xlane.f32.xlu1 %v100_v10  ;;  %v5987_v11 = vsub.f32 %v59_v1, %v93_v9 }
  0x9b   :  { %v88_v21 = vpop.xlane.xlu0 %87 }
  0x9c   :  { %v101_v12 = vmul.f32 %v5987_v11, %v5987_v11  ;;  %v94_v22 = vmul.f32 0.0078125, %v88_v21  ;;  %v67_v21 = vld [vmem:[%s7429_s2 + $0x8] sm:$0xff] }
  0x9e   :  { %106 = vadd.xlane.f32.xlu1 %v101_v12  ;;  %v6021_v25 = vsub.f32 %v60_v2, %v94_v22 }
  0xa0   :  { %v102_v29 = vmul.f32 %v6021_v25, %v6021_v25 }
  0xa2   :  { %89 = vadd.xlane.f32.xlu1 %v61_v13  ;;  %108 = vadd.xlane.f32.xlu0 %v102_v29  ;;  %v70_v29 = vld [vmem:[%s7430_s3] sm:$0xff] }
 0x123   :  { %v105_v35 = vpop.xlane.xlu1 %104 }
 0x124   :  { %v112_v36 = vmul.f32 0.0078125, %v105_v35 }
 0x126   :  { %v116_v37 = vadd.f32 1e-05, %v112_v36 }
 0x127   :  { %v107_v38 = vpop.xlane.xlu1 %106 }
 0x128   :  { %5630 = vrsqrt.f32 %v116_v37  ;;  %v113_v39 = vmul.f32 0.0078125, %v107_v38 }
 0x12a   :  { %v117_v40 = vadd.f32 1e-05, %v113_v39 }
 0x12b   :  { %v90_v41 = vpop.xlane.xlu1 %89  ;;  %v109_v62 = vpop.xlane.xlu0 %108 }
 0x12c   :  { %5632 = vrsqrt.f32 %v117_v40  ;;  %v95_v42 = vmul.f32 0.0078125, %v90_v41  ;;  %v114_v63 = vmul.f32 0.0078125, %v109_v62  ;;  %v74_v62 = vlaneseq }
 0x12e   :  { %v99_v43 = vsub.f32 %v61_v13, %v95_v42  ;;  %v118_v0 = vadd.f32 1e-05, %v114_v63  ;;  %v6124_v63 = vshrl.u32 %v74_v62, 7 }
 0x130   :  { %v103_v44 = vmul.f32 %v99_v43, %v99_v43  ;;  %5634 = vrsqrt.f32 %v118_v0  ;;  %v78_v0 = vand.u32 127, %v74_v62 }
 0x132   :  { %110 = vadd.xlane.f32.xlu1 %v103_v44  ;;  %vm6127_vm2 = vcmp.ge.s32.totalorder %v6124_v63, %v78_v0 }
 0x135   :  { %v5631_v45 = vpop.eup %5630 }
 0x136   :  { %v124_v46 = vmul.f32 %v5631_v45, %v5983_v7 }
 0x138   :  { %v134_v50 = vmul.f32 %v4614_v47, %v124_v46 }
 0x139   :  { %v5633_v48 = vpop.eup %5632 }
 0x13a   :  { %v125_v49 = vmul.f32 %v5633_v48, %v5987_v11  ;;  %v144_v53 = vadd.f32 %v4615_v51, %v134_v50 }
 0x13c   :  { %v135_v52 = vmul.f32 %v4614_v47, %v125_v49 }
 0x13d   :  { %v5635_v4 = vpop.eup %5634 }
 0x13e   :  { %v145_v54 = vadd.f32 %v4615_v51, %v135_v52  ;;  %v126_v5 = vmul.f32 %v5635_v4, %v6021_v25 }
 0x140   :  { %v180_v55 = vpack.c.bf16 %v145_v54, %v144_v53  ;;  %v136_v6 = vmul.f32 %v4614_v47, %v126_v5 }
 0x142   :  { %343 = vmatmul.mubr.bf16.vlgmr.msra.gmra.mxu0 %v180_v55  ;;  %5096 = vmatprep.mubr.bf16.mxu1 %v180_v55  ;;  %v146_v10 = vadd.f32 %v4615_v51, %v136_v6 }
 0x143   :  { %352 = vmatprep.mubr.bf16.mxu0 %v5868_v27 }
 0x1bb   :  { %v111_v1 = vpop.xlane.xlu1 %110 }
 0x1bc   :  { %v115_v2 = vmul.f32 0.0078125, %v111_v1 }
 0x1be   :  { %v119_v3 = vadd.f32 1e-05, %v115_v2  ;;  %v76_v2 = vadd.s32 8, %v6124_v63 }
 0x1c0   :  { %5636 = vrsqrt.f32 %v119_v3  ;;  %vm6135_vm4 = vcmp.ge.s32.totalorder %v76_v2, %v78_v0 }
 0x1cd   :  { %v5637_v7 = vpop.eup %5636 }
 0x1ce   :  { %v127_v8 = vmul.f32 %v5637_v7, %v99_v43 }
 0x1d0   :  { %v137_v9 = vmul.f32 %v4614_v47, %v127_v8 }
 0x1d2   :  { %v147_v11 = vadd.f32 %v4615_v51, %v137_v9 }
 0x1d4   :  { %v181_v12 = vpack.c.bf16 %v147_v11, %v146_v10 }
 0x1d6   :  { %353 = vmatmul.mubr.bf16.gmra.mxu0 %v181_v12  ;;  %5097 = vmatmul.mubr.bf16.vlgmr.msra.gmra.mxu1 %v181_v12 }
 0x1d7   :  { %5102 = vmatprep.mubr.msk.bf16.mxu1 %vm5872_vm0, %v5871_v16  ;;  %5132 = vmatprep.mubr.msk.bf16.mxu0 %vm5872_vm0, %v5871_v16 }
 0x202   :  { %v344_v13 = vpop.f32.mrf.mxu0 }
 0x203   :  { %v412_v45 = vmul.f32 %v344_v13, %v62_v23 }
 0x204   :  { %v346_v14 = vpop.f32.mrf.mxu0 }
 0x205   :  { %470 = vrot.lane.b32.xlu1 %v346_v14, %s5869_s29  ;;  %454 = vrot.lane.b32.xlu0 %v346_v14, %s5870_s0  ;;  %v450_v25 = vmul.f32 %v346_v14, %v62_v23 }
 0x206   :  { %v348_v15 = vpop.f32.mrf.mxu0 }
 0x207   :  { %v413_v46 = vmul.f32 %v348_v15, %v63_v28 }
 0x208   :  { %v350_v17 = vpop.f32.mrf.mxu0 }
 0x209   :  { %456 = vrot.lane.b32.xlu1 %v350_v17, %s5870_s0  ;;  %416 = vrot.lane.b32.xlu0 %v344_v13, %s5870_s0  ;;  %v451_v32 = vmul.f32 %v350_v17, %v63_v28 }
 0x20d   :  { %472 = vrot.lane.b32.xlu1 %v350_v17, %s5869_s29  ;;  %432 = vrot.lane.b32.xlu0 %v344_v13, %s5869_s29 }
 0x211   :  { %418 = vrot.lane.b32.xlu1 %v348_v15, %s5870_s0 }
 0x215   :  { %434 = vrot.lane.b32.xlu1 %v348_v15, %s5869_s29 }
 0x277   :  { %v471_v18 = vpop.permute.xlu1 %470  ;;  %v455_v20 = vpop.permute.xlu0 %454 }
 0x278   :  { %v462_v22 = vmul.f32 %v455_v20, %v66_v19  ;;  %v478_v35 = vmul.f32 %v471_v18, %v70_v29 }
 0x27a   :  { %v466_v33 = vadd.f32 %v462_v22, %v450_v25 }
 0x27b   :  { %v457_v24 = vpop.permute.xlu1 %456  ;;  %v417_v30 = vpop.permute.xlu0 %416 }
 0x27c   :  { %v463_v26 = vmul.f32 %v457_v24, %v67_v21  ;;  %v482_v38 = vadd.f32 %v478_v35, %v466_v33  ;;  %v424_v42 = vmul.f32 %v417_v30, %v66_v19 }
 0x27e   :  { %v467_v36 = vadd.f32 %v463_v26, %v451_v32  ;;  %v428_v50 = vadd.f32 %v424_v42, %v412_v45 }
 0x27f   :  { %v473_v34 = vpop.permute.xlu1 %472  ;;  %v433_v40 = vpop.permute.xlu0 %432 }
 0x280   :  { %v479_v37 = vmul.f32 %v473_v34, %v71_v31  ;;  %v440_v47 = vmul.f32 %v433_v40, %v70_v29 }
 0x282   :  { %v483_v39 = vadd.f32 %v479_v37, %v467_v36  ;;  %v444_v53 = vadd.f32 %v440_v47, %v428_v50 }
 0x283   :  { %v419_v41 = vpop.permute.xlu1 %418 }
 0x284   :  { %v6107_v43 = vpack.c.bf16 %v483_v39, %v482_v38  ;;  %v425_v44 = vmul.f32 %v419_v41, %v67_v21 }
 0x286   :  { %v495_v48 = vsel %vm490_vm1, %v6107_v43, 0  ;;  %v429_v51 = vadd.f32 %v425_v44, %v413_v46 }
 0x287   :  { %v435_v49 = vpop.permute.xlu1 %434  ;;  %5101 = vmatpush3.bf16.xpose.msra.mxu1 %v495_v48 }
 0x288   :  { %v441_v52 = vmul.f32 %v435_v49, %v71_v31  ;;  %5106 = vmatprep.subr.bf16.mxu1 %v5871_v16 }
 0x28a   :  { %v445_v54 = vadd.f32 %v441_v52, %v429_v51 }
 0x28c   :  { %v6112_v55 = vpack.c.bf16 %v445_v54, %v444_v53 }
 0x28e   :  { %5103 = vmatmul.mubr.msk.bf16.vlgmr.msra.gmra.mxu1 %vm490_vm1, %v6112_v55 }
 0x28f   :  { %5108 = vmatprep.mubr.msk.bf16.mxu1 %vm5872_vm0, %v5871_v16 }
 0x296   :  { %v5098_v56 = vpop.f32.mrf.mxu1  ;;  %v354_v47 = vpop.f32.mrf.mxu0 }
 0x298   :  { %v397_v57 = vpop.f32.mrf.mxu1  ;;  %v356_v48 = vpop.f32.mrf.mxu0 }
 0x29a   :  { %v5099_v58 = vpop.f32.mrf.mxu1  ;;  %v358_v49 = vpop.f32.mrf.mxu0 }
 0x29b   :  { %v6118_v59 = vpack.c.bf16 %v5099_v58, %v5098_v56 }
 0x29c   :  { %v400_v60 = vpop.f32.mrf.mxu1  ;;  %v360_v50 = vpop.f32.mrf.mxu0 }
 0x29d   :  { %v6120_v61 = vpack.c.bf16 %v400_v60, %v397_v57 }
 0x29f   :  { %5107 = vmatpush3.bf16.msra.mxu1 %v6120_v61 }
 0x2a0   :  { %5112 = vmatprep.subr.bf16.mxu1 %v5871_v16 }
 0x34e   :  { %v531_v3 = vpop.f32.mrf.mxu1 }
 0x34f   :  { %v538_v4 = vsel %vm6127_vm2, %v531_v3, -1e+09 }
 0x350   :  { %v5104_v5 = vpop.f32.mrf.mxu1  ;;  %v541_v6 = vsel %vm540_vm3, %v538_v4, -inf }
 0x351   :  { %542 = vmax.xlane.f32.xlu0 %v541_v6  ;;  %v69_v6 = vld [vmem:[%s7429_s2 + $0x18] sm:$0xff] }
 0x352   :  { %v534_v8 = vpop.f32.mrf.mxu1 }
 0x353   :  { %v539_v9 = vsel %vm6135_vm4, %v534_v8, -1e+09  ;;  %v68_v8 = vld [vmem:[%s7429_s2 + $0x10] sm:$0xff] }
 0x354   :  { %v5105_v10 = vpop.f32.mrf.mxu1  ;;  %v544_v11 = vsel %vm540_vm3, %v539_v9, -inf }
 0x355   :  { %545 = vmax.xlane.f32.xlu1 %v544_v11  ;;  %v64_v10 = vld [vmem:[%s7452_s22 + $0x10] sm:$0xff]  ;;  %v65_v11 = vld [vmem:[%s7452_s22 + $0x18] sm:$0xff] }
 0x366   :  { %609 = vrot.lane.b32.xlu1 %v6112_v55, %s5873_s18 }
 0x3da   :  { %v543_v12 = vpop.xlane.xlu0 %542 }
 0x3db   :  { %v547_v13 = vsub.f32 %v538_v4, %v543_v12  ;;  %v73_v12 = vld [vmem:[%s7430_s3 + $0x18] sm:$0xff] }
 0x3dd   :  { %v549_v14 = vmul.f32 1.442695, %v547_v13 }
 0x3de   :  { %v546_v15 = vpop.xlane.xlu1 %545 }
 0x3df   :  { %5638 = vpow2.f32 %v549_v14  ;;  %v548_v17 = vsub.f32 %v539_v9, %v546_v15 }
 0x3e1   :  { %v551_v18 = vmul.f32 1.442695, %v548_v17  ;;  %v452_v17 = vmul.f32 %v356_v48, %v64_v10 }
 0x3e2   :  { %v610_v33 = vpop.permute.xlu1 %609 }
 0x3e3   :  { %5640 = vpow2.f32 %v551_v18  ;;  %v453_v18 = vmul.f32 %v360_v50, %v65_v11 }
 0x3ec   :  { %v5639_v19 = vpop.eup %5638 }
 0x3ed   :  { %v553_v20 = vsel %vm540_vm3, %v5639_v19, 0.0 }
 0x3ee   :  { %554 = vadd.xlane.f32.xlu0 %v553_v20  ;;  %v72_v20 = vld [vmem:[%s7430_s3 + $0x10] sm:$0xff] }
 0x3f0   :  { %v5641_v21 = vpop.eup %5640 }
 0x3f1   :  { %v556_v22 = vsel %vm540_vm3, %v5641_v21, 0.0 }
 0x3f2   :  { %557 = vadd.xlane.f32.xlu0 %v556_v22 }
 0x408   :  { %612 = vrot.lane.b32.xlu0 %v6107_v43, %s5873_s18 }
 0x477   :  { %v555_v23 = vpop.xlane.xlu0 %554 }
 0x478   :  { %5642 = vrcp.f32 %v555_v23 }
 0x47b   :  { %v558_v24 = vpop.xlane.xlu0 %557 }
 0x47c   :  { %5644 = vrcp.f32 %v558_v24 }
 0x47f   :  { %v613_v30 = vpop.permute.xlu0 %612 }
 0x480   :  { %v618_v32 = vsel %vm490_vm1, %v613_v30, 0 }
 0x485   :  { %v5643_v25 = vpop.eup %5642 }
 0x486   :  { %v561_v28 = vmul.f32 %v5643_v25, %v5639_v19 }
 0x489   :  { %v5645_v26 = vpop.eup %5644 }
 0x48a   :  { %v562_v29 = vmul.f32 %v5645_v26, %v5641_v21 }
 0x48c   :  { %v563_v31 = vpack.c.bf16 %v562_v29, %v561_v28  ;;  %v415_v29 = vmul.f32 %v358_v49, %v65_v11 }
 0x48e   :  { %5109 = vmatmul.mubr.msk.bf16.vlgmr.msra.gmra.mxu1 %vm540_vm3, %v563_v31 }
 0x48f   :  { %5113 = vmatpush3.bf16.xpose.msra.mxu1 %v618_v32  ;;  %5114 = vmatprep.mubr.msk.bf16.mxu1 %vm5872_vm0, %v5871_v16 }
 0x490   :  { %5118 = vmatprep.subr.bf16.mxu1 %v5871_v16 }
 0x496   :  { %5115 = vmatmul.mubr.msk.bf16.vlgmr.msra.gmra.mxu1 %vm490_vm1, %v610_v33  ;;  %v414_v33 = vmul.f32 %v354_v47, %v64_v10 }
 0x497   :  { %5120 = vmatprep.mubr.msk.bf16.mxu1 %vm5872_vm0, %v5871_v16 }
 0x54e   :  { %v6156_v34 = vpop.f32.mrf.mxu1 }
 0x550   :  { %v5110_v35 = vpop.f32.mrf.mxu1 }
 0x552   :  { %v6158_v36 = vpop.f32.mrf.mxu1 }
 0x554   :  { %v5111_v37 = vpop.f32.mrf.mxu1 }
 0x556   :  { %v654_v38 = vpop.f32.mrf.mxu1 }
 0x557   :  { %v661_v39 = vsel %vm6127_vm2, %v654_v38, -1e+09 }
 0x558   :  { %v5116_v40 = vpop.f32.mrf.mxu1  ;;  %v663_v41 = vsel %vm540_vm3, %v661_v39, -inf }
 0x559   :  { %664 = vmax.xlane.f32.xlu1 %v663_v41 }
 0x55a   :  { %v657_v42 = vpop.f32.mrf.mxu1 }
 0x55b   :  { %v662_v44 = vsel %vm6135_vm4, %v657_v42, -1e+09 }
 0x55c   :  { %v5117_v45 = vpop.f32.mrf.mxu1  ;;  %v666_v46 = vsel %vm540_vm3, %v662_v44, -inf }
 0x55d   :  { %667 = vmax.xlane.f32.xlu0 %v666_v46 }
 0x56a   :  { %460 = vrot.lane.b32.xlu1 %v360_v50, %s5870_s0 }
 0x56e   :  { %474 = vrot.lane.b32.xlu1 %v356_v48, %s5869_s29 }
 0x572   :  { %476 = vrot.lane.b32.xlu1 %v360_v50, %s5869_s29 }
 0x573   :  { %458 = vrot.lane.b32.xlu0 %v356_v48, %s5870_s0 }
 0x576   :  { %422 = vrot.lane.b32.xlu1 %v358_v49, %s5870_s0 }
 0x577   :  { %420 = vrot.lane.b32.xlu0 %v354_v47, %s5870_s0 }
 0x57a   :  { %438 = vrot.lane.b32.xlu1 %v358_v49, %s5869_s29 }
 0x57b   :  { %436 = vrot.lane.b32.xlu0 %v354_v47, %s5869_s29 }
 0x5e2   :  { %v665_v51 = vpop.xlane.xlu1 %664 }
 0x5e3   :  { %v669_v52 = vsub.f32 %v661_v39, %v665_v51 }
 0x5e5   :  { %v671_v53 = vmul.f32 1.442695, %v669_v52 }
 0x5e6   :  { %v668_v54 = vpop.xlane.xlu0 %667  ;;  %v461_v58 = vpop.permute.xlu1 %460 }
 0x5e7   :  { %5646 = vpow2.f32 %v671_v53  ;;  %v670_v56 = vsub.f32 %v662_v44, %v668_v54  ;;  %v465_v13 = vmul.f32 %v461_v58, %v69_v6 }
 0x5e9   :  { %v673_v57 = vmul.f32 1.442695, %v670_v56  ;;  %v469_v21 = vadd.f32 %v465_v13, %v453_v18 }
 0x5ea   :  { %v475_v2 = vpop.permute.xlu1 %474  ;;  %v459_v5 = vpop.permute.xlu0 %458 }
 0x5eb   :  { %5648 = vpow2.f32 %v673_v57  ;;  %v464_v14 = vmul.f32 %v459_v5, %v68_v8  ;;  %v480_v25 = vmul.f32 %v475_v2, %v72_v20 }
 0x5ed   :  { %v468_v22 = vadd.f32 %v464_v14, %v452_v17 }
 0x5ee   :  { %v477_v4 = vpop.permute.xlu1 %476  ;;  %v421_v15 = vpop.permute.xlu0 %420 }
 0x5ef   :  { %v481_v19 = vmul.f32 %v477_v4, %v73_v12  ;;  %v426_v30 = vmul.f32 %v421_v15, %v68_v8  ;;  %v484_v32 = vadd.f32 %v480_v25, %v468_v22 }
 0x5f1   :  { %v485_v26 = vadd.f32 %v481_v19, %v469_v21  ;;  %v430_v39 = vadd.f32 %v426_v30, %v414_v33 }
 0x5f2   :  { %v423_v9 = vpop.permute.xlu1 %422  ;;  %v437_v28 = vpop.permute.xlu0 %436 }
 0x5f3   :  { %v427_v24 = vmul.f32 %v423_v9, %v69_v6  ;;  %v442_v37 = vmul.f32 %v437_v28, %v72_v20  ;;  %v487_v38 = vpack.c.bf16 %v485_v26, %v484_v32 }
 0x5f4   :  { %v6174_v60 = vpop.eup %5646 }
 0x5f5   :  { %v675_v62 = vsel %vm540_vm3, %v6174_v60, 0.0  ;;  %v431_v35 = vadd.f32 %v427_v24, %v415_v29  ;;  %v446_v41 = vadd.f32 %v442_v37, %v430_v39  ;;  %v1016_v57 = vsel %vm490_vm1, %v487_v38, 0 }
 0x5f6   :  { %676 = vadd.xlane.f32.xlu0 %v675_v62  ;;  %v439_v23 = vpop.permute.xlu1 %438 }
 0x5f7   :  { %v443_v31 = vmul.f32 %v439_v23, %v73_v12 }
 0x5f8   :  { %v5649_v0 = vpop.eup %5648 }
 0x5f9   :  { %v678_v3 = vsel %vm540_vm3, %v5649_v0, 0.0  ;;  %v447_v40 = vadd.f32 %v443_v31, %v431_v35 }
 0x5fa   :  { %679 = vadd.xlane.f32.xlu1 %v678_v3 }
 0x5fb   :  { %v449_v42 = vpack.c.bf16 %v447_v40, %v446_v41 }
 0x60b   :  { %736 = vrot.lane.b32.xlu1 %v6107_v43, %s5874_s20 }
 0x60c   :  { %687 = vrot.lane.b32.xlu0 %v6120_v61, %s5873_s18 }
 0x60f   :  { %859 = vrot.lane.b32.xlu1 %v6107_v43, %s7447_s21 }
 0x610   :  { %734 = vrot.lane.b32.xlu0 %v6112_v55, %s5874_s20 }
 0x613   :  { %1132 = vrot.lane.b32.xlu1 %v487_v38, %s5873_s18 }
 0x614   :  { %857 = vrot.lane.b32.xlu0 %v6112_v55, %s7447_s21 }
 0x617   :  { %1256 = vrot.lane.b32.xlu1 %v487_v38, %s5874_s20 }
 0x618   :  { %1129 = vrot.lane.b32.xlu0 %v449_v42, %s5873_s18 }
 0x61b   :  { %1379 = vrot.lane.b32.xlu1 %v487_v38, %s7447_s21 }
 0x61c   :  { %1254 = vrot.lane.b32.xlu0 %v449_v42, %s5874_s20 }
 0x620   :  { %1377 = vrot.lane.b32.xlu0 %v449_v42, %s7447_s21 }
 0x67f   :  { %v677_v43 = vpop.xlane.xlu0 %676 }
 0x680   :  { %5650 = vrcp.f32 %v677_v43 }
 0x683   :  { %v680_v44 = vpop.xlane.xlu1 %679  ;;  %v688_v45 = vpop.permute.xlu0 %687 }
 0x684   :  { %5652 = vrcp.f32 %v680_v44  ;;  %5119 = vmatpush3.bf16.msra.mxu1 %v688_v45 }
 0x685   :  { %5124 = vmatprep.subr.bf16.mxu1 %v5871_v16 }
 0x687   :  { %v737_v49 = vpop.permute.xlu1 %736  ;;  %v735_v53 = vpop.permute.xlu0 %734 }
 0x688   :  { %v742_v51 = vsel %vm490_vm1, %v737_v49, 0 }
 0x68b   :  { %v860_v52 = vpop.permute.xlu1 %859  ;;  %v858_v56 = vpop.permute.xlu0 %857 }
 0x68c   :  { %v865_v54 = vsel %vm490_vm1, %v860_v52, 0 }
 0x68d   :  { %v5651_v55 = vpop.eup %5650 }
 0x68e   :  { %v683_v47 = vmul.f32 %v5651_v55, %v6174_v60 }
 0x68f   :  { %v1133_v58 = vpop.permute.xlu1 %1132 }
 0x690   :  { %v1138_v60 = vsel %vm490_vm1, %v1133_v58, 0 }
 0x691   :  { %v5653_v46 = vpop.eup %5652 }
 0x692   :  { %v684_v48 = vmul.f32 %v5653_v46, %v5649_v0  ;;  %v1130_v0 = vpop.permute.xlu0 %1129 }
 0x693   :  { %v1257_v62 = vpop.permute.xlu1 %1256 }
 0x694   :  { %v685_v50 = vpack.c.bf16 %v684_v48, %v683_v47  ;;  %v1262_v2 = vsel %vm490_vm1, %v1257_v62, 0 }
 0x696   :  { %5121 = vmatmul.mubr.msk.bf16.vlgmr.msra.gmra.mxu1 %vm540_vm3, %v685_v50  ;;  %v1255_v4 = vpop.permute.xlu0 %1254 }
 0x697   :  { %5125 = vmatpush3.bf16.xpose.msra.mxu1 %v742_v51  ;;  %5126 = vmatprep.mubr.msk.bf16.mxu1 %vm5872_vm0, %v5871_v16  ;;  %v1380_v3 = vpop.permute.xlu1 %1379 }
 0x698   :  { %5136 = vmatprep.subr.bf16.mxu1 %v5871_v16  ;;  %v1385_v5 = vsel %vm490_vm1, %v1380_v3, 0 }
 0x69a   :  { %v1378_v6 = vpop.permute.xlu0 %1377 }
 0x69e   :  { %5127 = vmatmul.mubr.msk.bf16.vlgmr.msra.gmra.mxu1 %vm490_vm1, %v735_v53 }
 0x69f   :  { %5137 = vmatpush3.bf16.xpose.msra.mxu1 %v865_v54  ;;  %5138 = vmatprep.mubr.msk.bf16.mxu1 %vm5872_vm0, %v5871_v16 }
 0x6a0   :  { %5148 = vmatprep.subr.bf16.mxu1 %v5871_v16 }
 0x6a6   :  { %5139 = vmatmul.mubr.msk.bf16.vlgmr.msra.gmra.mxu1 %vm490_vm1, %v858_v56 }
 0x6a7   :  { %5149 = vmatpush3.bf16.xpose.msra.mxu1 %v1016_v57  ;;  %5150 = vmatprep.mubr.msk.bf16.mxu1 %vm5872_vm0, %v5871_v16 }
 0x6a8   :  { %5160 = vmatprep.subr.bf16.mxu1 %v5871_v16 }
 0x6ae   :  { %5151 = vmatmul.mubr.msk.bf16.vlgmr.msra.gmra.mxu1 %vm490_vm1, %v449_v42 }
 0x6af   :  { %5161 = vmatpush3.bf16.xpose.msra.mxu1 %v1138_v60  ;;  %5162 = vmatprep.mubr.msk.bf16.mxu1 %vm5872_vm0, %v5871_v16 }
 0x6b0   :  { %5172 = vmatprep.subr.bf16.mxu1 %v5871_v16 }
 0x6b6   :  { %5163 = vmatmul.mubr.msk.bf16.vlgmr.msra.gmra.mxu1 %vm490_vm1, %v1130_v0 }
 0x6b7   :  { %5173 = vmatpush3.bf16.xpose.msra.mxu1 %v1262_v2  ;;  %5174 = vmatprep.mubr.msk.bf16.mxu1 %vm5872_vm0, %v5871_v16 }
 0x6b8   :  { %5184 = vmatprep.subr.bf16.mxu1 %v5871_v16 }
 0x6be   :  { %5175 = vmatmul.mubr.msk.bf16.vlgmr.msra.gmra.mxu1 %vm490_vm1, %v1255_v4 }
 0x6bf   :  { %5185 = vmatpush3.bf16.xpose.msra.mxu1 %v1385_v5  ;;  %5186 = vmatprep.mubr.msk.bf16.mxu1 %vm5872_vm0, %v5871_v16 }
 0x6c6   :  { %5187 = vmatmul.mubr.msk.bf16.vlgmr.msra.gmra.mxu1 %vm490_vm1, %v1378_v6 }
 0x756   :  { %v6245_v8 = vpop.f32.mrf.mxu1 }
 0x758   :  { %v5122_v9 = vpop.f32.mrf.mxu1 }
 0x75a   :  { %v6247_v10 = vpop.f32.mrf.mxu1 }
 0x75b   :  { %v5362_v11 = vpack.i.bf16 %v6247_v10, %v6245_v8 }
 0x75c   :  { %v5123_v12 = vpop.f32.mrf.mxu1 }
 0x75e   :  { %v778_v13 = vpop.f32.mrf.mxu1 }
 0x75f   :  { %v785_v14 = vsel %vm6127_vm2, %v778_v13, -1e+09 }
 0x760   :  { %v5128_v15 = vpop.f32.mrf.mxu1  ;;  %v787_v17 = vsel %vm540_vm3, %v785_v14, -inf }
 0x761   :  { %788 = vmax.xlane.f32.xlu1 %v787_v17 }
 0x762   :  { %v781_v18 = vpop.f32.mrf.mxu1 }
 0x763   :  { %v786_v19 = vsel %vm6135_vm4, %v781_v18, -1e+09 }
 0x764   :  { %v5129_v20 = vpop.f32.mrf.mxu1  ;;  %v790_v21 = vsel %vm540_vm3, %v786_v19, -inf }
 0x765   :  { %791 = vmax.xlane.f32.xlu0 %v790_v21 }
 0x766   :  { %v901_v22 = vpop.f32.mrf.mxu1 }
 0x767   :  { %v908_v23 = vsel %vm6127_vm2, %v901_v22, -1e+09 }
 0x768   :  { %v5140_v24 = vpop.f32.mrf.mxu1  ;;  %v910_v25 = vsel %vm540_vm3, %v908_v23, -inf }
 0x769   :  { %911 = vmax.xlane.f32.xlu0 %v910_v25 }
 0x76a   :  { %v904_v26 = vpop.f32.mrf.mxu1 }
 0x76b   :  { %v6262_v28 = vsel %vm6135_vm4, %v904_v26, -1e+09 }
 0x76c   :  { %v5141_v29 = vpop.f32.mrf.mxu1  ;;  %v913_v30 = vsel %vm540_vm3, %v6262_v28, -inf }
 0x76d   :  { %914 = vmax.xlane.f32.xlu0 %v913_v30 }
 0x76e   :  { %v1052_v31 = vpop.f32.mrf.mxu1 }
 0x76f   :  { %v1059_v32 = vsel %vm6127_vm2, %v1052_v31, -1e+09 }
 0x770   :  { %v5152_v33 = vpop.f32.mrf.mxu1  ;;  %v1061_v35 = vsel %vm540_vm3, %v1059_v32, -inf }
 0x771   :  { %1062 = vmax.xlane.f32.xlu1 %v1061_v35 }
 0x772   :  { %v1055_v37 = vpop.f32.mrf.mxu1 }
 0x773   :  { %v6271_v38 = vsel %vm6135_vm4, %v1055_v37, -1e+09 }
 0x774   :  { %v5153_v39 = vpop.f32.mrf.mxu1  ;;  %v1064_v40 = vsel %vm540_vm3, %v6271_v38, -inf }
 0x775   :  { %1065 = vmax.xlane.f32.xlu0 %v1064_v40 }
 0x776   :  { %v1174_v41 = vpop.f32.mrf.mxu1 }
 0x777   :  { %v1181_v42 = vsel %vm6127_vm2, %v1174_v41, -1e+09 }
 0x778   :  { %v5164_v43 = vpop.f32.mrf.mxu1  ;;  %v1183_v44 = vsel %vm540_vm3, %v1181_v42, -inf }
 0x779   :  { %1184 = vmax.xlane.f32.xlu1 %v1183_v44 }
 0x77a   :  { %v1177_v45 = vpop.f32.mrf.mxu1 }
 0x77b   :  { %v6280_v55 = vsel %vm6135_vm4, %v1177_v45, -1e+09 }
 0x77c   :  { %v5165_v46 = vpop.f32.mrf.mxu1  ;;  %v1186_v47 = vsel %vm540_vm3, %v6280_v55, -inf }
 0x77d   :  { %1187 = vmax.xlane.f32.xlu0 %v1186_v47 }
 0x77e   :  { %v1298_v48 = vpop.f32.mrf.mxu1 }
 0x77f   :  { %v6286_v49 = vsel %vm6127_vm2, %v1298_v48, -1e+09 }
 0x780   :  { %v5176_v50 = vpop.f32.mrf.mxu1  ;;  %v1307_v51 = vsel %vm540_vm3, %v6286_v49, -inf }
 0x781   :  { %1308 = vmax.xlane.f32.xlu1 %v1307_v51 }
 0x782   :  { %v1301_v52 = vpop.f32.mrf.mxu1 }
 0x783   :  { %v6292_v53 = vsel %vm6135_vm4, %v1301_v52, -1e+09 }
 0x784   :  { %v5177_v54 = vpop.f32.mrf.mxu1  ;;  %v1310_v56 = vsel %vm540_vm3, %v6292_v53, -inf }
 0x785   :  { %1311 = vmax.xlane.f32.xlu0 %v1310_v56 }
 0x786   :  { %v1421_v57 = vpop.f32.mrf.mxu1 }
 0x787   :  { %v6298_v58 = vsel %vm6127_vm2, %v1421_v57, -1e+09 }
 0x788   :  { %v5188_v60 = vpop.f32.mrf.mxu1  ;;  %v1430_v62 = vsel %vm540_vm3, %v6298_v58, -inf }
 0x789   :  { %1431 = vmax.xlane.f32.xlu1 %v1430_v62 }
 0x78a   :  { %v1424_v0 = vpop.f32.mrf.mxu1 }
 0x78b   :  { %v6304_v2 = vsel %vm6135_vm4, %v1424_v0, -1e+09 }
 0x78c   :  { %v5189_v3 = vpop.f32.mrf.mxu1  ;;  %v1433_v4 = vsel %vm540_vm3, %v6304_v2, -inf }
 0x78d   :  { %1434 = vmax.xlane.f32.xlu0 %v1433_v4 }
 0x79a   :  { %810 = vrot.lane.b32.xlu1 %v6120_v61, %s5874_s20 }
 0x7ea   :  { %v789_v5 = vpop.xlane.xlu1 %788 }
 0x7eb   :  { %v793_v6 = vsub.f32 %v785_v14, %v789_v5 }
 0x7ed   :  { %v795_v9 = vmul.f32 1.442695, %v793_v6 }
 0x7ee   :  { %v792_v12 = vpop.xlane.xlu0 %791 }
 0x7ef   :  { %5654 = vpow2.f32 %v795_v9  ;;  %v794_v13 = vsub.f32 %v786_v19, %v792_v12 }
 0x7f1   :  { %v797_v15 = vmul.f32 1.442695, %v794_v13 }
 0x7f2   :  { %v912_v17 = vpop.xlane.xlu0 %911 }
 0x7f3   :  { %5656 = vpow2.f32 %v797_v15  ;;  %v916_v18 = vsub.f32 %v908_v23, %v912_v17 }
 0x7f5   :  { %v918_v20 = vmul.f32 1.442695, %v916_v18 }
 0x7f6   :  { %v915_v43 = vpop.xlane.xlu0 %914 }
 0x7f7   :  { %5658 = vpow2.f32 %v918_v20  ;;  %v917_v44 = vsub.f32 %v6262_v28, %v915_v43 }
 0x7f9   :  { %v920_v46 = vmul.f32 1.442695, %v917_v44 }
 0x7fa   :  { %v1063_v21 = vpop.xlane.xlu1 %1062 }
 0x7fb   :  { %v1067_v22 = vsub.f32 %v1059_v32, %v1063_v21 }
 0x7fc   :  { %v6310_v24 = vpop.eup %5654 }
 0x7fd   :  { %v1069_v25 = vmul.f32 1.442695, %v1067_v22  ;;  %v799_v26 = vsel %vm540_vm3, %v6310_v24, 0.0 }
 0x7fe   :  { %800 = vadd.xlane.f32.xlu1 %v799_v26  ;;  %v1066_v45 = vpop.xlane.xlu0 %1065 }
 0x7ff   :  { %5660 = vpow2.f32 %v1069_v25  ;;  %v1068_v47 = vsub.f32 %v6271_v38, %v1066_v45 }
 0x800   :  { %v6314_v14 = vpop.eup %5656 }
 0x801   :  { %v802_v19 = vsel %vm540_vm3, %v6314_v14, 0.0  ;;  %v1071_v50 = vmul.f32 1.442695, %v1068_v47 }
 0x802   :  { %v1185_v29 = vpop.xlane.xlu1 %1184  ;;  %803 = vadd.xlane.f32.xlu0 %v802_v19 }
 0x803   :  { %v1189_v23 = vsub.f32 %v1181_v42, %v1185_v29 }
 0x804   :  { %v6318_v30 = vpop.eup %5658 }
 0x805   :  { %v1191_v31 = vmul.f32 1.442695, %v1189_v23  ;;  %v922_v32 = vsel %vm540_vm3, %v6318_v30, 0.0 }
 0x806   :  { %923 = vadd.xlane.f32.xlu1 %v922_v32  ;;  %v1188_v48 = vpop.xlane.xlu0 %1187 }
 0x807   :  { %5662 = vpow2.f32 %v1191_v31  ;;  %v1190_v51 = vsub.f32 %v6280_v55, %v1188_v48 }
 0x808   :  { %5664 = vpow2.f32 %v920_v46 }
 0x809   :  { %5666 = vpow2.f32 %v1071_v50  ;;  %v1193_v52 = vmul.f32 1.442695, %v1190_v51 }
 0x80a   :  { %v1309_v37 = vpop.xlane.xlu1 %1308 }
 0x80b   :  { %5668 = vpow2.f32 %v1193_v52 }
 0x80c   :  { %v6322_v33 = vpop.eup %5660 }
 0x80d   :  { %v1073_v35 = vsel %vm540_vm3, %v6322_v33, 0.0 }
 0x80e   :  { %1074 = vadd.xlane.f32.xlu1 %v1073_v35  ;;  %v1312_v54 = vpop.xlane.xlu0 %1311 }
 0x80f   :  { %v1314_v28 = vsub.f32 %v6292_v53, %v1312_v54 }
 0x811   :  { %v1317_v60 = vmul.f32 1.442695, %v1314_v28 }
 0x812   :  { %v1432_v39 = vpop.xlane.xlu1 %1431 }
 0x813   :  { %v1436_v38 = vsub.f32 %v6298_v58, %v1432_v39 }
 0x814   :  { %v6326_v40 = vpop.eup %5662 }
 0x815   :  { %v1195_v41 = vsel %vm540_vm3, %v6326_v40, 0.0  ;;  %v5665_v55 = vpop.eup %5664  ;;  %v1438_v0 = vmul.f32 1.442695, %v1436_v38 }
 0x816   :  { %1196 = vadd.xlane.f32.xlu1 %v1195_v41  ;;  %v811_v42 = vpop.permute.xlu1 %810  ;;  %v1435_v57 = vpop.xlane.xlu0 %1434  ;;  %v925_v4 = vsel %vm540_vm3, %v5665_v55, 0.0 }
 0x817   :  { %5131 = vmatpush3.bf16.msra.mxu0 %v811_v42  ;;  %v1437_v62 = vsub.f32 %v6304_v2, %v1435_v57  ;;  %v6343_v5 = vpop.eup %5666 }
 0x818   :  { %933 = vrot.lane.b32.xlu0 %v6120_v61, %s7447_s21  ;;  %5142 = vmatprep.subr.bf16.mxu0 %v5871_v16  ;;  %v1313_v61 = vsub.f32 %v6286_v49, %v1309_v37  ;;  %v1076_v49 = vsel %vm540_vm3, %v6343_v5, 0.0  ;;  %v6347_v53 = vpop.eup %5668 }
 0x819   :  { %v1440_v3 = vmul.f32 1.442695, %v1437_v62  ;;  %v1198_v58 = vsel %vm540_vm3, %v6347_v53, 0.0 }
 0x81a   :  { %v1315_v56 = vmul.f32 1.442695, %v1313_v61 }
 0x81c   :  { %5670 = vpow2.f32 %v1315_v56 }
 0x81d   :  { %5672 = vpow2.f32 %v1317_v60 }
 0x81e   :  { %5674 = vpow2.f32 %v1438_v0 }
 0x81f   :  { %5676 = vpow2.f32 %v1440_v3 }
 0x827   :  { %1207 = vrot.lane.b32.xlu1 %v6118_v59, %s5873_s18 }
 0x829   :  { %v6351_v2 = vpop.eup %5670 }
 0x82a   :  { %v1319_v6 = vsel %vm540_vm3, %v6351_v2, 0.0  ;;  %v6355_v9 = vpop.eup %5672 }
 0x82b   :  { %v6357_v12 = vpop.eup %5674  ;;  %v1322_v13 = vsel %vm540_vm3, %v6355_v9, 0.0 }
 0x82c   :  { %v6361_v15 = vpop.eup %5676  ;;  %v1442_v17 = vsel %vm540_vm3, %v6357_v12, 0.0 }
 0x82d   :  { %v1445_v18 = vsel %vm540_vm3, %v6361_v15, 0.0 }
 0x837   :  { %926 = vadd.xlane.f32.xlu0 %v925_v4 }
 0x83b   :  { %1077 = vadd.xlane.f32.xlu0 %v1076_v49 }
 0x83f   :  { %1199 = vadd.xlane.f32.xlu0 %v1198_v58 }
 0x843   :  { %1320 = vadd.xlane.f32.xlu0 %v1319_v6 }
 0x847   :  { %1323 = vadd.xlane.f32.xlu0 %v1322_v13  ;;  %v5456_v13 = vld [vmem:[%s7432_s5 + $0x28] sm:$0xff]  }
 0x84b   :  { %1443 = vadd.xlane.f32.xlu1 %v1442_v17  ;;  %1446 = vadd.xlane.f32.xlu0 %v1445_v18 }
 0x85c   :  { %1453 = vrot.lane.b32.xlu1 %v6118_v59, %s7447_s21 }
 0x860   :  { %5363 = vrot.lane.b32.xlu1 %v5362_v11, %s7447_s21 }
 0x861   :  { %1330 = vrot.lane.b32.xlu0 %v6118_v59, %s5874_s20 }
 0x887   :  { %v801_v20 = vpop.xlane.xlu1 %800 }
 0x888   :  { %5678 = vrcp.f32 %v801_v20 }
 0x88b   :  { %v804_v21 = vpop.xlane.xlu0 %803 }
 0x88c   :  { %5680 = vrcp.f32 %v804_v21 }
 0x88f   :  { %v934_v23 = vpop.permute.xlu0 %933  ;;  %v924_v8 = vpop.xlane.xlu1 %923 }
 0x890   :  { %5682 = vrcp.f32 %v924_v8 }
 0x895   :  { %v5679_v22 = vpop.eup %5678 }
 0x896   :  { %v807_v26 = vmul.f32 %v5679_v22, %v6310_v24 }
 0x897   :  { %v1075_v11 = vpop.xlane.xlu1 %1074 }
 0x899   :  { %v5681_v25 = vpop.eup %5680 }
 0x89a   :  { %v808_v19 = vmul.f32 %v5681_v25, %v6314_v14 }
 0x89c   :  { %v809_v29 = vpack.c.bf16 %v808_v19, %v807_v26  ;;  %v5457_v26 = vld [vmem:[%s7432_s5 + $0x20] sm:$0xff]  }
 0x89d   :  { %v5683_v14 = vpop.eup %5682 }
 0x89e   :  { %5133 = vmatmul.mubr.msk.bf16.vlgmr.msra.gmra.mxu0 %vm540_vm3, %v809_v29  ;;  %v930_v39 = vmul.f32 %v5683_v14, %v6318_v30  ;;  %v5458_v29 = vld [vmem:[%s7432_s5 + $0x18] sm:$0xff]  }
 0x89f   :  { %5143 = vmatpush3.bf16.msra.mxu0 %v934_v23  ;;  %5144 = vmatprep.mubr.msk.bf16.mxu0 %vm5872_vm0, %v5871_v16  ;;  %v1197_v32 = vpop.xlane.xlu1 %1196 }
 0x8a0   :  { %5154 = vmatprep.subr.bf16.mxu0 %v5871_v16 }
 0x8a3   :  { %v1208_v46 = vpop.permute.xlu1 %1207 }
 0x8c0   :  { %v927_v10 = vpop.xlane.xlu0 %926 }
 0x8c1   :  { %5684 = vrcp.f32 %v927_v10 }
 0x8c4   :  { %v1078_v31 = vpop.xlane.xlu0 %1077 }
 0x8c5   :  { %5686 = vrcp.f32 %v1078_v31 }
 0x8c6   :  { %5688 = vrcp.f32 %v1075_v11  ;;  %v5459_v11 = vld [vmem:[%s7432_s5 + $0x10] sm:$0xff]  }
 0x8c8   :  { %v1200_v24 = vpop.xlane.xlu0 %1199 }
 0x8c9   :  { %5690 = vrcp.f32 %v1200_v24  ;;  %v5460_v24 = vld [vmem:[%s7432_s5 + $0x8] sm:$0xff]  }
 0x8ca   :  { %5692 = vrcp.f32 %v1197_v32 }
 0x8cc   :  { %v1321_v35 = vpop.xlane.xlu0 %1320 }
 0x8ce   :  { %v5685_v37 = vpop.eup %5684 }
 0x8cf   :  { %v931_v41 = vmul.f32 %v5685_v37, %v5665_v55 }
 0x8d0   :  { %v1324_v44 = vpop.xlane.xlu0 %1323 }
 0x8d1   :  { %v932_v42 = vpack.c.bf16 %v931_v41, %v930_v39  ;;  %5694 = vrcp.f32 %v1324_v44  ;;  %v5461_v39 = vld [vmem:[%s7432_s5] sm:$0xff]  }
 0x8d2   :  { %v5687_v43 = vpop.eup %5686  ;;  %5696 = vrcp.f32 %v1321_v35 }
 0x8d3   :  { %5145 = vmatmul.mubr.msk.bf16.vlgmr.msra.gmra.mxu0 %vm540_vm3, %v932_v42  ;;  %v5689_v45 = vpop.eup %5688  ;;  %v1082_v47 = vmul.f32 %v5687_v43, %v6343_v5 }
 0x8d4   :  { %5155 = vmatpush3.bf16.msra.mxu0 %v6118_v59  ;;  %5156 = vmatprep.mubr.msk.bf16.mxu0 %vm5872_vm0, %v5871_v16  ;;  %v1081_v30 = vmul.f32 %v5689_v45, %v6322_v33  ;;  %v1444_v48 = vpop.xlane.xlu1 %1443  ;;  %v1447_v52 = vpop.xlane.xlu0 %1446 }
 0x8d5   :  { %5166 = vmatprep.subr.bf16.mxu0 %v5871_v16  ;;  %5698 = vrcp.f32 %v1444_v48 }
 0x8d6   :  { %v1083_v50 = vpack.c.bf16 %v1082_v47, %v1081_v30  ;;  %v5691_v51 = vpop.eup %5690  ;;  %5700 = vrcp.f32 %v1447_v52 }
 0x8d7   :  { %v5693_v61 = vpop.eup %5692  ;;  %v1204_v59 = vmul.f32 %v5691_v51, %v6347_v53 }
 0x8d8   :  { %v1203_v54 = vmul.f32 %v5693_v61, %v6326_v40  ;;  %v1331_v28 = vpop.permute.xlu0 %1330  ;;  %v1454_v40 = vpop.permute.xlu1 %1453 }
 0x8da   :  { %v1205_v33 = vpack.c.bf16 %v1204_v59, %v1203_v54 }
 0x8db   :  { %5157 = vmatmul.mubr.msk.bf16.vlgmr.msra.gmra.mxu0 %vm540_vm3, %v1083_v50 }
 0x8dc   :  { %5167 = vmatpush3.bf16.msra.mxu0 %v1208_v46  ;;  %5168 = vmatprep.mubr.msk.bf16.mxu0 %vm5872_vm0, %v5871_v16  ;;  %v5364_v48 = vpop.permute.xlu1 %5363 }
 0x8dd   :  { %5178 = vmatprep.subr.bf16.mxu0 %v5871_v16  ;;  %v5366_v51 = vunpack.i.h.bf16 %v5364_v48  ;;  %v5365_v52 = vunpack.i.l.bf16 %v5364_v48  ;;  %v5465_v48 = vld [vmem:[%s7437_s10 + $0x60] ss:$8 sps:$4 sm:$0xff]  }
 0x8de   :  { %v5695_v56 = vpop.eup %5694 }
 0x8df   :  { %v5697_v57 = vpop.eup %5696  ;;  %v1328_v38 = vmul.f32 %v5695_v56, %v6355_v9  ;;  %v5454_v9 = vld [vmem:[%s7432_s5 + $0x38] sm:$0xff]   ;;  %v1004_v56 = vsel %vm490_vm1, %v6156_v34, %v5365_v52  ;;  %v5473_v52 = vld [vmem:[%s7437_s10 + $0x44] ss:$8 sps:$4 sm:$0xff]  }
 0x8e0   :  { %v1327_v60 = vmul.f32 %v5697_v57, %v6351_v2  ;;  %5196 = vmatprep.subr.bf16.mxu1 %v5454_v9 }
 0x8e1   :  { %5197 = vmatpush3.bf16.msra.mxu1 %v5454_v9 }
 0x8e2   :  { %v5699_v62 = vpop.eup %5698  ;;  %v1329_v55 = vpack.c.bf16 %v1328_v38, %v1327_v60 }
 0x8e3   :  { %5169 = vmatmul.mubr.msk.bf16.vlgmr.msra.gmra.mxu0 %vm540_vm3, %v1205_v33  ;;  %v5701_v0 = vpop.eup %5700  ;;  %v1450_v3 = vmul.f32 %v5699_v62, %v6357_v12  ;;  %v5455_v12 = vld [vmem:[%s7432_s5 + $0x30] sm:$0xff]   ;;  %v1005_v33 = vsel %vm490_vm1, %v6158_v36, %v5366_v51 }
 0x8e4   :  { %5179 = vmatpush3.bf16.msra.mxu0 %v1331_v28  ;;  %5180 = vmatprep.mubr.msk.bf16.mxu0 %vm5872_vm0, %v5871_v16  ;;  %v1451_v4 = vmul.f32 %v5701_v0, %v6361_v15  ;;  %v5468_v51 = vld [vmem:[%s7437_s10 + $0x50] ss:$8 sps:$4 sm:$0xff]  }
 0x8e5   :  { %5190 = vmatprep.subr.bf16.mxu0 %v5871_v16  ;;  %5198 = vmatprep.subr.bf16.mxu1 %v5455_v12 }
 0x8e6   :  { %v1452_v5 = vpack.c.bf16 %v1451_v4, %v1450_v3  ;;  %5199 = vmatpush3.bf16.msra.mxu1 %v5455_v12 }
 0x8e7   :  { %5200 = vmatprep.subr.bf16.mxu1 %v5456_v13 }
 0x8ea   :  { %5201 = vmatpush3.bf16.msra.mxu1 %v5456_v13 }
 0x8eb   :  { %5181 = vmatmul.mubr.msk.bf16.vlgmr.msra.gmra.mxu0 %vm540_vm3, %v1329_v55  ;;  %5202 = vmatprep.subr.bf16.mxu1 %v5457_v26 }
 0x8ec   :  { %5191 = vmatpush3.bf16.msra.mxu0 %v1454_v40  ;;  %5192 = vmatprep.mubr.msk.bf16.mxu0 %vm5872_vm0, %v5871_v16 }
 0x8ee   :  { %5203 = vmatpush3.bf16.msra.mxu1 %v5457_v26 }
 0x8ef   :  { %5204 = vmatprep.subr.bf16.mxu1 %v5458_v29 }
 0x8f2   :  { %5205 = vmatpush3.bf16.msra.mxu1 %v5458_v29 }
 0x8f3   :  { %5193 = vmatmul.mubr.msk.bf16.vlgmr.msra.gmra.mxu0 %vm540_vm3, %v1452_v5  ;;  %5206 = vmatprep.subr.bf16.mxu1 %v5459_v11 }
 0x8f4   :  { %1857 = vmatprep.mubr.bf16.mxu0 %v5868_v27 }
 0x8f6   :  { %5207 = vmatpush3.bf16.msra.mxu1 %v5459_v11  ;;  %v5464_v11 = vld [vmem:[%s7437_s10 + $0x74] ss:$8 sps:$4 sm:$0xff]  }
 0x8f7   :  { %5208 = vmatprep.subr.bf16.mxu1 %v5460_v24  ;;  %1825 = vmatprep.subr.bf16.mxu0 %v5464_v11  ;;  %v5492_v11 = vld [vmem:[%s7439_s12 + $0x60] sm:$0xff]  }
 0x8fa   :  { %5209 = vmatpush3.bf16.msra.mxu1 %v5460_v24 }
 0x8fb   :  { %5210 = vmatprep.subr.bf16.mxu1 %v5461_v39 }
 0x8fe   :  { %5211 = vmatpush3.bf16.msra.mxu1 %v5461_v39 }
 0x95e   :  { %v850_v49 = vpop.f32.mrf.mxu0 }
 0x960   :  { %v5134_v53 = vpop.f32.mrf.mxu0 }
 0x962   :  { %v853_v58 = vpop.f32.mrf.mxu0 }
 0x963   :  { %v5367_v2 = vpack.i.bf16 %v853_v58, %v850_v49 }
 0x964   :  { %v5135_v6 = vpop.f32.mrf.mxu0 }
 0x965   :  { %5368 = vrot.lane.b32.xlu1 %v5367_v2, %s5874_s20 }
 0x993   :  { %v973_v15 = vpop.f32.mrf.mxu0 }
 0x995   :  { %v5146_v17 = vpop.f32.mrf.mxu0 }
 0x997   :  { %v976_v18 = vpop.f32.mrf.mxu0 }
 0x998   :  { %v5372_v20 = vpack.i.bf16 %v976_v18, %v973_v15 }
 0x999   :  { %v5147_v21 = vpop.f32.mrf.mxu0 }
 0x99a   :  { %5373 = vrot.lane.b32.xlu1 %v5372_v20, %s5873_s18  ;;  %v5830_v21 = vld [vmem:[%s7451_s26] sm:$0xff] }
 0x99b   :  { %v6419_v22 = vpop.f32.mrf.mxu0 }
 0x99d   :  { %v5158_v25 = vpop.f32.mrf.mxu0 }
 0x99f   :  { %v1124_v19 = vpop.f32.mrf.mxu0 }
 0x9a1   :  { %v5159_v23 = vpop.f32.mrf.mxu0 }
 0x9a2   :  { %v5832_v23 = vld [vmem:[%s7451_s26 + $0x18] sm:$0xff] }
 0x9a3   :  { %v1247_v8 = vpop.f32.mrf.mxu0 }
 0x9a5   :  { %v5170_v10 = vpop.f32.mrf.mxu0 }
 0x9a6   :  { %v5462_v10 = vld [vmem:[%s7437_s10 + $0x70] ss:$8 sps:$4 sm:$0xff]  }
 0x9a7   :  { %v1250_v31 = vpop.f32.mrf.mxu0  ;;  %1826 = vmatpush1.bf16.msra.mxu0 %v5462_v10  ;;  %v5491_v10 = vld [vmem:[%s7439_s12 + $0x28] sm:$0xff]  }
 0x9a8   :  { %v5377_v14 = vpack.i.bf16 %v1250_v31, %v1247_v8 }
 0x9a9   :  { %v5171_v32 = vpop.f32.mrf.mxu0 }
 0x9aa   :  { %5378 = vrot.lane.b32.xlu1 %v5377_v14, %s7447_s21 }
 0x9ab   :  { %v1370_v35 = vpop.f32.mrf.mxu0 }
 0x9ad   :  { %v5182_v37 = vpop.f32.mrf.mxu0 }
 0x9af   :  { %v1373_v41 = vpop.f32.mrf.mxu0 }
 0x9b0   :  { %v5382_v42 = vpack.i.bf16 %v1373_v41, %v1370_v35 }
 0x9b1   :  { %v5183_v43 = vpop.f32.mrf.mxu0 }
 0x9b2   :  { %5383 = vrot.lane.b32.xlu0 %v5382_v42, %s5874_s20 }
 0x9b3   :  { %v1493_v44 = vpop.f32.mrf.mxu0 }
 0x9b5   :  { %v5194_v45 = vpop.f32.mrf.mxu0 }
 0x9b6   :  { %v5833_v45 = vld [vmem:[%s7451_s26 + $0x10] sm:$0xff] }
 0x9b7   :  { %v1496_v46 = vpop.f32.mrf.mxu0 }
 0x9b8   :  { %v5387_v47 = vpack.i.bf16 %v1496_v46, %v1493_v44 }
 0x9b9   :  { %v5195_v30 = vpop.f32.mrf.mxu0 }
 0x9ba   :  { %5388 = vrot.lane.b32.xlu1 %v5387_v47, %s5873_s18  ;;  %v5467_v30 = vld [vmem:[%s7437_s10 + $0x64] ss:$8 sps:$4 sm:$0xff]  }
 0x9bb   :  { %1827 = vmatprep.subr.bf16.mxu0 %v5467_v30 }
 0x9bc   :  { %1828 = vmatpush1.bf16.msra.mxu0 %v5465_v48 }
 0x9d7   :  { %v5369_v50 = vpop.permute.xlu1 %5368 }
 0x9d8   :  { %v5371_v61 = vunpack.i.h.bf16 %v5369_v50  ;;  %v5370_v59 = vunpack.i.l.bf16 %v5369_v50  ;;  %v5470_v50 = vld [vmem:[%s7437_s10 + $0x54] ss:$8 sps:$4 sm:$0xff]  }
 0x9d9   :  { %1829 = vmatprep.subr.bf16.mxu0 %v5470_v50 }
 0x9da   :  { %v1007_v38 = vsel %vm1006_vm5, %v1004_v56, %v5370_v59  ;;  %v1008_v60 = vsel %vm1006_vm5, %v1005_v33, %v5371_v61  ;;  %1830 = vmatpush1.bf16.msra.mxu0 %v5468_v51  ;;  %v5471_v61 = vld [vmem:[%s7437_s10 + $0x40] ss:$8 sps:$4 sm:$0xff]   ;;  %v5474_v59 = vld [vmem:[%s7437_s10 + $0x30] ss:$8 sps:$4 sm:$0xff]   ;;  %v5479_v33 = vld [vmem:[%s7437_s10 + $0x24] ss:$8 sps:$4 sm:$0xff]  }
 0x9db   :  { %1831 = vmatprep.subr.bf16.mxu0 %v5473_v52  ;;  %v5477_v56 = vld [vmem:[%s7437_s10 + $0x20] ss:$8 sps:$4 sm:$0xff]  }
 0x9de   :  { %1832 = vmatpush1.bf16.msra.mxu0 %v5471_v61 }
 0xa0c   :  { %v5374_v54 = vpop.permute.xlu1 %5373 }
 0xa0d   :  { %v5376_v28 = vunpack.i.h.bf16 %v5374_v54  ;;  %v5375_v57 = vunpack.i.l.bf16 %v5374_v54  ;;  %v5476_v54 = vld [vmem:[%s7437_s10 + $0x34] ss:$8 sps:$4 sm:$0xff]  }
 0xa0e   :  { %1833 = vmatprep.subr.bf16.mxu0 %v5476_v54 }
 0xa0f   :  { %v1010_v62 = vsel %vm1009_vm6, %v1007_v38, %v5375_v57  ;;  %v1011_v55 = vsel %vm1009_vm6, %v1008_v60, %v5376_v28  ;;  %1834 = vmatpush1.bf16.msra.mxu0 %v5474_v59  ;;  %v5482_v28 = vld [vmem:[%s7437_s10 + $0x14] ss:$8 sps:$4 sm:$0xff]   ;;  %v5480_v57 = vld [vmem:[%s7437_s10 + $0x10] ss:$8 sps:$4 sm:$0xff]   ;;  %v5485_v38 = vld [vmem:[%s7437_s10 + $0x4] ss:$8 sps:$4 sm:$0xff]  }
 0xa10   :  { %v1546_v0 = vpack.c.bf16 %v1011_v55, %v1010_v62  ;;  %1835 = vmatprep.subr.bf16.mxu0 %v5479_v33  ;;  %v5483_v60 = vld [vmem:[%s7437_s10] ss:$8 sps:$4 sm:$0xff]  }
 0xa12   :  { %5212 = vmatprep.mubr.bf16.mxu1 %v1546_v0 }
 0xa13   :  { %1836 = vmatpush1.bf16.msra.mxu0 %v5477_v56 }
 0xa14   :  { %1837 = vmatprep.subr.bf16.mxu0 %v5482_v28 }
 0xa17   :  { %1838 = vmatpush1.bf16.msra.mxu0 %v5480_v57 }
 0xa18   :  { %1839 = vmatprep.subr.bf16.mxu0 %v5485_v38  ;;  %v1737_v38 = vsub.s32 0, %v6124_v63 }
 0xa1b   :  { %1840 = vmatpush1.bf16.msra.mxu0 %v5483_v60  ;;  %v1733_v60 = vld [vmem:[%s7438_s11] sm:$0x3] }
 0xa1c   :  { %v5379_v40 = vpop.permute.xlu1 %5378 }
 0xa1d   :  { %v5381_v4 = vunpack.i.h.bf16 %v5379_v40  ;;  %v5380_v5 = vunpack.i.l.bf16 %v5379_v40 }
 0xa1f   :  { %v1525_v34 = vsel %vm490_vm1, %v1124_v19, %v5381_v4  ;;  %v1524_v58 = vsel %vm490_vm1, %v6419_v22, %v5380_v5  ;;  %v5831_v19 = vld [vmem:[%s7451_s26 + $0x8] sm:$0xff] }
 0xa24   :  { %v5384_v3 = vpop.permute.xlu0 %5383 }
 0xa25   :  { %v5386_v36 = vunpack.i.h.bf16 %v5384_v3  ;;  %v5385_v49 = vunpack.i.l.bf16 %v5384_v3 }
 0xa27   :  { %v1527_v9 = vsel %vm1006_vm5, %v1525_v34, %v5386_v36  ;;  %v1526_v12 = vsel %vm1006_vm5, %v1524_v58, %v5385_v49 }
 0xa2c   :  { %v5389_v53 = vpop.permute.xlu1 %5388 }
 0xa2d   :  { %v5391_v2 = vunpack.i.h.bf16 %v5389_v53  ;;  %v5390_v6 = vunpack.i.l.bf16 %v5389_v53 }
 0xa2f   :  { %v1529_v13 = vsel %vm1009_vm6, %v1527_v9, %v5391_v2  ;;  %v1528_v15 = vsel %vm1009_vm6, %v1526_v12, %v5390_v6  ;;  %v4664_v2 = vld [vmem:[%s7435_s8] ss:$0 sm:$0xff] }
 0xa30   :  { %v1547_v17 = vpack.c.bf16 %v1529_v13, %v1528_v15  ;;  %v4665_v13 = vld [vmem:[%s7436_s9] ss:$0 sm:$0xff] }
 0xa32   :  { %5213 = vmatmul.mubr.bf16.vlgmr.msra.gmra.mxu1 %v1547_v17 }
 0xaf2   :  { %v5214_v18 = vpop.f32.mrf.mxu1 }
 0xaf3   :  { %v6486_v46 = vadd.f32 %v5833_v45, %v5214_v18 }
 0xaf4   :  { %v1630_v20 = vpop.f32.mrf.mxu1 }
 0xaf5   :  { %v6457_v25 = vadd.f32 %v5830_v21, %v1630_v20  ;;  %v5486_v21 = vld [vmem:[%s7439_s12 + $0x78] sm:$0xff]  }
 0xaf6   :  { %v5215_v22 = vpop.f32.mrf.mxu1  ;;  %4972 = vmatprep.subr.bf16.mxu1 %v5486_v21 }
 0xaf7   :  { %1651 = vadd.xlane.f32.xlu0 %v6457_v25  ;;  %v6469_v8 = vadd.f32 %v5832_v23, %v5215_v22  ;;  %v5487_v22 = vld [vmem:[%s7439_s12 + $0x38] sm:$0xff]   ;;  %v5490_v23 = vld [vmem:[%s7439_s12 + $0x68] sm:$0xff]  }
 0xaf8   :  { %v1633_v26 = vpop.f32.mrf.mxu1  ;;  %4973 = vmatpush3.bf16.msra.mxu1 %v5487_v22 }
 0xaf9   :  { %v6463_v29 = vadd.f32 %v5831_v19, %v1633_v26  ;;  %v5488_v26 = vld [vmem:[%s7439_s12 + $0x70] sm:$0xff]  }
 0xafa   :  { %v5489_v19 = vld [vmem:[%s7439_s12 + $0x30] sm:$0xff]   ;;  %4974 = vmatprep.subr.bf16.mxu1 %v5488_v26 }
 0xafb   :  { %1653 = vadd.xlane.f32.xlu1 %v6463_v29 }
 0xafc   :  { %4975 = vmatpush3.bf16.msra.mxu1 %v5489_v19 }
 0xafd   :  { %4976 = vmatprep.subr.bf16.mxu1 %v5490_v23 }
 0xaff   :  { %1657 = vadd.xlane.f32.xlu1 %v6469_v8 }
 0xb00   :  { %4977 = vmatpush3.bf16.msra.mxu1 %v5491_v10 }
 0xb01   :  { %4978 = vmatprep.subr.bf16.mxu1 %v5492_v11 }
 0xb80   :  { %v1652_v31 = vpop.xlane.xlu0 %1651 }
 0xb81   :  { %v1659_v24 = vmul.f32 0.0078125, %v1652_v31  ;;  %v5493_v31 = vld [vmem:[%s7439_s12 + $0x20] sm:$0xff]  }
 0xb82   :  { %4979 = vmatpush3.bf16.msra.mxu1 %v5493_v31 }
 0xb83   :  { %v1663_v14 = vsub.f32 %v6457_v25, %v1659_v24  ;;  %v5494_v24 = vld [vmem:[%s7439_s12 + $0x58] sm:$0xff]  }
 0xb84   :  { %v1654_v32 = vpop.xlane.xlu1 %1653  ;;  %4980 = vmatprep.subr.bf16.mxu1 %v5494_v24 }
 0xb85   :  { %v1660_v35 = vmul.f32 0.0078125, %v1654_v32  ;;  %v1667_v37 = vmul.f32 %v1663_v14, %v1663_v14  ;;  %v5496_v32 = vld [vmem:[%s7439_s12 + $0x50] sm:$0xff]  }
 0xb87   :  { %1671 = vadd.xlane.f32.xlu0 %v1667_v37  ;;  %v1664_v39 = vsub.f32 %v6463_v29, %v1660_v35  ;;  %v5497_v35 = vld [vmem:[%s7439_s12 + $0x10] sm:$0xff]   ;;  %v5498_v37 = vld [vmem:[%s7439_s12 + $0x48] sm:$0xff]  }
 0xb88   :  { %v1658_v41 = vpop.xlane.xlu1 %1657 }
 0xb89   :  { %v1662_v42 = vmul.f32 0.0078125, %v1658_v41  ;;  %v1668_v43 = vmul.f32 %v1664_v39, %v1664_v39  ;;  %v5500_v41 = vld [vmem:[%s7439_s12 + $0x40] sm:$0xff]  }
 0xb8b   :  { %1673 = vadd.xlane.f32.xlu0 %v1668_v43  ;;  %v6481_v44 = vsub.f32 %v6469_v8, %v1662_v42  ;;  %v5501_v42 = vld [vmem:[%s7439_s12] sm:$0xff]  }
 0xb8d   :  { %v1670_v47 = vmul.f32 %v6481_v44, %v6481_v44 }
 0xb8f   :  { %1655 = vadd.xlane.f32.xlu0 %v6486_v46  ;;  %1677 = vadd.xlane.f32.xlu1 %v1670_v47 }
 0xc10   :  { %v1672_v62 = vpop.xlane.xlu0 %1671 }
 0xc11   :  { %v1679_v55 = vmul.f32 0.0078125, %v1672_v62  ;;  %v1741_v62 = vsub.s32 1, %v6124_v63 }
 0xc13   :  { %v1683_v0 = vadd.f32 1e-05, %v1679_v55  ;;  %v6600_v55 = vrot.slane %v1733_v60, %v1741_v62 }
 0xc14   :  { %v1674_v40 = vpop.xlane.xlu0 %1673 }
 0xc15   :  { %5702 = vrsqrt.f32 %v1683_v0  ;;  %v1680_v3 = vmul.f32 0.0078125, %v1674_v40 }
 0xc17   :  { %v1684_v4 = vadd.f32 1e-05, %v1680_v3 }
 0xc18   :  { %v1656_v5 = vpop.xlane.xlu0 %1655  ;;  %v1678_v43 = vpop.xlane.xlu1 %1677 }
 0xc19   :  { %5704 = vrsqrt.f32 %v1684_v4  ;;  %v1661_v36 = vmul.f32 0.0078125, %v1656_v5  ;;  %v1682_v45 = vmul.f32 0.0078125, %v1678_v43 }
 0xc1b   :  { %v1665_v49 = vsub.f32 %v6486_v46, %v1661_v36  ;;  %v1686_v47 = vadd.f32 1e-05, %v1682_v45 }
 0xc1d   :  { %v1669_v53 = vmul.f32 %v1665_v49, %v1665_v49  ;;  %5706 = vrsqrt.f32 %v1686_v47 }
 0xc1f   :  { %1675 = vadd.xlane.f32.xlu0 %v1669_v53 }
 0xc22   :  { %v5703_v34 = vpop.eup %5702 }
 0xc23   :  { %v1691_v58 = vmul.f32 %v5703_v34, %v1663_v14  ;;  %v5495_v14 = vld [vmem:[%s7439_s12 + $0x18] sm:$0xff]  }
 0xc24   :  { %4981 = vmatpush3.bf16.msra.mxu1 %v5495_v14 }
 0xc25   :  { %v1701_v12 = vmul.f32 %v4664_v2, %v1691_v58  ;;  %4982 = vmatprep.subr.bf16.mxu1 %v5496_v32 }
 0xc26   :  { %v5705_v6 = vpop.eup %5704 }
 0xc27   :  { %v1692_v9 = vmul.f32 %v5705_v6, %v1664_v39  ;;  %v1711_v17 = vadd.f32 %v4665_v13, %v1701_v12  ;;  %v5499_v39 = vld [vmem:[%s7439_s12 + $0x8] sm:$0xff]  }
 0xc28   :  { %4983 = vmatpush3.bf16.msra.mxu1 %v5497_v35 }
 0xc29   :  { %v1702_v15 = vmul.f32 %v4664_v2, %v1692_v9  ;;  %4984 = vmatprep.subr.bf16.mxu1 %v5498_v37 }
 0xc2a   :  { %v5707_v51 = vpop.eup %5706 }
 0xc2b   :  { %v1712_v18 = vadd.f32 %v4665_v13, %v1702_v15  ;;  %v1694_v52 = vmul.f32 %v5707_v51, %v6481_v44  ;;  %v1738_v44 = vrot.slane %v1733_v60, %v1737_v38 }
 0xc2c   :  { %4985 = vmatpush3.bf16.msra.mxu1 %v5499_v39 }
 0xc2d   :  { %v1731_v20 = vpack.c.bf16 %v1712_v18, %v1711_v17  ;;  %4986 = vmatprep.subr.bf16.mxu1 %v5500_v41  ;;  %v1704_v54 = vmul.f32 %v4664_v2, %v1694_v52 }
 0xc2f   :  { %1858 = vmatmul.mubr.bf16.vlgmr.msra.gmra.mxu0 %v1731_v20  ;;  %v1714_v28 = vadd.f32 %v4665_v13, %v1704_v54 }
 0xc30   :  { %1867 = vmatprep.mubr.bf16.mxu0 %v5868_v27  ;;  %4987 = vmatpush3.bf16.msra.mxu1 %v5501_v42 }
 0xca8   :  { %v1676_v30 = vpop.xlane.xlu0 %1675 }
 0xca9   :  { %v1681_v48 = vmul.f32 0.0078125, %v1676_v30 }
 0xcab   :  { %v1685_v50 = vadd.f32 1e-05, %v1681_v48 }
 0xcad   :  { %5708 = vrsqrt.f32 %v1685_v50 }
 0xcba   :  { %v5709_v61 = vpop.eup %5708 }
 0xcbb   :  { %v1693_v59 = vmul.f32 %v5709_v61, %v1665_v49 }
 0xcbd   :  { %v1703_v33 = vmul.f32 %v4664_v2, %v1693_v59 }
 0xcbf   :  { %v1713_v56 = vadd.f32 %v4665_v13, %v1703_v33 }
 0xcc1   :  { %v1732_v57 = vpack.c.bf16 %v1714_v28, %v1713_v56 }
 0xcc3   :  { %1868 = vmatmul.mubr.bf16.gmra.mxu0 %v1732_v57 }
 0xcc4   :  { %2409 = vmatprep.mubr.bf16.mxu0 %v5868_v27 }
 0xcef   :  { %v1859_v0 = vpop.f32.mrf.mxu0 }
 0xcf0   :  { %v1860_v40 = vadd.f32 %v1859_v0, %v1738_v44 }
 0xcf1   :  { %v1861_v3 = vpop.f32.mrf.mxu0 }
 0xcf2   :  { %v1886_v4 = vmul.f32 0.044715, %v1860_v40  ;;  %v1862_v5 = vadd.f32 %v1861_v3, %v6600_v55  ;;  %v1878_v48 = vmul.f32 0.5, %v1860_v40 }
 0xcf3   :  { %v1863_v36 = vpop.f32.mrf.mxu0 }
 0xcf4   :  { %v1894_v49 = vmul.f32 %v1886_v4, %v1860_v40  ;;  %v1887_v53 = vmul.f32 0.044715, %v1862_v5  ;;  %v1864_v34 = vadd.f32 %v1863_v36, %v1738_v44  ;;  %v1879_v45 = vmul.f32 0.5, %v1862_v5 }
 0xcf5   :  { %v1865_v58 = vpop.f32.mrf.mxu0 }
 0xcf6   :  { %v1902_v2 = vmul.f32 %v1894_v49, %v1860_v40  ;;  %v1895_v6 = vmul.f32 %v1887_v53, %v1862_v5  ;;  %v1888_v9 = vmul.f32 0.044715, %v1864_v34  ;;  %v1866_v12 = vadd.f32 %v1865_v58, %v6600_v55 }
 0xcf7   :  { %v1880_v42 = vmul.f32 0.5, %v1864_v34 }
 0xcf8   :  { %v1910_v13 = vadd.f32 %v1902_v2, %v1860_v40  ;;  %v1903_v15 = vmul.f32 %v1895_v6, %v1862_v5  ;;  %v1896_v17 = vmul.f32 %v1888_v9, %v1864_v34  ;;  %v1889_v18 = vmul.f32 0.044715, %v1866_v12 }
 0xcf9   :  { %v1881_v47 = vmul.f32 0.5, %v1866_v12 }
 0xcfa   :  { %v1904_v20 = vmul.f32 %v1896_v17, %v1864_v34  ;;  %v1897_v21 = vmul.f32 %v1889_v18, %v1866_v12  ;;  %v1911_v22 = vadd.f32 %v1903_v15, %v1862_v5  ;;  %v1918_v26 = vmul.f32 0.7978846, %v1910_v13 }
 0xcfc   :  { %v1912_v19 = vadd.f32 %v1904_v20, %v1864_v34  ;;  %v1905_v23 = vmul.f32 %v1897_v21, %v1866_v12  ;;  %v1919_v10 = vmul.f32 0.7978846, %v1911_v22 }
 0xcfe   :  { %v1920_v11 = vmul.f32 0.7978846, %v1912_v19  ;;  %v1913_v31 = vadd.f32 %v1905_v23, %v1866_v12  ;;  %5710 = vtanh.f32 %v1919_v10 }
 0xcff   :  { %5712 = vtanh.f32 %v1918_v26 }
 0xd00   :  { %5714 = vtanh.f32 %v1920_v11  ;;  %v1921_v24 = vmul.f32 0.7978846, %v1913_v31 }
 0xd02   :  { %5716 = vtanh.f32 %v1921_v24 }
 0xd0b   :  { %v5711_v14 = vpop.eup %5710 }
 0xd0c   :  { %v5713_v32 = vpop.eup %5712  ;;  %v1935_v37 = vadd.f32 1.0, %v5711_v14 }
 0xd0d   :  { %v5715_v35 = vpop.eup %5714  ;;  %v1934_v43 = vadd.f32 1.0, %v5713_v32 }
 0xd0e   :  { %v1936_v39 = vadd.f32 1.0, %v5715_v35  ;;  %v1943_v51 = vmul.f32 %v1935_v37, %v1879_v45 }
 0xd0f   :  { %v5717_v41 = vpop.eup %5716  ;;  %v1942_v61 = vmul.f32 %v1934_v43, %v1878_v48 }
 0xd10   :  { %v1937_v30 = vadd.f32 1.0, %v5717_v41  ;;  %v1944_v50 = vmul.f32 %v1936_v39, %v1880_v42 }
 0xd12   :  { %v1945_v52 = vmul.f32 %v1937_v30, %v1881_v47  ;;  %v1982_v54 = vpack.c.bf16 %v1944_v50, %v1942_v61  ;;  %v4698_v61 = vld [vmem:[%s7440_s13] ss:$0 sm:$0xff] }
 0xd14   :  { %v1983_v59 = vpack.c.bf16 %v1945_v52, %v1943_v51 }
 0xd16   :  { %2114 = vmatprep.mubr.bf16.mxu1 %v1983_v59 }
 0xd17   :  { %2115 = vmatmul.mubr.bf16.vlgmr.msra.gmra.mxu1 %v1982_v54 }
 0xd83   :  { %v1869_v33 = vpop.f32.mrf.mxu0 }
 0xd84   :  { %v1870_v56 = vadd.f32 %v1869_v33, %v1738_v44 }
 0xd85   :  { %v1871_v28 = vpop.f32.mrf.mxu0 }
 0xd86   :  { %v1890_v57 = vmul.f32 0.044715, %v1870_v56  ;;  %v1872_v60 = vadd.f32 %v1871_v28, %v6600_v55  ;;  %v1882_v39 = vmul.f32 0.5, %v1870_v56 }
 0xd87   :  { %v1873_v0 = vpop.f32.mrf.mxu0 }
 0xd88   :  { %v1898_v3 = vmul.f32 %v1890_v57, %v1870_v56  ;;  %v1891_v4 = vmul.f32 0.044715, %v1872_v60  ;;  %v1874_v5 = vadd.f32 %v1873_v0, %v1738_v44  ;;  %v1883_v32 = vmul.f32 0.5, %v1872_v60 }
 0xd89   :  { %v1875_v36 = vpop.f32.mrf.mxu0 }
 0xd8a   :  { %v1906_v40 = vmul.f32 %v1898_v3, %v1870_v56  ;;  %v1899_v49 = vmul.f32 %v1891_v4, %v1872_v60  ;;  %v1892_v53 = vmul.f32 0.044715, %v1874_v5  ;;  %v1876_v34 = vadd.f32 %v1875_v36, %v6600_v55 }
 0xd8b   :  { %v1884_v24 = vmul.f32 0.5, %v1874_v5 }
 0xd8c   :  { %v1907_v58 = vmul.f32 %v1899_v49, %v1872_v60  ;;  %v1900_v2 = vmul.f32 %v1892_v53, %v1874_v5  ;;  %v1893_v6 = vmul.f32 0.044715, %v1876_v34  ;;  %v1914_v9 = vadd.f32 %v1906_v40, %v1870_v56 }
 0xd8d   :  { %v1885_v35 = vmul.f32 0.5, %v1876_v34 }
 0xd8e   :  { %v1908_v12 = vmul.f32 %v1900_v2, %v1874_v5  ;;  %v1901_v13 = vmul.f32 %v1893_v6, %v1876_v34  ;;  %v1915_v15 = vadd.f32 %v1907_v58, %v1872_v60  ;;  %v1922_v17 = vmul.f32 0.7978846, %v1914_v9  ;;  %v5502_v60 = vld [vmem:[%s7431_s4 + $0x168] ss:$12 sps:$4 sm:$0xff]  }
 0xd90   :  { %v1909_v18 = vmul.f32 %v1901_v13, %v1876_v34  ;;  %v1923_v20 = vmul.f32 0.7978846, %v1915_v15  ;;  %v1916_v21 = vadd.f32 %v1908_v12, %v1874_v5 }
 0xd92   :  { %v1917_v22 = vadd.f32 %v1909_v18, %v1876_v34  ;;  %5718 = vtanh.f32 %v1923_v20  ;;  %v1924_v44 = vmul.f32 0.7978846, %v1916_v21  ;;  %v5505_v18 = vld [vmem:[%s7431_s4 + $0x150] ss:$12 sps:$4 sm:$0xff]   ;;  %v5508_v20 = vld [vmem:[%s7431_s4 + $0x138] ss:$12 sps:$4 sm:$0xff]  }
 0xd93   :  { %5720 = vtanh.f32 %v1922_v17  ;;  %v5513_v21 = vld [vmem:[%s7431_s4 + $0x124] ss:$12 sps:$4 sm:$0xff]  }
 0xd94   :  { %v1925_v26 = vmul.f32 0.7978846, %v1917_v22  ;;  %5722 = vtanh.f32 %v1924_v44  ;;  %v5511_v22 = vld [vmem:[%s7431_s4 + $0x120] ss:$12 sps:$4 sm:$0xff]  }
 0xd95   :  { %v5516_v44 = vld [vmem:[%s7431_s4 + $0x10c] ss:$12 sps:$4 sm:$0xff]  }
 0xd96   :  { %5724 = vtanh.f32 %v1925_v26  ;;  %v5514_v26 = vld [vmem:[%s7431_s4 + $0x108] ss:$12 sps:$4 sm:$0xff]  }
 0xd9f   :  { %v5719_v19 = vpop.eup %5718 }
 0xda0   :  { %v5721_v55 = vpop.eup %5720  ;;  %v1939_v10 = vadd.f32 1.0, %v5719_v19  ;;  %v5519_v19 = vld [vmem:[%s7431_s4 + $0xf4] ss:$12 sps:$4 sm:$0xff]  }
 0xda1   :  { %v5723_v23 = vpop.eup %5722  ;;  %v1938_v14 = vadd.f32 1.0, %v5721_v55  ;;  %v5517_v55 = vld [vmem:[%s7431_s4 + $0xf0] ss:$12 sps:$4 sm:$0xff]  }
 0xda2   :  { %v1940_v11 = vadd.f32 1.0, %v5723_v23  ;;  %v1947_v42 = vmul.f32 %v1939_v10, %v1883_v32  ;;  %v5522_v23 = vld [vmem:[%s7431_s4 + $0xdc] ss:$12 sps:$4 sm:$0xff]   ;;  %v5520_v10 = vld [vmem:[%s7431_s4 + $0xd8] ss:$12 sps:$4 sm:$0xff]  }
 0xda3   :  { %v5725_v31 = vpop.eup %5724  ;;  %v1946_v45 = vmul.f32 %v1938_v14, %v1882_v39 }
 0xda4   :  { %v1941_v37 = vadd.f32 1.0, %v5725_v31  ;;  %v1948_v41 = vmul.f32 %v1940_v11, %v1884_v24  ;;  %v5525_v11 = vld [vmem:[%s7431_s4 + $0xc4] ss:$12 sps:$4 sm:$0xff]   ;;  %v5523_v31 = vld [vmem:[%s7431_s4 + $0xc0] ss:$12 sps:$4 sm:$0xff]  }
 0xda5   :  { %v5526_v24 = vld [vmem:[%s7431_s4 + $0x170] ss:$12 sps:$4 sm:$0xff]  }
 0xda6   :  { %v1949_v43 = vmul.f32 %v1941_v37, %v1885_v35  ;;  %v1984_v30 = vpack.c.bf16 %v1948_v41, %v1946_v45  ;;  %5216 = vmatprep.subr.bf16.mxu1 %v5526_v24 }
 0xda7   :  { %5217 = vmatpush3.bf16.msra.mxu1 %v5526_v24 }
 0xda8   :  { %v1985_v47 = vpack.c.bf16 %v1949_v43, %v1947_v42 }
 0xdaa   :  { %2122 = vmatprep.mubr.bf16.mxu1 %v1985_v47 }
 0xdab   :  { %2123 = vmatmul.mubr.bf16.gmra.mxu1 %v1984_v30 }
 0xdd7   :  { %v4988_v48 = vpop.f32.mrf.mxu1 }
 0xdd9   :  { %v4989_v50 = vpop.f32.mrf.mxu1 }
 0xdda   :  { %v4990_v51 = vadd.f32 %v4989_v50, %v4988_v48 }
 0xddb   :  { %v4991_v52 = vpop.f32.mrf.mxu1 }
 0xddc   :  { %v2131_v59 = vadd.f32 %v4990_v51, %v6457_v25  ;;  %v5504_v25 = vld [vmem:[%s7431_s4 + $0x16c] ss:$12 sps:$4 sm:$0xff]  }
 0xddd   :  { %v4992_v54 = vpop.f32.mrf.mxu1  ;;  %2377 = vmatprep.subr.bf16.mxu0 %v5504_v25  ;;  %v4702_v25 = vld [vmem:[%s7434_s7 + $0x1] ss:$0 sm:$0xff] }
 0xdde   :  { %v4993_v33 = vadd.f32 %v4992_v54, %v4991_v52  ;;  %v6610_v56 = vadd.f32 %v4698_v61, %v2131_v59  ;;  %2378 = vmatpush1.bf16.msra.mxu0 %v5502_v60  ;;  %v4701_v59 = vld [vmem:[%s7433_s6 + $0x1] ss:$0 sm:$0xff] }
 0xde0   :  { %v2132_v28 = vadd.f32 %v4993_v33, %v6463_v29  ;;  %2150 = vadd.xlane.f32.xlu0 %v6610_v56  ;;  %v5527_v33 = vld [vmem:[%s7431_s4 + $0x158] ss:$12 sps:$4 sm:$0xff]  }
 0xde1   :  { %5218 = vmatprep.subr.bf16.mxu1 %v5527_v33 }
 0xde2   :  { %v6614_v57 = vadd.f32 %v4698_v61, %v2132_v28  ;;  %5219 = vmatpush3.bf16.msra.mxu1 %v5527_v33 }
 0xde4   :  { %2152 = vadd.xlane.f32.xlu1 %v6614_v57 }
 0xe69   :  { %v2151_v0 = vpop.xlane.xlu0 %2150 }
 0xe6a   :  { %v2158_v3 = vmul.f32 0.0078125, %v2151_v0 }
 0xe6b   :  { %v4994_v4 = vpop.f32.mrf.mxu1 }
 0xe6c   :  { %v6624_v29 = vsub.f32 %v6610_v56, %v2158_v3  ;;  %v5528_v3 = vld [vmem:[%s7431_s4 + $0x140] ss:$12 sps:$4 sm:$0xff]  }
 0xe6d   :  { %v4995_v5 = vpop.f32.mrf.mxu1  ;;  %v2153_v36 = vpop.xlane.xlu1 %2152  ;;  %5220 = vmatprep.subr.bf16.mxu1 %v5528_v3 }
 0xe6e   :  { %v4996_v40 = vadd.f32 %v4995_v5, %v4994_v4  ;;  %v2159_v49 = vmul.f32 0.0078125, %v2153_v36  ;;  %v2166_v53 = vmul.f32 %v6624_v29, %v6624_v29  ;;  %5221 = vmatpush3.bf16.msra.mxu1 %v5528_v3  ;;  %v5529_v36 = vld [vmem:[%s7431_s4 + $0x128] ss:$12 sps:$4 sm:$0xff]  }
 0xe6f   :  { %v4997_v34 = vpop.f32.mrf.mxu1  ;;  %5222 = vmatprep.subr.bf16.mxu1 %v5529_v36 }
 0xe70   :  { %v2133_v58 = vadd.f32 %v4996_v40, %v6486_v46  ;;  %v6630_v2 = vsub.f32 %v6614_v57, %v2159_v49  ;;  %2170 = vadd.xlane.f32.xlu0 %v2166_v53  ;;  %v5507_v46 = vld [vmem:[%s7431_s4 + $0x154] ss:$12 sps:$4 sm:$0xff]   ;;  %v5530_v40 = vld [vmem:[%s7431_s4 + $0x110] ss:$12 sps:$4 sm:$0xff]   ;;  %v5531_v49 = vld [vmem:[%s7431_s4 + $0xf8] ss:$12 sps:$4 sm:$0xff]  }
 0xe71   :  { %v4998_v6 = vpop.f32.mrf.mxu1  ;;  %2379 = vmatprep.subr.bf16.mxu0 %v5507_v46  ;;  %v5532_v53 = vld [vmem:[%s7431_s4 + $0xe0] ss:$12 sps:$4 sm:$0xff]  }
 0xe72   :  { %v4999_v9 = vadd.f32 %v4998_v6, %v4997_v34  ;;  %v6632_v12 = vadd.f32 %v4698_v61, %v2133_v58  ;;  %v2167_v13 = vmul.f32 %v6630_v2, %v6630_v2  ;;  %2380 = vmatpush1.bf16.msra.mxu0 %v5505_v18  ;;  %5223 = vmatpush3.bf16.msra.mxu1 %v5529_v36  ;;  %v5533_v34 = vld [vmem:[%s7431_s4 + $0xc8] ss:$12 sps:$4 sm:$0xff]  }
 0xe73   :  { %5224 = vmatprep.subr.bf16.mxu1 %v5530_v40 }
 0xe74   :  { %v2134_v15 = vadd.f32 %v4999_v9, %v6469_v8  ;;  %2154 = vadd.xlane.f32.xlu0 %v6632_v12  ;;  %2172 = vadd.xlane.f32.xlu1 %v2167_v13  ;;  %v5510_v8 = vld [vmem:[%s7431_s4 + $0x13c] ss:$12 sps:$4 sm:$0xff]  }
 0xe75   :  { %2381 = vmatprep.subr.bf16.mxu0 %v5510_v8 }
 0xe76   :  { %v6638_v17 = vadd.f32 %v4698_v61, %v2134_v15  ;;  %2382 = vmatpush1.bf16.msra.mxu0 %v5508_v20  ;;  %5225 = vmatpush3.bf16.msra.mxu1 %v5530_v40 }
 0xe77   :  { %2383 = vmatprep.subr.bf16.mxu0 %v5513_v21  ;;  %5226 = vmatprep.subr.bf16.mxu1 %v5531_v49 }
 0xe78   :  { %2156 = vadd.xlane.f32.xlu1 %v6638_v17 }
 0xe7a   :  { %2384 = vmatpush1.bf16.msra.mxu0 %v5511_v22  ;;  %5227 = vmatpush3.bf16.msra.mxu1 %v5531_v49 }
 0xe7b   :  { %2385 = vmatprep.subr.bf16.mxu0 %v5516_v44  ;;  %5228 = vmatprep.subr.bf16.mxu1 %v5532_v53 }
 0xe7e   :  { %2386 = vmatpush1.bf16.msra.mxu0 %v5514_v26  ;;  %5229 = vmatpush3.bf16.msra.mxu1 %v5532_v53 }
 0xe7f   :  { %2387 = vmatprep.subr.bf16.mxu0 %v5519_v19  ;;  %5230 = vmatprep.subr.bf16.mxu1 %v5533_v34 }
 0xe82   :  { %2388 = vmatpush1.bf16.msra.mxu0 %v5517_v55  ;;  %5231 = vmatpush3.bf16.msra.mxu1 %v5533_v34 }
 0xe83   :  { %2389 = vmatprep.subr.bf16.mxu0 %v5522_v23  ;;  %5254 = vmatprep.subr.bf16.mxu1 %v5871_v16 }
 0xe86   :  { %2390 = vmatpush1.bf16.msra.mxu0 %v5520_v10 }
 0xe87   :  { %2391 = vmatprep.subr.bf16.mxu0 %v5525_v11 }
 0xe8a   :  { %2392 = vmatpush1.bf16.msra.mxu0 %v5523_v31 }
 0xe8b   :  { %5236 = vmatprep.subr.bf16.mxu0 %v5871_v16 }
 0xef9   :  { %v2171_v14 = vpop.xlane.xlu0 %2170 }
 0xefa   :  { %v2178_v32 = vmul.f32 0.0078125, %v2171_v14  ;;  %v5834_v14 = vld [vmem:[%s7429_s2] sm:$0xff] }
 0xefc   :  { %v2182_v35 = vadd.f32 1e-05, %v2178_v32 }
 0xefd   :  { %v2155_v37 = vpop.xlane.xlu0 %2154  ;;  %v2173_v39 = vpop.xlane.xlu1 %2172 }
 0xefe   :  { %5726 = vrsqrt.f32 %v2182_v35  ;;  %v2160_v41 = vmul.f32 0.0078125, %v2155_v37  ;;  %v2179_v42 = vmul.f32 0.0078125, %v2173_v39  ;;  %v5835_v37 = vld [vmem:[%s7452_s22] sm:$0xff] }
 0xf00   :  { %v2164_v43 = vsub.f32 %v6632_v12, %v2160_v41  ;;  %v2183_v45 = vadd.f32 1e-05, %v2179_v42  ;;  %v5836_v41 = vld [vmem:[%s7429_s2 + $0x8] sm:$0xff] }
 0xf01   :  { %v2157_v47 = vpop.xlane.xlu1 %2156 }
 0xf02   :  { %5728 = vrsqrt.f32 %v2183_v45  ;;  %v2161_v30 = vmul.f32 0.0078125, %v2157_v47  ;;  %v2168_v48 = vmul.f32 %v2164_v43, %v2164_v43  ;;  %v5837_v45 = vld [vmem:[%s7452_s22 + $0x8] sm:$0xff] }
 0xf04   :  { %v2165_v50 = vsub.f32 %v6638_v17, %v2161_v30  ;;  %2174 = vadd.xlane.f32.xlu0 %v2168_v48 }
 0xf06   :  { %v2169_v51 = vmul.f32 %v2165_v50, %v2165_v50 }
 0xf08   :  { %2176 = vadd.xlane.f32.xlu1 %v2169_v51 }
 0xf0b   :  { %v5727_v52 = vpop.eup %5726 }
 0xf0c   :  { %v2190_v61 = vmul.f32 %v5727_v52, %v6624_v29 }
 0xf0e   :  { %v2200_v60 = vmul.f32 %v4701_v59, %v2190_v61  ;;  %v5839_v61 = vld [vmem:[%s7430_s3 + $0x8] sm:$0xff] }
 0xf0f   :  { %v5729_v54 = vpop.eup %5728 }
 0xf10   :  { %v2191_v28 = vmul.f32 %v5729_v54, %v6630_v2  ;;  %v2210_v4 = vadd.f32 %v4702_v25, %v2200_v60 }
 0xf12   :  { %v2201_v0 = vmul.f32 %v4701_v59, %v2191_v28 }
 0xf14   :  { %v2211_v29 = vadd.f32 %v4702_v25, %v2201_v0 }
 0xf16   :  { %v2247_v5 = vpack.c.bf16 %v2211_v29, %v2210_v4 }
 0xf18   :  { %2410 = vmatmul.mubr.bf16.vlgmr.msra.gmra.mxu0 %v2247_v5  ;;  %5232 = vmatprep.mubr.bf16.mxu1 %v2247_v5 }
 0xf19   :  { %2419 = vmatprep.mubr.bf16.mxu0 %v5868_v27 }
 0xf8d   :  { %v2175_v58 = vpop.xlane.xlu0 %2174 }
 0xf8e   :  { %v2180_v2 = vmul.f32 0.0078125, %v2175_v58 }
 0xf90   :  { %v2184_v6 = vadd.f32 1e-05, %v2180_v2 }
 0xf91   :  { %v2177_v9 = vpop.xlane.xlu1 %2176 }
 0xf92   :  { %5730 = vrsqrt.f32 %v2184_v6  ;;  %v2181_v13 = vmul.f32 0.0078125, %v2177_v9 }
 0xf94   :  { %v2185_v15 = vadd.f32 1e-05, %v2181_v13 }
 0xf96   :  { %5732 = vrsqrt.f32 %v2185_v15 }
 0xf9f   :  { %v5731_v46 = vpop.eup %5730 }
 0xfa0   :  { %v2192_v18 = vmul.f32 %v5731_v46, %v2164_v43 }
 0xfa2   :  { %v2202_v21 = vmul.f32 %v4701_v59, %v2192_v18 }
 0xfa3   :  { %v5733_v8 = vpop.eup %5732 }
 0xfa4   :  { %v2193_v20 = vmul.f32 %v5733_v8, %v2165_v50  ;;  %v2212_v44 = vadd.f32 %v4702_v25, %v2202_v21  ;;  %v5838_v50 = vld [vmem:[%s7430_s3] sm:$0xff] }
 0xfa6   :  { %v2203_v22 = vmul.f32 %v4701_v59, %v2193_v20 }
 0xfa8   :  { %v2213_v26 = vadd.f32 %v4702_v25, %v2203_v22 }
 0xfaa   :  { %v2248_v19 = vpack.c.bf16 %v2213_v26, %v2212_v44 }
 0xfac   :  { %2420 = vmatmul.mubr.bf16.gmra.mxu0 %v2248_v19  ;;  %5233 = vmatmul.mubr.bf16.vlgmr.msra.gmra.mxu1 %v2248_v19 }
 0xfad   :  { %5238 = vmatprep.mubr.msk.bf16.mxu0 %vm5872_vm0, %v5871_v16  ;;  %5256 = vmatprep.mubr.msk.bf16.mxu1 %vm5872_vm0, %v5871_v16 }
 0xfd8   :  { %v2411_v55 = vpop.f32.mrf.mxu0 }
 0xfd9   :  { %v2479_v4 = vmul.f32 %v5835_v37, %v2411_v55 }
 0xfda   :  { %v2413_v23 = vpop.f32.mrf.mxu0 }
 0xfdb   :  { %2521 = vrot.lane.b32.xlu0 %v2413_v23, %s5870_s0  ;;  %2537 = vrot.lane.b32.xlu1 %v2413_v23, %s5869_s29  ;;  %v2517_v39 = vmul.f32 %v5835_v37, %v2413_v23 }
 0xfdc   :  { %v2415_v10 = vpop.f32.mrf.mxu0 }
 0xfdd   :  { %v2480_v29 = vmul.f32 %v5837_v45, %v2415_v10 }
 0xfde   :  { %v2417_v11 = vpop.f32.mrf.mxu0 }
 0xfdf   :  { %2483 = vrot.lane.b32.xlu0 %v2411_v55, %s5870_s0  ;;  %2523 = vrot.lane.b32.xlu1 %v2417_v11, %s5870_s0  ;;  %v2518_v47 = vmul.f32 %v5837_v45, %v2417_v11 }
 0xfe3   :  { %2499 = vrot.lane.b32.xlu0 %v2411_v55, %s5869_s29  ;;  %2539 = vrot.lane.b32.xlu1 %v2417_v11, %s5869_s29 }
 0xfe7   :  { %2485 = vrot.lane.b32.xlu1 %v2415_v10, %s5870_s0 }
 0xfeb   :  { %2501 = vrot.lane.b32.xlu1 %v2415_v10, %s5869_s29 }
0x104d   :  { %v2522_v31 = vpop.permute.xlu0 %2521  ;;  %v2538_v24 = vpop.permute.xlu1 %2537 }
0x104e   :  { %v2529_v32 = vmul.f32 %v5834_v14, %v2522_v31  ;;  %v2545_v51 = vmul.f32 %v5838_v50, %v2538_v24 }
0x1050   :  { %v2533_v30 = vadd.f32 %v2529_v32, %v2517_v39 }
0x1051   :  { %v2524_v35 = vpop.permute.xlu1 %2523  ;;  %v2484_v43 = vpop.permute.xlu0 %2483 }
0x1052   :  { %v2530_v42 = vmul.f32 %v5836_v41, %v2524_v35  ;;  %v2549_v54 = vadd.f32 %v2545_v51, %v2533_v30  ;;  %v2491_v25 = vmul.f32 %v5834_v14, %v2484_v43  ;;  %v5840_v51 = vld [vmem:[%s7429_s2 + $0x18] sm:$0xff] }
0x1054   :  { %v2534_v52 = vadd.f32 %v2530_v42, %v2518_v47  ;;  %v2495_v49 = vadd.f32 %v2491_v25, %v2479_v4 }
0x1055   :  { %v2540_v48 = vpop.permute.xlu1 %2539  ;;  %v2500_v28 = vpop.permute.xlu0 %2499 }
0x1056   :  { %v2546_v59 = vmul.f32 %v5839_v61, %v2540_v48  ;;  %v2507_v5 = vmul.f32 %v5838_v50, %v2500_v28 }
0x1058   :  { %v2550_v33 = vadd.f32 %v2546_v59, %v2534_v52  ;;  %v2511_v58 = vadd.f32 %v2507_v5, %v2495_v49  ;;  %v5841_v59 = vld [vmem:[%s7452_s22 + $0x18] sm:$0xff] }
0x1059   :  { %v2486_v60 = vpop.permute.xlu1 %2485 }
0x105a   :  { %v6750_v0 = vpack.c.bf16 %v2550_v33, %v2549_v54  ;;  %v2492_v3 = vmul.f32 %v5836_v41, %v2486_v60  ;;  %v5842_v33 = vld [vmem:[%s7429_s2 + $0x10] sm:$0xff]  ;;  %v5843_v60 = vld [vmem:[%s7430_s3 + $0x18] sm:$0xff]  ;;  %s7457_s2 = smov 32  }
0x105c   :  { %v2561_v36 = vsel %vm490_vm1, %v6750_v0, 0  ;;  %v2496_v53 = vadd.f32 %v2492_v3, %v2480_v29  ;;  %v5844_v3 = vld [vmem:[%s7452_s22 + $0x10] sm:$0xff] }
0x105d   :  { %5237 = vmatpush3.bf16.xpose.msra.mxu0 %v2561_v36  ;;  %v2502_v40 = vpop.permute.xlu1 %2501  ;;  %v5845_v29 = vld [vmem:[%s7430_s3 + $0x10] sm:$0xff] }
0x105e   :  { %v2508_v34 = vmul.f32 %v5839_v61, %v2502_v40  ;;  %5242 = vmatprep.subr.bf16.mxu0 %v5871_v16 }
0x1060   :  { %v2512_v2 = vadd.f32 %v2508_v34, %v2496_v53 }
0x1062   :  { %v6755_v6 = vpack.c.bf16 %v2512_v2, %v2511_v58 }
0x1064   :  { %5239 = vmatmul.mubr.msk.bf16.vlgmr.msra.gmra.mxu0 %vm490_vm1, %v6755_v6 }
0x1065   :  { %5244 = vmatprep.mubr.msk.bf16.mxu0 %vm5872_vm0, %v5871_v16 }
0x106c   :  { %v5234_v9 = vpop.f32.mrf.mxu1  ;;  %v6767_v20 = vpop.f32.mrf.mxu0 }
0x106e   :  { %v2464_v13 = vpop.f32.mrf.mxu1  ;;  %v2423_v21 = vpop.f32.mrf.mxu0 }
0x106f   :  { %v2519_v4 = vmul.f32 %v5844_v3, %v2423_v21 }
0x1070   :  { %v5235_v15 = vpop.f32.mrf.mxu1  ;;  %v6769_v22 = vpop.f32.mrf.mxu0 }
0x1071   :  { %v6761_v46 = vpack.c.bf16 %v5235_v15, %v5234_v9 }
0x1072   :  { %v2467_v18 = vpop.f32.mrf.mxu1  ;;  %v2427_v44 = vpop.f32.mrf.mxu0 }
0x1073   :  { %v6763_v8 = vpack.c.bf16 %v2467_v18, %v2464_v13  ;;  %v2520_v54 = vmul.f32 %v5841_v59, %v2427_v44 }
0x1075   :  { %5243 = vmatpush3.bf16.msra.mxu0 %v6763_v8 }
0x1076   :  { %5248 = vmatprep.subr.bf16.mxu0 %v5871_v16 }
0x1124   :  { %v2597_v26 = vpop.f32.mrf.mxu0 }
0x1125   :  { %v2604_v19 = vsel %vm6127_vm2, %v2597_v26, -1e+09 }
0x1126   :  { %v2606_v55 = vsel %vm540_vm3, %v2604_v19, -inf  ;;  %v5240_v23 = vpop.f32.mrf.mxu0 }
0x1127   :  { %2607 = vmax.xlane.f32.xlu0 %v2606_v55 }
0x1128   :  { %v2600_v10 = vpop.f32.mrf.mxu0 }
0x1129   :  { %v2605_v11 = vsel %vm6135_vm4, %v2600_v10, -1e+09 }
0x112a   :  { %v2609_v31 = vsel %vm540_vm3, %v2605_v11, -inf  ;;  %v5241_v24 = vpop.f32.mrf.mxu0 }
0x112b   :  { %2610 = vmax.xlane.f32.xlu1 %v2609_v31 }
0x113c   :  { %2527 = vrot.lane.b32.xlu1 %v2427_v44, %s5870_s0 }
0x113d   :  { %2525 = vrot.lane.b32.xlu0 %v2423_v21, %s5870_s0 }
0x1140   :  { %2543 = vrot.lane.b32.xlu1 %v2427_v44, %s5869_s29  ;;  %v2482_v44 = vmul.f32 %v5841_v59, %v6769_v22 }
0x1141   :  { %2541 = vrot.lane.b32.xlu0 %v2423_v21, %s5869_s29 }
0x1144   :  { %2489 = vrot.lane.b32.xlu1 %v6769_v22, %s5870_s0 }
0x1145   :  { %2487 = vrot.lane.b32.xlu0 %v6767_v20, %s5870_s0 }
0x1149   :  { %2503 = vrot.lane.b32.xlu0 %v6767_v20, %s5869_s29 }
0x11b0   :  { %v2608_v14 = vpop.xlane.xlu0 %2607 }
0x11b1   :  { %v2612_v32 = vsub.f32 %v2604_v19, %v2608_v14 }
0x11b3   :  { %v2614_v35 = vmul.f32 1.442695, %v2612_v32 }
0x11b4   :  { %v2611_v37 = vpop.xlane.xlu1 %2610  ;;  %v2526_v48 = vpop.permute.xlu0 %2525 }
0x11b5   :  { %5734 = vpow2.f32 %v2614_v35  ;;  %v2613_v39 = vsub.f32 %v2605_v11, %v2611_v37  ;;  %v2531_v28 = vmul.f32 %v5842_v33, %v2526_v48 }
0x11b7   :  { %v2616_v41 = vmul.f32 1.442695, %v2613_v39  ;;  %v2535_v40 = vadd.f32 %v2531_v28, %v2519_v4 }
0x11b8   :  { %v2528_v30 = vpop.permute.xlu1 %2527  ;;  %v2542_v61 = vpop.permute.xlu0 %2541 }
0x11b9   :  { %5736 = vpow2.f32 %v2616_v41  ;;  %v2532_v52 = vmul.f32 %v5840_v51, %v2528_v30  ;;  %v2547_v5 = vmul.f32 %v5845_v29, %v2542_v61 }
0x11bb   :  { %v2536_v36 = vadd.f32 %v2532_v52, %v2520_v54  ;;  %v2551_v53 = vadd.f32 %v2547_v5, %v2535_v40 }
0x11bc   :  { %v2544_v50 = vpop.permute.xlu1 %2543  ;;  %v2488_v58 = vpop.permute.xlu0 %2487 }
0x11bd   :  { %v2548_v25 = vmul.f32 %v5843_v60, %v2544_v50  ;;  %v2493_v18 = vmul.f32 %v5842_v33, %v2488_v58 }
0x11bf   :  { %v2552_v49 = vadd.f32 %v2548_v25, %v2536_v36 }
0x11c0   :  { %v2504_v2 = vpop.permute.xlu0 %2503  ;;  %v2490_v9 = vpop.permute.xlu1 %2489 }
0x11c1   :  { %v2554_v34 = vpack.c.bf16 %v2552_v49, %v2551_v53  ;;  %v2494_v21 = vmul.f32 %v5840_v51, %v2490_v9 }
0x11c2   :  { %v5735_v42 = vpop.eup %5734 }
0x11c3   :  { %v2618_v43 = vsel %vm540_vm3, %v5735_v42, 0.0  ;;  %v2498_v55 = vadd.f32 %v2494_v21, %v2482_v44  ;;  %v3079_v48 = vsel %vm490_vm1, %v2554_v34, 0 }
0x11c4   :  { %2619 = vadd.xlane.f32.xlu0 %v2618_v43 }
0x11c6   :  { %v5737_v45 = vpop.eup %5736 }
0x11c7   :  { %v2621_v47 = vsel %vm540_vm3, %v5737_v45, 0.0 }
0x11c8   :  { %2622 = vadd.xlane.f32.xlu1 %v2621_v47 }
0x11d9   :  { %2505 = vrot.lane.b32.xlu1 %v6769_v22, %s5869_s29 }
0x11da   :  { %2677 = vrot.lane.b32.xlu0 %v6750_v0, %s5873_s18 }
0x11dd   :  { %2674 = vrot.lane.b32.xlu1 %v6755_v6, %s5873_s18 }
0x11de   :  { %2801 = vrot.lane.b32.xlu0 %v6750_v0, %s5874_s20 }
0x11e1   :  { %2799 = vrot.lane.b32.xlu1 %v6755_v6, %s5874_s20 }
0x11e2   :  { %2924 = vrot.lane.b32.xlu0 %v6750_v0, %s7457_s2  ;;  %v2481_v0 = vmul.f32 %v5844_v3, %v6767_v20 }
0x11e4   :  { %v2497_v19 = vadd.f32 %v2493_v18, %v2481_v0 }
0x11e5   :  { %2922 = vrot.lane.b32.xlu1 %v6755_v6, %s7457_s2  ;;  %v2509_v6 = vmul.f32 %v5845_v29, %v2504_v2 }
0x11e6   :  { %3195 = vrot.lane.b32.xlu0 %v2554_v34, %s5873_s18 }
0x11e7   :  { %v2513_v10 = vadd.f32 %v2509_v6, %v2497_v19 }
0x11ea   :  { %3319 = vrot.lane.b32.xlu0 %v2554_v34, %s5874_s20 }
0x11ee   :  { %3442 = vrot.lane.b32.xlu0 %v2554_v34, %s7457_s2 }
0x124d   :  { %v2620_v13 = vpop.xlane.xlu0 %2619 }
0x124e   :  { %5738 = vrcp.f32 %v2620_v13 }
0x1251   :  { %v2623_v15 = vpop.xlane.xlu1 %2622  ;;  %v2678_v37 = vpop.permute.xlu0 %2677 }
0x1252   :  { %5740 = vrcp.f32 %v2623_v15  ;;  %v2683_v22 = vsel %vm490_vm1, %v2678_v37, 0 }
0x1255   :  { %v2506_v26 = vpop.permute.xlu1 %2505  ;;  %v2802_v39 = vpop.permute.xlu0 %2801 }
0x1256   :  { %v2510_v23 = vmul.f32 %v5843_v60, %v2506_v26  ;;  %v2807_v43 = vsel %vm490_vm1, %v2802_v39, 0 }
0x1258   :  { %v2514_v11 = vadd.f32 %v2510_v23, %v2498_v55 }
0x1259   :  { %v2675_v41 = vpop.permute.xlu1 %2674 }
0x125a   :  { %v2516_v31 = vpack.c.bf16 %v2514_v11, %v2513_v10 }
0x125b   :  { %v5739_v24 = vpop.eup %5738 }
0x125c   :  { %3192 = vrot.lane.b32.xlu1 %v2516_v31, %s5873_s18  ;;  %v2626_v32 = vmul.f32 %v5739_v24, %v5735_v42  ;;  %v2925_v42 = vpop.permute.xlu0 %2924 }
0x125d   :  { %v2930_v47 = vsel %vm490_vm1, %v2925_v42, 0 }
0x125f   :  { %v5741_v14 = vpop.eup %5740 }
0x1260   :  { %3317 = vrot.lane.b32.xlu1 %v2516_v31, %s5874_s20  ;;  %v2627_v35 = vmul.f32 %v5741_v14, %v5737_v45  ;;  %v2800_v45 = vpop.permute.xlu1 %2799  ;;  %v3196_v50 = vpop.permute.xlu0 %3195 }
0x1261   :  { %v3201_v51 = vsel %vm490_vm1, %v3196_v50, 0 }
0x1262   :  { %v2628_v20 = vpack.c.bf16 %v2627_v35, %v2626_v32 }
0x1264   :  { %5245 = vmatmul.mubr.msk.bf16.vlgmr.msra.gmra.mxu0 %vm540_vm3, %v2628_v20  ;;  %3440 = vrot.lane.b32.xlu1 %v2516_v31, %s7457_s2  ;;  %v2923_v30 = vpop.permute.xlu1 %2922  ;;  %v3320_v52 = vpop.permute.xlu0 %3319 }
0x1265   :  { %5249 = vmatpush3.bf16.xpose.msra.mxu0 %v2683_v22  ;;  %5250 = vmatprep.mubr.msk.bf16.mxu0 %vm5872_vm0, %v5871_v16  ;;  %v3325_v59 = vsel %vm490_vm1, %v3320_v52, 0 }
0x1266   :  { %5260 = vmatprep.subr.bf16.mxu0 %v5871_v16 }
0x1268   :  { %v3443_v54 = vpop.permute.xlu0 %3442 }
0x1269   :  { %v3448_v28 = vsel %vm490_vm1, %v3443_v54, 0 }
0x126c   :  { %5251 = vmatmul.mubr.msk.bf16.vlgmr.msra.gmra.mxu0 %vm490_vm1, %v2675_v41 }
0x126d   :  { %5261 = vmatpush3.bf16.xpose.msra.mxu0 %v2807_v43  ;;  %5262 = vmatprep.mubr.msk.bf16.mxu0 %vm5872_vm0, %v5871_v16 }
0x126e   :  { %5272 = vmatprep.subr.bf16.mxu0 %v5871_v16 }
0x1274   :  { %5263 = vmatmul.mubr.msk.bf16.vlgmr.msra.gmra.mxu0 %vm490_vm1, %v2800_v45 }
0x1275   :  { %5273 = vmatpush3.bf16.xpose.msra.mxu0 %v2930_v47  ;;  %5274 = vmatprep.mubr.msk.bf16.mxu0 %vm5872_vm0, %v5871_v16 }
0x1276   :  { %5284 = vmatprep.subr.bf16.mxu0 %v5871_v16 }
0x127c   :  { %5275 = vmatmul.mubr.msk.bf16.vlgmr.msra.gmra.mxu0 %vm490_vm1, %v2923_v30 }
0x127d   :  { %5285 = vmatpush3.bf16.xpose.msra.mxu0 %v3079_v48  ;;  %5286 = vmatprep.mubr.msk.bf16.mxu0 %vm5872_vm0, %v5871_v16 }
0x127e   :  { %5296 = vmatprep.subr.bf16.mxu0 %v5871_v16 }
0x1284   :  { %5287 = vmatmul.mubr.msk.bf16.vlgmr.msra.gmra.mxu0 %vm490_vm1, %v2516_v31 }
0x1285   :  { %5297 = vmatpush3.bf16.xpose.msra.mxu0 %v3201_v51  ;;  %5298 = vmatprep.mubr.msk.bf16.mxu0 %vm5872_vm0, %v5871_v16 }
0x1286   :  { %5308 = vmatprep.subr.bf16.mxu0 %v5871_v16 }
0x12ce   :  { %v3193_v61 = vpop.permute.xlu1 %3192 }
0x12cf   :  { %5299 = vmatmul.mubr.msk.bf16.vlgmr.msra.gmra.mxu0 %vm490_vm1, %v3193_v61 }
0x12d0   :  { %5309 = vmatpush3.bf16.xpose.msra.mxu0 %v3325_v59  ;;  %5310 = vmatprep.mubr.msk.bf16.mxu0 %vm5872_vm0, %v5871_v16 }
0x12d1   :  { %5320 = vmatprep.subr.bf16.mxu0 %v5871_v16 }
0x12d2   :  { %v3318_v33 = vpop.permute.xlu1 %3317 }
0x12d6   :  { %v3441_v60 = vpop.permute.xlu1 %3440 }
0x12d7   :  { %5311 = vmatmul.mubr.msk.bf16.vlgmr.msra.gmra.mxu0 %vm490_vm1, %v3318_v33 }
0x12d8   :  { %5321 = vmatpush3.bf16.xpose.msra.mxu0 %v3448_v28  ;;  %5322 = vmatprep.mubr.msk.bf16.mxu0 %vm5872_vm0, %v5871_v16 }
0x12df   :  { %5323 = vmatmul.mubr.msk.bf16.vlgmr.msra.gmra.mxu0 %vm490_vm1, %v3441_v60 }
0x1324   :  { %v6864_v25 = vpop.f32.mrf.mxu0 }
0x1326   :  { %v5246_v3 = vpop.f32.mrf.mxu0 }
0x1328   :  { %v6866_v4 = vpop.f32.mrf.mxu0 }
0x132a   :  { %v5247_v29 = vpop.f32.mrf.mxu0 }
0x132c   :  { %v2719_v5 = vpop.f32.mrf.mxu0 }
0x132d   :  { %v6870_v36 = vsel %vm6127_vm2, %v2719_v5, -1e+09 }
0x132e   :  { %v2728_v40 = vsel %vm540_vm3, %v6870_v36, -inf  ;;  %v5252_v49 = vpop.f32.mrf.mxu0 }
0x132f   :  { %2729 = vmax.xlane.f32.xlu0 %v2728_v40 }
0x1330   :  { %v2722_v53 = vpop.f32.mrf.mxu0 }
0x1331   :  { %v6876_v34 = vsel %vm6135_vm4, %v2722_v53, -1e+09 }
0x1332   :  { %v2731_v58 = vsel %vm540_vm3, %v6876_v34, -inf  ;;  %v5253_v2 = vpop.f32.mrf.mxu0 }
0x1333   :  { %2732 = vmax.xlane.f32.xlu1 %v2731_v58 }
0x1334   :  { %v2843_v9 = vpop.f32.mrf.mxu0 }
0x1335   :  { %v6882_v13 = vsel %vm6127_vm2, %v2843_v9, -1e+09 }
0x1336   :  { %v2852_v15 = vsel %vm540_vm3, %v6882_v13, -inf  ;;  %v5264_v18 = vpop.f32.mrf.mxu0 }
0x1337   :  { %2853 = vmax.xlane.f32.xlu0 %v2852_v15 }
0x1338   :  { %v2846_v21 = vpop.f32.mrf.mxu0 }
0x1339   :  { %v6888_v0 = vsel %vm6135_vm4, %v2846_v21, -1e+09 }
0x133a   :  { %v2855_v44 = vsel %vm540_vm3, %v6888_v0, -inf  ;;  %v5265_v6 = vpop.f32.mrf.mxu0 }
0x133b   :  { %2856 = vmax.xlane.f32.xlu0 %v2855_v44 }
0x133c   :  { %v2966_v26 = vpop.f32.mrf.mxu0 }
0x133d   :  { %v6894_v19 = vsel %vm6127_vm2, %v2966_v26, -1e+09 }
0x133e   :  { %v2975_v55 = vsel %vm540_vm3, %v6894_v19, -inf  ;;  %v5276_v23 = vpop.f32.mrf.mxu0 }
0x133f   :  { %2976 = vmax.xlane.f32.xlu0 %v2975_v55 }
0x1340   :  { %v2969_v10 = vpop.f32.mrf.mxu0 }
0x1341   :  { %v6900_v11 = vsel %vm6135_vm4, %v2969_v10, -1e+09 }
0x1342   :  { %v2978_v31 = vsel %vm540_vm3, %v6900_v11, -inf  ;;  %v5277_v24 = vpop.f32.mrf.mxu0 }
0x1343   :  { %2979 = vmax.xlane.f32.xlu1 %v2978_v31 }
0x1344   :  { %v3115_v14 = vpop.f32.mrf.mxu0 }
0x1345   :  { %v6906_v32 = vsel %vm6127_vm2, %v3115_v14, -1e+09 }
0x1346   :  { %v3124_v35 = vsel %vm540_vm3, %v6906_v32, -inf  ;;  %v5288_v37 = vpop.f32.mrf.mxu0 }
0x1347   :  { %3125 = vmax.xlane.f32.xlu0 %v3124_v35 }
0x1348   :  { %v3118_v20 = vpop.f32.mrf.mxu0 }
0x1349   :  { %v6912_v22 = vsel %vm6135_vm4, %v3118_v20, -1e+09 }
0x134a   :  { %v3127_v39 = vsel %vm540_vm3, %v6912_v22, -inf  ;;  %v5289_v41 = vpop.f32.mrf.mxu0 }
0x134b   :  { %3128 = vmax.xlane.f32.xlu1 %v3127_v39 }
0x138f   :  { %v3237_v43 = vpop.f32.mrf.mxu0 }
0x1390   :  { %v6918_v42 = vsel %vm6127_vm2, %v3237_v43, -1e+09 }
0x1391   :  { %v3246_v45 = vsel %vm540_vm3, %v6918_v42, -inf  ;;  %v5300_v47 = vpop.f32.mrf.mxu0 }
0x1392   :  { %3247 = vmax.xlane.f32.xlu0 %v3246_v45 }
0x1393   :  { %v3240_v30 = vpop.f32.mrf.mxu0 }
0x1394   :  { %v6924_v48 = vsel %vm6135_vm4, %v3240_v30, -1e+09 }
0x1395   :  { %v3249_v50 = vsel %vm540_vm3, %v6924_v48, -inf  ;;  %v5301_v51 = vpop.f32.mrf.mxu0 }
0x1396   :  { %3250 = vmax.xlane.f32.xlu1 %v3249_v50 }
0x1397   :  { %v3361_v52 = vpop.f32.mrf.mxu0 }
0x1398   :  { %v6930_v61 = vsel %vm6127_vm2, %v3361_v52, -1e+09 }
0x1399   :  { %v3370_v59 = vsel %vm540_vm3, %v6930_v61, -inf  ;;  %v5312_v54 = vpop.f32.mrf.mxu0 }
0x139a   :  { %3371 = vmax.xlane.f32.xlu0 %v3370_v59 }
0x139b   :  { %v3364_v33 = vpop.f32.mrf.mxu0 }
0x139c   :  { %v6936_v28 = vsel %vm6135_vm4, %v3364_v33, -1e+09 }
0x139d   :  { %v3373_v60 = vsel %vm540_vm3, %v6936_v28, -inf  ;;  %v5313_v3 = vpop.f32.mrf.mxu0 }
0x139e   :  { %3374 = vmax.xlane.f32.xlu1 %v3373_v60 }
0x139f   :  { %v3484_v29 = vpop.f32.mrf.mxu0 }
0x13a0   :  { %v6942_v5 = vsel %vm6127_vm2, %v3484_v29, -1e+09 }
0x13a1   :  { %v3493_v40 = vsel %vm540_vm3, %v6942_v5, -inf  ;;  %v5324_v49 = vpop.f32.mrf.mxu0 }
0x13a2   :  { %3494 = vmax.xlane.f32.xlu0 %v3493_v40 }
0x13a3   :  { %v3487_v53 = vpop.f32.mrf.mxu0 }
0x13a4   :  { %v6948_v58 = vsel %vm6135_vm4, %v3487_v53, -1e+09 }
0x13a5   :  { %v3496_v2 = vsel %vm540_vm3, %v6948_v58, -inf  ;;  %v5325_v9 = vpop.f32.mrf.mxu0 }
0x13a6   :  { %3497 = vmax.xlane.f32.xlu1 %v3496_v2 }
0x13b7   :  { %2875 = vrot.lane.b32.xlu1 %v6763_v8, %s5874_s20 }
0x13b8   :  { %2752 = vrot.lane.b32.xlu0 %v6763_v8, %s5873_s18  ;;  %v2730_v1 = vpop.xlane.xlu0 %2729 }
0x13b9   :  { %v2734_v15 = vsub.f32 %v6870_v36, %v2730_v1 }
0x13bb   :  { %v2736_v44 = vmul.f32 1.442695, %v2734_v15 }
0x13bc   :  { %v2733_v18 = vpop.xlane.xlu1 %2732 }
0x13bd   :  { %v2735_v7 = vsub.f32 %v6876_v34, %v2733_v18  ;;  %5742 = vpow2.f32 %v2736_v44 }
0x13bf   :  { %v2738_v55 = vmul.f32 1.442695, %v2735_v7 }
0x13c0   :  { %v2854_v21 = vpop.xlane.xlu0 %2853 }
0x13c1   :  { %v2858_v6 = vsub.f32 %v6882_v13, %v2854_v21  ;;  %5744 = vpow2.f32 %v2738_v55 }
0x13c3   :  { %v2860_v10 = vmul.f32 1.442695, %v2858_v6 }
0x13c4   :  { %v2857_v26 = vpop.xlane.xlu0 %2856 }
0x13c5   :  { %v2859_v23 = vsub.f32 %v6888_v0, %v2857_v26  ;;  %5746 = vpow2.f32 %v2860_v10 }
0x13c7   :  { %v2862_v24 = vmul.f32 1.442695, %v2859_v23 }
0x13c8   :  { %v2977_v31 = vpop.xlane.xlu0 %2976 }
0x13c9   :  { %v2981_v14 = vsub.f32 %v6894_v19, %v2977_v31  ;;  %5748 = vpow2.f32 %v2862_v24 }
0x13ca   :  { %v6963_v0 = vpop.eup %5742 }
0x13cb   :  { %v2983_v36 = vmul.f32 1.442695, %v2981_v14  ;;  %v2740_v45 = vsel %vm540_vm3, %v6963_v0, 0.0 }
0x13cc   :  { %v2980_v35 = vpop.xlane.xlu1 %2979 }
0x13cd   :  { %v2982_v34 = vsub.f32 %v6900_v11, %v2980_v35  ;;  %5750 = vpow2.f32 %v2983_v36 }
0x13ce   :  { %v6966_v19 = vpop.eup %5744 }
0x13cf   :  { %v2985_v37 = vmul.f32 1.442695, %v2982_v34  ;;  %v2743_v50 = vsel %vm540_vm3, %v6966_v19, 0.0 }
0x13d0   :  { %v3126_v13 = vpop.xlane.xlu0 %3125 }
0x13d1   :  { %v3130_v20 = vsub.f32 %v6906_v32, %v3126_v13  ;;  %5752 = vpow2.f32 %v2985_v37 }
0x13d2   :  { %v6970_v47 = vpop.eup %5746 }
0x13d3   :  { %v3132_v39 = vmul.f32 1.442695, %v3130_v20  ;;  %v2864_v32 = vsel %vm540_vm3, %v6970_v47, 0.0 }
0x13d4   :  { %v3129_v41 = vpop.xlane.xlu1 %3128 }
0x13d5   :  { %5754 = vpow2.f32 %v3132_v39  ;;  %v3131_v43 = vsub.f32 %v6912_v22, %v3129_v41 }
0x13d6   :  { %v6972_v30 = vpop.eup %5748 }
0x13d7   :  { %v3134_v11 = vmul.f32 1.442695, %v3131_v43  ;;  %2741 = vadd.xlane.f32.xlu0 %v2740_v45  ;;  %v2867_v52 = vsel %vm540_vm3, %v6972_v30, 0.0 }
0x13d9   :  { %5756 = vpow2.f32 %v3134_v11 }
0x13da   :  { %v6978_v51 = vpop.eup %5750 }
0x13db   :  { %2865 = vadd.xlane.f32.xlu0 %v2864_v32  ;;  %2744 = vadd.xlane.f32.xlu1 %v2743_v50  ;;  %v2987_v22 = vsel %vm540_vm3, %v6978_v51, 0.0 }
0x13de   :  { %v6984_v59 = vpop.eup %5752 }
0x13df   :  { %2988 = vadd.xlane.f32.xlu0 %v2987_v22  ;;  %2868 = vadd.xlane.f32.xlu1 %v2867_v52  ;;  %v2990_v33 = vsel %vm540_vm3, %v6984_v59, 0.0 }
0x13e2   :  { %v6986_v54 = vpop.eup %5754 }
0x13e3   :  { %2991 = vadd.xlane.f32.xlu1 %v2990_v33  ;;  %v3136_v60 = vsel %vm540_vm3, %v6986_v54, 0.0 }
0x13e4   :  { %3137 = vadd.xlane.f32.xlu0 %v3136_v60 }
0x13e6   :  { %v6992_v3 = vpop.eup %5756 }
0x13e7   :  { %v3139_v29 = vsel %vm540_vm3, %v6992_v3, 0.0 }
0x13e8   :  { %3140 = vadd.xlane.f32.xlu1 %v3139_v29 }
0x13fa   :  { %2998 = vrot.lane.b32.xlu0 %v6763_v8, %s7457_s2 }
0x141b   :  { %v3248_v40 = vpop.xlane.xlu0 %3247 }
0x141c   :  { %v3252_v49 = vsub.f32 %v6918_v42, %v3248_v40 }
0x141e   :  { %v3254_v53 = vmul.f32 1.442695, %v3252_v49 }
0x141f   :  { %v3251_v2 = vpop.xlane.xlu1 %3250 }
0x1420   :  { %5758 = vpow2.f32 %v3254_v53  ;;  %v3253_v9 = vsub.f32 %v6924_v48, %v3251_v2 }
0x1422   :  { %v3256_v1 = vmul.f32 1.442695, %v3253_v9 }
0x1423   :  { %v3372_v15 = vpop.xlane.xlu0 %3371 }
0x1424   :  { %5760 = vpow2.f32 %v3256_v1  ;;  %v3376_v18 = vsub.f32 %v6930_v61, %v3372_v15 }
0x1426   :  { %v3378_v21 = vmul.f32 1.442695, %v3376_v18 }
0x1427   :  { %v3375_v7 = vpop.xlane.xlu1 %3374 }
0x1428   :  { %5762 = vpow2.f32 %v3378_v21  ;;  %v3377_v44 = vsub.f32 %v6936_v28, %v3375_v7 }
0x142a   :  { %v3380_v6 = vmul.f32 1.442695, %v3377_v44 }
0x142b   :  { %v3495_v8 = vpop.xlane.xlu0 %3494 }
0x142c   :  { %5764 = vpow2.f32 %v3380_v6  ;;  %v3499_v42 = vsub.f32 %v6942_v5, %v3495_v8 }
0x142d   :  { %v7003_v26 = vpop.eup %5758 }
0x142e   :  { %v3501_v55 = vmul.f32 1.442695, %v3499_v42  ;;  %v3258_v48 = vsel %vm540_vm3, %v7003_v26, 0.0 }
0x142f   :  { %v2753_v23 = vpop.permute.xlu0 %2752  ;;  %3259 = vadd.xlane.f32.xlu1 %v3258_v48  ;;  %v3498_v10 = vpop.xlane.xlu1 %3497 }
0x1430   :  { %5766 = vpow2.f32 %v3501_v55  ;;  %v3500_v61 = vsub.f32 %v6948_v58, %v3498_v10  ;;  %5255 = vmatpush3.bf16.msra.mxu1 %v2753_v23 }
0x1431   :  { %v7008_v31 = vpop.eup %5760  ;;  %5266 = vmatprep.subr.bf16.mxu1 %v5871_v16 }
0x1432   :  { %v3503_v28 = vmul.f32 1.442695, %v3500_v61  ;;  %v3261_v5 = vsel %vm540_vm3, %v7008_v31, 0.0 }
0x1433   :  { %3262 = vadd.xlane.f32.xlu1 %v3261_v5  ;;  %v2876_v20 = vpop.permute.xlu1 %2875 }
0x1434   :  { %5768 = vpow2.f32 %v3503_v28 }
0x1435   :  { %v7013_v24 = vpop.eup %5762 }
0x1436   :  { %v3382_v14 = vsel %vm540_vm3, %v7013_v24, 0.0 }
0x1437   :  { %3383 = vadd.xlane.f32.xlu0 %v3382_v14 }
0x1439   :  { %v7017_v36 = vpop.eup %5764 }
0x143a   :  { %v3385_v58 = vsel %vm540_vm3, %v7017_v36, 0.0 }
0x143b   :  { %3386 = vadd.xlane.f32.xlu1 %v3385_v58 }
0x143d   :  { %v7021_v35 = vpop.eup %5766 }
0x143e   :  { %v3505_v34 = vsel %vm540_vm3, %v7021_v35, 0.0 }
0x143f   :  { %3506 = vadd.xlane.f32.xlu1 %v3505_v34 }
0x1441   :  { %v7025_v37 = vpop.eup %5768 }
0x1442   :  { %v3508_v13 = vsel %vm540_vm3, %v7025_v37, 0.0 }
0x1443   :  { %3509 = vadd.xlane.f32.xlu1 %v3508_v13 }
0x144d   :  { %3393 = vrot.lane.b32.xlu0 %v6761_v46, %s5874_s20 }
0x1451   :  { %3516 = vrot.lane.b32.xlu0 %v6761_v46, %s7457_s2 }
0x1454   :  { %3270 = vrot.lane.b32.xlu1 %v6761_v46, %s5873_s18 }
0x1460   :  { %v2742_v39 = vpop.xlane.xlu0 %2741 }
0x1461   :  { %5770 = vrcp.f32 %v2742_v39 }
0x1464   :  { %v2745_v41 = vpop.xlane.xlu1 %2744  ;;  %v2866_v45 = vpop.xlane.xlu0 %2865 }
0x1465   :  { %5772 = vrcp.f32 %v2745_v41 }
0x1468   :  { %v2869_v43 = vpop.xlane.xlu1 %2868  ;;  %v2989_v50 = vpop.xlane.xlu0 %2988 }
0x1469   :  { %5774 = vrcp.f32 %v2869_v43 }
0x146a   :  { %5776 = vrcp.f32 %v2866_v45 }
0x146c   :  { %v2992_v11 = vpop.xlane.xlu1 %2991 }
0x146d   :  { %5778 = vrcp.f32 %v2992_v11  ;;  %v3138_v53 = vpop.xlane.xlu0 %3137 }
0x146e   :  { %v5771_v32 = vpop.eup %5770  ;;  %5780 = vrcp.f32 %v2989_v50 }
0x146f   :  { %v2748_v52 = vmul.f32 %v5771_v32, %v6963_v0 }
0x1471   :  { %v3141_v40 = vpop.xlane.xlu1 %3140  ;;  %v2999_v1 = vpop.permute.xlu0 %2998 }
0x1472   :  { %v5773_v22 = vpop.eup %5772  ;;  %5782 = vrcp.f32 %v3141_v40 }
0x1473   :  { %v2749_v33 = vmul.f32 %v5773_v22, %v6966_v19  ;;  %5784 = vrcp.f32 %v3138_v53 }
0x1475   :  { %v2750_v60 = vpack.c.bf16 %v2749_v33, %v2748_v52 }
0x1476   :  { %v5775_v29 = vpop.eup %5774 }
0x1477   :  { %5257 = vmatmul.mubr.msk.bf16.vlgmr.msra.gmra.mxu1 %vm540_vm3, %v2750_v60  ;;  %v5777_v49 = vpop.eup %5776  ;;  %v2873_v2 = vmul.f32 %v5775_v29, %v6972_v30 }
0x1478   :  { %5267 = vmatpush3.bf16.msra.mxu1 %v2876_v20  ;;  %5268 = vmatprep.mubr.msk.bf16.mxu1 %vm5872_vm0, %v5871_v16  ;;  %v2872_v0 = vmul.f32 %v5777_v49, %v6970_v47  ;;  %v5536_v49 = vld [vmem:[%s7432_s5 + $0x68] sm:$0xff]  }
0x1479   :  { %5278 = vmatprep.subr.bf16.mxu1 %v5871_v16 }
0x147a   :  { %v2874_v19 = vpack.c.bf16 %v2873_v2, %v2872_v0  ;;  %v5779_v9 = vpop.eup %5778 }
0x147b   :  { %v5781_v15 = vpop.eup %5780  ;;  %v2996_v18 = vmul.f32 %v5779_v9, %v6984_v59 }
0x147c   :  { %v2995_v21 = vmul.f32 %v5781_v15, %v6978_v51 }
0x147e   :  { %v2997_v30 = vpack.c.bf16 %v2996_v18, %v2995_v21  ;;  %v5537_v18 = vld [vmem:[%s7432_s5 + $0x60] sm:$0xff]   ;;  %v5538_v21 = vld [vmem:[%s7432_s5 + $0x58] sm:$0xff]  }
0x147f   :  { %5269 = vmatmul.mubr.msk.bf16.vlgmr.msra.gmra.mxu1 %vm540_vm3, %v2874_v19  ;;  %v5783_v7 = vpop.eup %5782 }
0x1480   :  { %5279 = vmatpush3.bf16.msra.mxu1 %v2999_v1  ;;  %5280 = vmatprep.mubr.msk.bf16.mxu1 %vm5872_vm0, %v5871_v16  ;;  %v5785_v47 = vpop.eup %5784  ;;  %v3145_v44 = vmul.f32 %v5783_v7, %v6992_v3 }
0x1481   :  { %5290 = vmatprep.subr.bf16.mxu1 %v5871_v16  ;;  %v3144_v6 = vmul.f32 %v5785_v47, %v6986_v54  ;;  %v5539_v47 = vld [vmem:[%s7432_s5 + $0x50] sm:$0xff]  }
0x1483   :  { %v3146_v8 = vpack.c.bf16 %v3145_v44, %v3144_v6  ;;  %v5540_v6 = vld [vmem:[%s7432_s5 + $0x48] sm:$0xff]  }
0x1487   :  { %5281 = vmatmul.mubr.msk.bf16.vlgmr.msra.gmra.mxu1 %vm540_vm3, %v2997_v30 }
0x1488   :  { %5291 = vmatpush3.bf16.msra.mxu1 %v6761_v46  ;;  %5292 = vmatprep.mubr.msk.bf16.mxu1 %vm5872_vm0, %v5871_v16 }
0x1489   :  { %5302 = vmatprep.subr.bf16.mxu1 %v5871_v16 }
0x148f   :  { %5293 = vmatmul.mubr.msk.bf16.vlgmr.msra.gmra.mxu1 %vm540_vm3, %v3146_v8 }
0x1490   :  { %5304 = vmatprep.mubr.msk.bf16.mxu1 %vm5872_vm0, %v5871_v16 }
0x14b8   :  { %v3260_v51 = vpop.xlane.xlu1 %3259 }
0x14bc   :  { %v3263_v59 = vpop.xlane.xlu1 %3262 }
0x14bd   :  { %5786 = vrcp.f32 %v3263_v59 }
0x14be   :  { %5788 = vrcp.f32 %v3260_v51 }
0x14c0   :  { %v3384_v42 = vpop.xlane.xlu0 %3383 }
0x14c4   :  { %v3387_v46 = vpop.xlane.xlu1 %3386  ;;  %v3394_v14 = vpop.permute.xlu0 %3393 }
0x14c5   :  { %5790 = vrcp.f32 %v3387_v46 }
0x14c6   :  { %5792 = vrcp.f32 %v3384_v42  ;;  %v5541_v42 = vld [vmem:[%s7432_s5 + $0x40] sm:$0xff]  }
0x14c8   :  { %v3507_v55 = vpop.xlane.xlu1 %3506  ;;  %v3517_v20 = vpop.permute.xlu0 %3516 }
0x14ca   :  { %v5787_v3 = vpop.eup %5786 }
0x14cb   :  { %v5789_v23 = vpop.eup %5788  ;;  %v3267_v54 = vmul.f32 %v5787_v3, %v7008_v31 }
0x14cc   :  { %v3510_v48 = vpop.xlane.xlu1 %3509  ;;  %v3266_v61 = vmul.f32 %v5789_v23, %v7003_v26 }
0x14cd   :  { %5794 = vrcp.f32 %v3510_v48 }
0x14ce   :  { %5796 = vrcp.f32 %v3507_v55  ;;  %v3268_v28 = vpack.c.bf16 %v3267_v54, %v3266_v61 }
0x14d0   :  { %v3271_v10 = vpop.permute.xlu1 %3270 }
0x14d1   :  { %5303 = vmatpush3.bf16.msra.mxu1 %v3271_v10 }
0x14d2   :  { %5314 = vmatprep.subr.bf16.mxu1 %v5871_v16  ;;  %v5791_v5 = vpop.eup %5790 }
0x14d3   :  { %v5793_v58 = vpop.eup %5792  ;;  %v3391_v31 = vmul.f32 %v5791_v5, %v7017_v36 }
0x14d4   :  { %5305 = vmatmul.mubr.msk.bf16.vlgmr.msra.gmra.mxu1 %vm540_vm3, %v3268_v28  ;;  %v3390_v34 = vmul.f32 %v5793_v58, %v7013_v24 }
0x14d5   :  { %5315 = vmatpush3.bf16.msra.mxu1 %v3394_v14  ;;  %5316 = vmatprep.mubr.msk.bf16.mxu1 %vm5872_vm0, %v5871_v16 }
0x14d6   :  { %5326 = vmatprep.subr.bf16.mxu1 %v5871_v16  ;;  %v3392_v26 = vpack.c.bf16 %v3391_v31, %v3390_v34 }
0x14da   :  { %v5795_v13 = vpop.eup %5794 }
0x14db   :  { %v5797_v39 = vpop.eup %5796  ;;  %v3514_v41 = vmul.f32 %v5795_v13, %v7025_v37  ;;  %v5535_v37 = vld [vmem:[%s7432_s5 + $0x70] sm:$0xff]  }
0x14dc   :  { %5317 = vmatmul.mubr.msk.bf16.vlgmr.msra.gmra.mxu1 %vm540_vm3, %v3392_v26  ;;  %v3513_v43 = vmul.f32 %v5797_v39, %v7021_v35  ;;  %v5534_v35 = vld [vmem:[%s7432_s5 + $0x78] sm:$0xff]  }
0x14dd   :  { %5327 = vmatpush3.bf16.msra.mxu1 %v3517_v20  ;;  %5328 = vmatprep.mubr.msk.bf16.mxu1 %vm5872_vm0, %v5871_v16 }
0x14de   :  { %v3515_v45 = vpack.c.bf16 %v3514_v41, %v3513_v43  ;;  %5332 = vmatprep.subr.bf16.mxu0 %v5534_v35 }
0x14df   :  { %5333 = vmatpush3.bf16.msra.mxu0 %v5534_v35 }
0x14e0   :  { %5334 = vmatprep.subr.bf16.mxu0 %v5535_v37 }
0x14e3   :  { %5335 = vmatpush3.bf16.msra.mxu0 %v5535_v37 }
0x14e4   :  { %5329 = vmatmul.mubr.msk.bf16.vlgmr.msra.gmra.mxu1 %vm540_vm3, %v3515_v45  ;;  %5336 = vmatprep.subr.bf16.mxu0 %v5536_v49 }
0x14e5   :  { %3925 = vmatprep.mubr.bf16.mxu1 %v5868_v27 }
0x14e7   :  { %5337 = vmatpush3.bf16.msra.mxu0 %v5536_v49 }
0x14e8   :  { %5338 = vmatprep.subr.bf16.mxu0 %v5537_v18 }
0x14eb   :  { %5339 = vmatpush3.bf16.msra.mxu0 %v5537_v18 }
0x14ec   :  { %5340 = vmatprep.subr.bf16.mxu0 %v5538_v21 }
0x14ef   :  { %5341 = vmatpush3.bf16.msra.mxu0 %v5538_v21 }
0x14f0   :  { %5342 = vmatprep.subr.bf16.mxu0 %v5539_v47 }
0x14f3   :  { %5343 = vmatpush3.bf16.msra.mxu0 %v5539_v47 }
0x14f4   :  { %5344 = vmatprep.subr.bf16.mxu0 %v5540_v6 }
0x14f7   :  { %5345 = vmatpush3.bf16.msra.mxu0 %v5540_v6 }
0x14f8   :  { %5346 = vmatprep.subr.bf16.mxu0 %v5541_v42 }
0x14fb   :  { %5347 = vmatpush3.bf16.msra.mxu0 %v5541_v42 }
0x1537   :  { %v2792_v24 = vpop.f32.mrf.mxu1 }
0x1539   :  { %v5258_v36 = vpop.f32.mrf.mxu1 }
0x153b   :  { %v2795_v11 = vpop.f32.mrf.mxu1 }
0x153c   :  { %v5392_v32 = vpack.i.bf16 %v2795_v11, %v2792_v24 }
0x153d   :  { %v5259_v50 = vpop.f32.mrf.mxu1 }
0x153e   :  { %5393 = vrot.lane.b32.xlu0 %v5392_v32, %s7457_s2 }
0x153f   :  { %v2915_v22 = vpop.f32.mrf.mxu1 }
0x1541   :  { %v5270_v52 = vpop.f32.mrf.mxu1 }
0x1543   :  { %v2918_v33 = vpop.f32.mrf.mxu1 }
0x1544   :  { %v5397_v16 = vpack.i.bf16 %v2918_v33, %v2915_v22 }
0x1545   :  { %v5271_v60 = vpop.f32.mrf.mxu1 }
0x1546   :  { %5398 = vrot.lane.b32.xlu1 %v5397_v16, %s5874_s20 }
0x1547   :  { %v3038_v29 = vpop.f32.mrf.mxu1 }
0x1549   :  { %v5282_v40 = vpop.f32.mrf.mxu1 }
0x154b   :  { %v3041_v53 = vpop.f32.mrf.mxu1 }
0x154c   :  { %v5402_v2 = vpack.i.bf16 %v3041_v53, %v3038_v29 }
0x154d   :  { %v5283_v0 = vpop.f32.mrf.mxu1 }
0x154e   :  { %5403 = vrot.lane.b32.xlu1 %v5402_v2, %s5873_s18 }
0x154f   :  { %v7087_v19 = vpop.f32.mrf.mxu1 }
0x1551   :  { %v5294_v9 = vpop.f32.mrf.mxu1 }
0x1553   :  { %v3187_v1 = vpop.f32.mrf.mxu1 }
0x1555   :  { %v5295_v15 = vpop.f32.mrf.mxu1 }
0x1594   :  { %v3310_v30 = vpop.f32.mrf.mxu1 }
0x1596   :  { %v5306_v7 = vpop.f32.mrf.mxu1 }
0x1598   :  { %v3313_v44 = vpop.f32.mrf.mxu1 }
0x1599   :  { %v5407_v8 = vpack.i.bf16 %v3313_v44, %v3310_v30 }
0x159a   :  { %v5307_v51 = vpop.f32.mrf.mxu1 }
0x159b   :  { %5408 = vrot.lane.b32.xlu0 %v5407_v8, %s7457_s2 }
0x159c   :  { %v3433_v59 = vpop.f32.mrf.mxu1 }
0x159e   :  { %v5318_v46 = vpop.f32.mrf.mxu1 }
0x15a0   :  { %v3436_v55 = vpop.f32.mrf.mxu1 }
0x15a1   :  { %v5412_v3 = vpack.i.bf16 %v3436_v55, %v3433_v59 }
0x15a2   :  { %v5319_v48 = vpop.f32.mrf.mxu1 }
0x15a3   :  { %5413 = vrot.lane.b32.xlu0 %v5412_v3, %s5874_s20 }
0x15a4   :  { %v3556_v23 = vpop.f32.mrf.mxu1 }
0x15a6   :  { %v5330_v54 = vpop.f32.mrf.mxu1 }
0x15a8   :  { %v3559_v10 = vpop.f32.mrf.mxu1 }
0x15a9   :  { %v5417_v61 = vpack.i.bf16 %v3559_v10, %v3556_v23 }
0x15aa   :  { %v5331_v28 = vpop.f32.mrf.mxu1 }
0x15ab   :  { %5418 = vrot.lane.b32.xlu1 %v5417_v61, %s5873_s18  ;;  %v5547_v61 = vld [vmem:[%s7437_s10 + $0xe4] ss:$8 sps:$4 sm:$0xff]   ;;  %v5545_v28 = vld [vmem:[%s7437_s10 + $0xe0] ss:$8 sps:$4 sm:$0xff]  }
0x15b0   :  { %v5394_v5 = vpop.permute.xlu0 %5393 }
0x15b1   :  { %v5396_v58 = vunpack.i.h.bf16 %v5394_v5  ;;  %v5395_v31 = vunpack.i.l.bf16 %v5394_v5  ;;  %v5550_v5 = vld [vmem:[%s7437_s10 + $0xd4] ss:$8 sps:$4 sm:$0xff]  }
0x15b3   :  { %v3070_v20 = vsel %vm490_vm1, %v6866_v4, %v5396_v58  ;;  %v3069_v39 = vsel %vm490_vm1, %v6864_v25, %v5395_v31  ;;  %v5553_v58 = vld [vmem:[%s7437_s10 + $0xc4] ss:$8 sps:$4 sm:$0xff]   ;;  %v5551_v31 = vld [vmem:[%s7437_s10 + $0xc0] ss:$8 sps:$4 sm:$0xff]  }
0x15b8   :  { %v5399_v14 = vpop.permute.xlu1 %5398 }
0x15b9   :  { %v5401_v34 = vunpack.i.h.bf16 %v5399_v14  ;;  %v5400_v26 = vunpack.i.l.bf16 %v5399_v14  ;;  %v5548_v14 = vld [vmem:[%s7437_s10 + $0xd0] ss:$8 sps:$4 sm:$0xff]  }
0x15bb   :  { %v3072_v45 = vsel %vm1006_vm5, %v3070_v20, %v5401_v34  ;;  %v3071_v24 = vsel %vm1006_vm5, %v3069_v39, %v5400_v26  ;;  %v5556_v34 = vld [vmem:[%s7437_s10 + $0xb4] ss:$8 sps:$4 sm:$0xff]   ;;  %v5554_v26 = vld [vmem:[%s7437_s10 + $0xb0] ss:$8 sps:$4 sm:$0xff]   ;;  %v5557_v20 = vld [vmem:[%s7437_s10 + $0xa0] ss:$8 sps:$4 sm:$0xff]  }
0x15bc   :  { %v5562_v39 = vld [vmem:[%s7437_s10 + $0x94] ss:$8 sps:$4 sm:$0xff]  }
0x15c0   :  { %v5404_v13 = vpop.permute.xlu1 %5403 }
0x15c1   :  { %v5406_v41 = vunpack.i.h.bf16 %v5404_v13  ;;  %v5405_v43 = vunpack.i.l.bf16 %v5404_v13  ;;  %v5559_v13 = vld [vmem:[%s7437_s10 + $0xa4] ss:$8 sps:$4 sm:$0xff]  }
0x15c3   :  { %v3073_v36 = vsel %vm1009_vm6, %v3071_v24, %v5405_v43  ;;  %v3074_v11 = vsel %vm1009_vm6, %v3072_v45, %v5406_v41  ;;  %v5560_v41 = vld [vmem:[%s7437_s10 + $0x90] ss:$8 sps:$4 sm:$0xff]   ;;  %v5565_v43 = vld [vmem:[%s7437_s10 + $0x84] ss:$8 sps:$4 sm:$0xff]   ;;  %v5563_v45 = vld [vmem:[%s7437_s10 + $0x80] ss:$8 sps:$4 sm:$0xff]  }
0x15c4   :  { %v3610_v32 = vpack.c.bf16 %v3074_v11, %v3073_v36 }
0x15c6   :  { %5348 = vmatprep.mubr.bf16.mxu0 %v3610_v32 }
0x160d   :  { %v5409_v50 = vpop.permute.xlu0 %5408 }
0x160e   :  { %v5411_v52 = vunpack.i.h.bf16 %v5409_v50  ;;  %v5410_v33 = vunpack.i.l.bf16 %v5409_v50 }
0x1610   :  { %v3588_v25 = vsel %vm490_vm1, %v3187_v1, %v5411_v52  ;;  %v3587_v35 = vsel %vm490_vm1, %v7087_v19, %v5410_v33 }
0x1615   :  { %v5414_v22 = vpop.permute.xlu0 %5413 }
0x1616   :  { %v5416_v4 = vunpack.i.h.bf16 %v5414_v22  ;;  %v5415_v16 = vunpack.i.l.bf16 %v5414_v22 }
0x1618   :  { %v3590_v40 = vsel %vm1006_vm5, %v3588_v25, %v5416_v4  ;;  %v3589_v49 = vsel %vm1006_vm5, %v3587_v35, %v5415_v16 }
0x161d   :  { %v5419_v60 = vpop.permute.xlu1 %5418 }
0x161e   :  { %v5421_v37 = vunpack.i.h.bf16 %v5419_v60  ;;  %v5420_v29 = vunpack.i.l.bf16 %v5419_v60 }
0x1620   :  { %v3592_v53 = vsel %vm1009_vm6, %v3590_v40, %v5421_v37  ;;  %v3591_v2 = vsel %vm1009_vm6, %v3589_v49, %v5420_v29  ;;  %v4801_v29 = vld [vmem:[%s7435_s8 + $0x1] ss:$0 sm:$0xff] }
0x1621   :  { %v3611_v0 = vpack.c.bf16 %v3592_v53, %v3591_v2 }
0x1623   :  { %5349 = vmatmul.mubr.bf16.vlgmr.msra.gmra.mxu0 %v3611_v0  ;;  %v4802_v0 = vld [vmem:[%s7436_s9 + $0x1] ss:$0 sm:$0xff] }
0x16e3   :  { %v5350_v9 = vpop.f32.mrf.mxu0 }
0x16e4   :  { %v7127_v21 = vadd.f32 %v5350_v9, %v6632_v12  ;;  %v5544_v12 = vld [vmem:[%s7437_s10 + $0xf4] ss:$8 sps:$4 sm:$0xff]  }
0x16e5   :  { %v3694_v15 = vpop.f32.mrf.mxu0  ;;  %3893 = vmatprep.subr.bf16.mxu1 %v5544_v12 }
0x16e6   :  { %v7123_v18 = vadd.f32 %v3694_v15, %v6610_v56  ;;  %v5542_v56 = vld [vmem:[%s7437_s10 + $0xf0] ss:$8 sps:$4 sm:$0xff]  }
0x16e7   :  { %v5351_v1 = vpop.f32.mrf.mxu0  ;;  %3894 = vmatpush1.bf16.msra.mxu1 %v5542_v56 }
0x16e8   :  { %3717 = vadd.xlane.f32.xlu0 %v7123_v18  ;;  %v7135_v7 = vadd.f32 %v5351_v1, %v6638_v17  ;;  %3895 = vmatprep.subr.bf16.mxu1 %v5547_v61  ;;  %v5576_v61 = vld [vmem:[%s7439_s12 + $0xd0] sm:$0xff]  }
0x16e9   :  { %v3697_v19 = vpop.f32.mrf.mxu0 }
0x16ea   :  { %v7130_v30 = vadd.f32 %v3697_v19, %v6614_v57 }
0x16eb   :  { %3896 = vmatpush1.bf16.msra.mxu1 %v5545_v28  ;;  %v5577_v28 = vld [vmem:[%s7439_s12 + $0x90] sm:$0xff]  }
0x16ec   :  { %3721 = vadd.xlane.f32.xlu0 %v7127_v21  ;;  %3719 = vadd.xlane.f32.xlu1 %v7130_v30 }
0x16ed   :  { %3897 = vmatprep.subr.bf16.mxu1 %v5550_v5  ;;  %v5578_v5 = vld [vmem:[%s7439_s12 + $0xc8] sm:$0xff]  }
0x16ef   :  { %3898 = vmatpush1.bf16.msra.mxu1 %v5548_v14  ;;  %v5579_v14 = vld [vmem:[%s7439_s12 + $0x88] sm:$0xff]  }
0x16f0   :  { %3723 = vadd.xlane.f32.xlu0 %v7135_v7  ;;  %3899 = vmatprep.subr.bf16.mxu1 %v5553_v58  ;;  %v5580_v58 = vld [vmem:[%s7439_s12 + $0xc0] sm:$0xff]  }
0x16f3   :  { %3900 = vmatpush1.bf16.msra.mxu1 %v5551_v31  ;;  %v5581_v31 = vld [vmem:[%s7439_s12 + $0x80] sm:$0xff]  }
0x16f4   :  { %3901 = vmatprep.subr.bf16.mxu1 %v5556_v34  ;;  %v4819_v34 = vld [vmem:[%s7438_s11 + $0x2] sm:$0x3] }
0x16f7   :  { %3902 = vmatpush1.bf16.msra.mxu1 %v5554_v26  ;;  %v3806_v26 = vrot.slane %v4819_v34, %v1737_v38 }
0x16f8   :  { %3903 = vmatprep.subr.bf16.mxu1 %v5559_v13  ;;  %v3810_v13 = vrot.slane %v4819_v34, %v1741_v62 }
0x16fb   :  { %3904 = vmatpush1.bf16.msra.mxu1 %v5557_v20 }
0x16fc   :  { %3905 = vmatprep.subr.bf16.mxu1 %v5562_v39 }
0x16ff   :  { %3906 = vmatpush1.bf16.msra.mxu1 %v5560_v41 }
0x1700   :  { %3907 = vmatprep.subr.bf16.mxu1 %v5565_v43 }
0x1703   :  { %3908 = vmatpush1.bf16.msra.mxu1 %v5563_v45 }
0x1771   :  { %v3718_v57 = vpop.xlane.xlu0 %3717 }
0x1772   :  { %v3725_v47 = vmul.f32 0.0078125, %v3718_v57 }
0x1774   :  { %v7145_v44 = vsub.f32 %v7123_v18, %v3725_v47 }
0x1775   :  { %v3722_v6 = vpop.xlane.xlu0 %3721  ;;  %v3720_v17 = vpop.xlane.xlu1 %3719 }
0x1776   :  { %v3727_v8 = vmul.f32 0.0078125, %v3722_v6  ;;  %v3726_v51 = vmul.f32 0.0078125, %v3720_v17  ;;  %v3733_v59 = vmul.f32 %v7145_v44, %v7145_v44 }
0x1778   :  { %v7150_v46 = vsub.f32 %v7127_v21, %v3727_v8  ;;  %v3730_v42 = vsub.f32 %v7130_v30, %v3726_v51  ;;  %3737 = vadd.xlane.f32.xlu0 %v3733_v59  ;;  %v5566_v51 = vld [vmem:[%s7439_s12 + $0xf8] sm:$0xff]  }
0x1779   :  { %v3724_v55 = vpop.xlane.xlu0 %3723  ;;  %v5567_v59 = vld [vmem:[%s7439_s12 + $0xb8] sm:$0xff]   ;;  %5052 = vmatprep.subr.bf16.mxu0 %v5566_v51 }
0x177a   :  { %v3728_v3 = vmul.f32 0.0078125, %v3724_v55  ;;  %v3735_v48 = vmul.f32 %v7150_v46, %v7150_v46  ;;  %v3734_v23 = vmul.f32 %v3730_v42, %v3730_v42  ;;  %5053 = vmatpush3.bf16.msra.mxu0 %v5567_v59  ;;  %v5570_v55 = vld [vmem:[%s7439_s12 + $0xe8] sm:$0xff]  }
0x177c   :  { %v3732_v54 = vsub.f32 %v7135_v7, %v3728_v3  ;;  %3741 = vadd.xlane.f32.xlu0 %v3735_v48  ;;  %3739 = vadd.xlane.f32.xlu1 %v3734_v23  ;;  %v5571_v3 = vld [vmem:[%s7439_s12 + $0xa8] sm:$0xff]   ;;  %v5572_v48 = vld [vmem:[%s7439_s12 + $0xe0] sm:$0xff]  }
0x177d   :  { %v5573_v23 = vld [vmem:[%s7439_s12 + $0xa0] sm:$0xff]  }
0x177e   :  { %v3736_v10 = vmul.f32 %v3732_v54, %v3732_v54 }
0x1780   :  { %3743 = vadd.xlane.f32.xlu1 %v3736_v10  ;;  %v5575_v10 = vld [vmem:[%s7439_s12 + $0x98] sm:$0xff]  }
0x1801   :  { %v3738_v24 = vpop.xlane.xlu0 %3737 }
0x1802   :  { %v3745_v36 = vmul.f32 0.0078125, %v3738_v24 }
0x1804   :  { %v3749_v11 = vadd.f32 1e-05, %v3745_v36 }
0x1805   :  { %v3742_v32 = vpop.xlane.xlu0 %3741  ;;  %v3740_v50 = vpop.xlane.xlu1 %3739 }
0x1806   :  { %5798 = vrsqrt.f32 %v3749_v11  ;;  %v3747_v22 = vmul.f32 0.0078125, %v3742_v32  ;;  %v3746_v52 = vmul.f32 0.0078125, %v3740_v50 }
0x1808   :  { %v3750_v33 = vadd.f32 1e-05, %v3746_v52  ;;  %v3751_v4 = vadd.f32 1e-05, %v3747_v22 }
0x1809   :  { %v3744_v16 = vpop.xlane.xlu1 %3743 }
0x180a   :  { %v3748_v60 = vmul.f32 0.0078125, %v3744_v16  ;;  %5800 = vrsqrt.f32 %v3750_v33 }
0x180b   :  { %5802 = vrsqrt.f32 %v3751_v4 }
0x180c   :  { %v3752_v25 = vadd.f32 1e-05, %v3748_v60 }
0x180e   :  { %5804 = vrsqrt.f32 %v3752_v25 }
0x1813   :  { %v5799_v35 = vpop.eup %5798 }
0x1814   :  { %v3757_v37 = vmul.f32 %v5799_v35, %v7145_v44 }
0x1816   :  { %v3767_v53 = vmul.f32 %v4801_v29, %v3757_v37 }
0x1817   :  { %v5801_v40 = vpop.eup %5800 }
0x1818   :  { %v3758_v49 = vmul.f32 %v5801_v40, %v3730_v42  ;;  %v5803_v2 = vpop.eup %5802  ;;  %v3777_v19 = vadd.f32 %v4802_v0, %v3767_v53  ;;  %v5569_v42 = vld [vmem:[%s7439_s12 + $0xb0] sm:$0xff]  }
0x1819   :  { %v3759_v12 = vmul.f32 %v5803_v2, %v7150_v46  ;;  %v5568_v46 = vld [vmem:[%s7439_s12 + $0xf0] sm:$0xff]  }
0x181a   :  { %v3768_v15 = vmul.f32 %v4801_v29, %v3758_v49  ;;  %5054 = vmatprep.subr.bf16.mxu0 %v5568_v46 }
0x181b   :  { %v5805_v9 = vpop.eup %5804  ;;  %v3769_v44 = vmul.f32 %v4801_v29, %v3759_v12  ;;  %5055 = vmatpush3.bf16.msra.mxu0 %v5569_v42 }
0x181c   :  { %v3760_v1 = vmul.f32 %v5805_v9, %v3732_v54  ;;  %v3778_v56 = vadd.f32 %v4802_v0, %v3768_v15  ;;  %5056 = vmatprep.subr.bf16.mxu0 %v5570_v55  ;;  %v5574_v54 = vld [vmem:[%s7439_s12 + $0xd8] sm:$0xff]  }
0x181d   :  { %v3779_v17 = vadd.f32 %v4802_v0, %v3769_v44 }
0x181e   :  { %v3798_v57 = vpack.c.bf16 %v3778_v56, %v3777_v19  ;;  %v3770_v47 = vmul.f32 %v4801_v29, %v3760_v1 }
0x181f   :  { %5057 = vmatpush3.bf16.msra.mxu0 %v5571_v3 }
0x1820   :  { %3926 = vmatmul.mubr.bf16.vlgmr.msra.gmra.mxu1 %v3798_v57  ;;  %v3780_v6 = vadd.f32 %v4802_v0, %v3770_v47  ;;  %5058 = vmatprep.subr.bf16.mxu0 %v5572_v48 }
0x1821   :  { %3935 = vmatprep.mubr.bf16.mxu1 %v5868_v27 }
0x1822   :  { %v3799_v8 = vpack.c.bf16 %v3780_v6, %v3779_v17 }
0x1823   :  { %5059 = vmatpush3.bf16.msra.mxu0 %v5573_v23 }
0x1824   :  { %5060 = vmatprep.subr.bf16.mxu0 %v5574_v54 }
0x1827   :  { %5061 = vmatpush3.bf16.msra.mxu0 %v5575_v10 }
0x1828   :  { %3936 = vmatmul.mubr.bf16.gmra.mxu1 %v3799_v8  ;;  %5062 = vmatprep.subr.bf16.mxu0 %v5576_v61 }
0x1829   :  { %4508 = vmatprep.mubr.bf16.mxu1 %v5868_v27 }
0x182b   :  { %5063 = vmatpush3.bf16.msra.mxu0 %v5577_v28 }
0x182c   :  { %5064 = vmatprep.subr.bf16.mxu0 %v5578_v5 }
0x182f   :  { %5065 = vmatpush3.bf16.msra.mxu0 %v5579_v14 }
0x1830   :  { %5066 = vmatprep.subr.bf16.mxu0 %v5580_v58 }
0x1833   :  { %5067 = vmatpush3.bf16.msra.mxu0 %v5581_v31 }
0x18e0   :  { %v3927_v20 = vpop.f32.mrf.mxu1 }
0x18e1   :  { %v7263_v39 = vadd.f32 %v3927_v20, %v3806_v26 }
0x18e2   :  { %v3929_v41 = vpop.f32.mrf.mxu1 }
0x18e3   :  { %v3954_v43 = vmul.f32 0.044715, %v7263_v39  ;;  %v7266_v45 = vadd.f32 %v3929_v41, %v3810_v13 }
0x18e4   :  { %v3931_v24 = vpop.f32.mrf.mxu1 }
0x18e5   :  { %v3962_v36 = vmul.f32 %v3954_v43, %v7263_v39  ;;  %v3955_v11 = vmul.f32 0.044715, %v7266_v45  ;;  %v3932_v32 = vadd.f32 %v3931_v24, %v3806_v26 }
0x18e6   :  { %v3933_v50 = vpop.f32.mrf.mxu1 }
0x18e7   :  { %v3970_v38 = vmul.f32 %v3962_v36, %v7263_v39  ;;  %v3963_v63 = vmul.f32 %v3955_v11, %v7266_v45  ;;  %v3956_v62 = vmul.f32 0.044715, %v3932_v32  ;;  %v3934_v22 = vadd.f32 %v3933_v50, %v3810_v13 }
0x18e8   :  { %v3937_v52 = vpop.f32.mrf.mxu1  ;;  %v3948_v24 = vmul.f32 0.5, %v3932_v32  ;;  %v3947_v11 = vmul.f32 0.5, %v7266_v45 }
0x18e9   :  { %v3978_v33 = vadd.f32 %v3970_v38, %v7263_v39  ;;  %v3971_v4 = vmul.f32 %v3963_v63, %v7266_v45  ;;  %v3964_v16 = vmul.f32 %v3956_v62, %v3932_v32  ;;  %v3957_v60 = vmul.f32 0.044715, %v3934_v22 }
0x18ea   :  { %v7274_v25 = vadd.f32 %v3937_v52, %v3806_v26  ;;  %v3939_v35 = vpop.f32.mrf.mxu1  ;;  %v3949_v50 = vmul.f32 0.5, %v3934_v22  ;;  %v3946_v63 = vmul.f32 0.5, %v7263_v39 }
0x18eb   :  { %v3986_v37 = vmul.f32 0.7978846, %v3978_v33  ;;  %v3972_v29 = vmul.f32 %v3964_v16, %v3932_v32  ;;  %v3965_v40 = vmul.f32 %v3957_v60, %v3934_v22  ;;  %v7276_v49 = vadd.f32 %v3939_v35, %v3810_v13 }
0x18ec   :  { %v3958_v53 = vmul.f32 0.044715, %v7274_v25  ;;  %v3941_v2 = vpop.f32.mrf.mxu1  ;;  %v3979_v0 = vadd.f32 %v3971_v4, %v7266_v45 }
0x18ed   :  { %v3980_v9 = vadd.f32 %v3972_v29, %v3932_v32  ;;  %v3973_v15 = vmul.f32 %v3965_v40, %v3934_v22  ;;  %v3959_v1 = vmul.f32 0.044715, %v7276_v49  ;;  %5806 = vtanh.f32 %v3986_v37 }
0x18ee   :  { %v3966_v19 = vmul.f32 %v3958_v53, %v7274_v25  ;;  %v3942_v56 = vadd.f32 %v3941_v2, %v3806_v26  ;;  %v3943_v12 = vpop.f32.mrf.mxu1  ;;  %v3987_v57 = vmul.f32 0.7978846, %v3979_v0 }
0x18ef   :  { %v3988_v47 = vmul.f32 0.7978846, %v3980_v9  ;;  %v3967_v44 = vmul.f32 %v3959_v1, %v7276_v49  ;;  %v3944_v6 = vadd.f32 %v3943_v12, %v3810_v13  ;;  %v3981_v17 = vadd.f32 %v3973_v15, %v3934_v22 }
0x18f0   :  { %v3974_v8 = vmul.f32 %v3966_v19, %v7274_v25  ;;  %v3960_v51 = vmul.f32 0.044715, %v3942_v56  ;;  %5808 = vtanh.f32 %v3987_v57  ;;  %v3952_v32 = vmul.f32 0.5, %v3942_v56 }
0x18f1   :  { %5810 = vtanh.f32 %v3988_v47  ;;  %v3975_v59 = vmul.f32 %v3967_v44, %v7276_v49  ;;  %v3961_v46 = vmul.f32 0.044715, %v3944_v6  ;;  %v3989_v42 = vmul.f32 0.7978846, %v3981_v17 }
0x18f2   :  { %v3968_v55 = vmul.f32 %v3960_v51, %v3942_v56  ;;  %v3982_v3 = vadd.f32 %v3974_v8, %v7274_v25  ;;  %v3951_v22 = vmul.f32 0.5, %v7276_v49  ;;  %v3953_v0 = vmul.f32 0.5, %v3944_v6 }
0x18f3   :  { %v3969_v48 = vmul.f32 %v3961_v46, %v3944_v6  ;;  %5812 = vtanh.f32 %v3989_v42  ;;  %v3983_v23 = vadd.f32 %v3975_v59, %v7276_v49  ;;  %v3950_v9 = vmul.f32 0.5, %v7274_v25  ;;  %v4885_v49 = vld [vmem:[%s7440_s13 + $0x1] ss:$0 sm:$0xff] }
0x18f4   :  { %v3976_v54 = vmul.f32 %v3968_v55, %v3942_v56  ;;  %v3990_v10 = vmul.f32 0.7978846, %v3982_v3 }
0x18f5   :  { %v3977_v61 = vmul.f32 %v3969_v48, %v3944_v6  ;;  %v3991_v28 = vmul.f32 0.7978846, %v3983_v23 }
0x18f6   :  { %v3984_v5 = vadd.f32 %v3976_v54, %v3942_v56 }
0x18f7   :  { %v3985_v14 = vadd.f32 %v3977_v61, %v3944_v6  ;;  %5814 = vtanh.f32 %v3991_v28 }
0x18f8   :  { %v3992_v58 = vmul.f32 0.7978846, %v3984_v5  ;;  %5816 = vtanh.f32 %v3990_v10 }
0x18f9   :  { %v3993_v31 = vmul.f32 0.7978846, %v3985_v14  ;;  %v5584_v14 = vld [vmem:[%s7443_s16 + $0xe4] ss:$16 sps:$4 sm:$0xff]  }
0x18fa   :  { %5818 = vtanh.f32 %v3992_v58  ;;  %v5807_v34 = vpop.eup %5806  ;;  %v5587_v58 = vld [vmem:[%s7443_s16 + $0xec] ss:$16 sps:$4 sm:$0xff]   ;;  %4476 = vmatprep.subr.bf16.mxu1 %v5584_v14 }
0x18fb   :  { %5820 = vtanh.f32 %v3993_v31  ;;  %v4002_v36 = vadd.f32 1.0, %v5807_v34  ;;  %4529 = vmatprep.subr.bf16.mxu0 %v5587_v58  ;;  %v4887_v58 = vld [vmem:[%s7442_s15] ss:$0 sm:$0xff] }
0x18fd   :  { %v5809_v26 = vpop.eup %5808  ;;  %v4010_v16 = vmul.f32 %v4002_v36, %v3946_v63 }
0x18fe   :  { %v5811_v13 = vpop.eup %5810  ;;  %v4003_v20 = vadd.f32 1.0, %v5809_v26 }
0x18ff   :  { %v4004_v41 = vadd.f32 1.0, %v5811_v13 }
0x1900   :  { %v5813_v43 = vpop.eup %5812  ;;  %v4011_v52 = vmul.f32 %v4003_v20, %v3947_v11 }
0x1901   :  { %v4005_v38 = vadd.f32 1.0, %v5813_v43  ;;  %v4012_v62 = vmul.f32 %v4004_v41, %v3948_v24 }
0x1903   :  { %v4013_v33 = vmul.f32 %v4005_v38, %v3949_v50  ;;  %v4051_v37 = vpack.c.bf16 %v4012_v62, %v4010_v16  ;;  %v5588_v16 = vld [vmem:[%s7443_s16 + $0xc0] ss:$16 sps:$4 sm:$0xff]  }
0x1904   :  { %v5815_v4 = vpop.eup %5814 }
0x1905   :  { %v5817_v60 = vpop.eup %5816  ;;  %v4052_v35 = vpack.c.bf16 %v4013_v33, %v4011_v52  ;;  %v4007_v40 = vadd.f32 1.0, %v5815_v4  ;;  %v5590_v33 = vld [vmem:[%s7443_s16 + $0xc4] ss:$16 sps:$4 sm:$0xff]   ;;  %v5593_v4 = vld [vmem:[%s7443_s16 + $0xcc] ss:$16 sps:$4 sm:$0xff]  }
0x1906   :  { %v4006_v2 = vadd.f32 1.0, %v5817_v60  ;;  %v5591_v60 = vld [vmem:[%s7443_s16 + $0xc8] ss:$16 sps:$4 sm:$0xff]  }
0x1907   :  { %v5819_v29 = vpop.eup %5818  ;;  %4183 = vmatprep.mubr.bf16.mxu0 %v4052_v35  ;;  %v4015_v1 = vmul.f32 %v4007_v40, %v3951_v22  ;;  %v5596_v35 = vld [vmem:[%s7443_s16 + $0xa4] ss:$16 sps:$4 sm:$0xff]   ;;  %v5597_v40 = vld [vmem:[%s7443_s16 + $0xa8] ss:$16 sps:$4 sm:$0xff]  }
0x1908   :  { %v5821_v53 = vpop.eup %5820  ;;  %4184 = vmatmul.mubr.bf16.vlgmr.msra.gmra.mxu0 %v4051_v37  ;;  %v4008_v45 = vadd.f32 1.0, %v5819_v29  ;;  %v4014_v12 = vmul.f32 %v4006_v2, %v3950_v9  ;;  %v5599_v37 = vld [vmem:[%s7443_s16 + $0xac] ss:$16 sps:$4 sm:$0xff]   ;;  %v5594_v29 = vld [vmem:[%s7443_s16 + $0xa0] ss:$16 sps:$4 sm:$0xff]  }
0x1909   :  { %v4009_v39 = vadd.f32 1.0, %v5821_v53  ;;  %v5602_v53 = vld [vmem:[%s7443_s16 + $0x84] ss:$16 sps:$4 sm:$0xff]   ;;  %v5600_v2 = vld [vmem:[%s7443_s16 + $0x80] ss:$16 sps:$4 sm:$0xff]  }
0x190a   :  { %v4016_v15 = vmul.f32 %v4008_v45, %v3952_v32  ;;  %v5605_v32 = vld [vmem:[%s7443_s16 + $0x8c] ss:$16 sps:$4 sm:$0xff]   ;;  %v5603_v45 = vld [vmem:[%s7443_s16 + $0x88] ss:$16 sps:$4 sm:$0xff]   ;;  %v5608_v22 = vld [vmem:[%s7443_s16 + $0x64] ss:$16 sps:$4 sm:$0xff]  }
0x190b   :  { %v4017_v19 = vmul.f32 %v4009_v39, %v3953_v0  ;;  %v5611_v0 = vld [vmem:[%s7443_s16 + $0x6c] ss:$16 sps:$4 sm:$0xff]   ;;  %v5606_v39 = vld [vmem:[%s7443_s16 + $0x60] ss:$16 sps:$4 sm:$0xff]   ;;  %v5609_v9 = vld [vmem:[%s7443_s16 + $0x68] ss:$16 sps:$4 sm:$0xff]  }
0x190c   :  { %v4053_v47 = vpack.c.bf16 %v4016_v15, %v4014_v12  ;;  %v5614_v15 = vld [vmem:[%s7443_s16 + $0x44] ss:$16 sps:$4 sm:$0xff]   ;;  %v5615_v12 = vld [vmem:[%s7443_s16 + $0x48] ss:$16 sps:$4 sm:$0xff]  }
0x190d   :  { %v4054_v57 = vpack.c.bf16 %v4017_v19, %v4015_v1  ;;  %v5617_v1 = vld [vmem:[%s7443_s16 + $0x4c] ss:$16 sps:$4 sm:$0xff]   ;;  %v5612_v19 = vld [vmem:[%s7443_s16 + $0x40] ss:$16 sps:$4 sm:$0xff]  }
0x190f   :  { %4191 = vmatprep.mubr.bf16.mxu0 %v4054_v57  ;;  %v5620_v57 = vld [vmem:[%s7443_s16 + $0x24] ss:$16 sps:$4 sm:$0xff]  }
0x1910   :  { %4192 = vmatmul.mubr.bf16.gmra.mxu0 %v4053_v47  ;;  %v5623_v47 = vld [vmem:[%s7443_s16 + $0x2c] ss:$16 sps:$4 sm:$0xff]  }
0x1911   :  { %4561 = vmatprep.mubr.bf16.mxu0 %v5868_v27 }
0x19c8   :  { %v5068_v44 = vpop.f32.mrf.mxu0 }
0x19ca   :  { %v5069_v56 = vpop.f32.mrf.mxu0 }
0x19cb   :  { %v5070_v17 = vadd.f32 %v5069_v56, %v5068_v44  ;;  %v5618_v44 = vld [vmem:[%s7443_s16 + $0x20] ss:$16 sps:$4 sm:$0xff]   ;;  %v5621_v56 = vld [vmem:[%s7443_s16 + $0x28] ss:$16 sps:$4 sm:$0xff]  }
0x19cc   :  { %v5071_v8 = vpop.f32.mrf.mxu0 }
0x19cd   :  { %v4200_v25 = vadd.f32 %v5070_v17, %v7123_v18  ;;  %v5626_v17 = vld [vmem:[%s7443_s16 + $0x4] ss:$16 sps:$4 sm:$0xff]  }
0x19ce   :  { %v5072_v6 = vpop.f32.mrf.mxu0 }
0x19cf   :  { %v5073_v51 = vadd.f32 %v5072_v6, %v5071_v8  ;;  %v4212_v59 = vadd.f32 %v4885_v49, %v4200_v25  ;;  %v5629_v8 = vld [vmem:[%s7443_s16 + $0xc] ss:$16 sps:$4 sm:$0xff]   ;;  %v5627_v25 = vld [vmem:[%s7443_s16 + $0x8] ss:$16 sps:$4 sm:$0xff]  }
0x19d0   :  { %v5074_v46 = vpop.f32.mrf.mxu0 }
0x19d1   :  { %v4201_v42 = vadd.f32 %v5073_v51, %v7130_v30  ;;  %4218 = vadd.xlane.f32.xlu0 %v4212_v59  ;;  %v5582_v30 = vld [vmem:[%s7443_s16 + $0xe0] ss:$16 sps:$4 sm:$0xff]  }
0x19d2   :  { %v5075_v55 = vpop.f32.mrf.mxu0  ;;  %4477 = vmatpush1.bf16.msra.mxu1 %v5582_v30 }
0x19d3   :  { %v5076_v3 = vadd.f32 %v5075_v55, %v5074_v46  ;;  %v4213_v48 = vadd.f32 %v4885_v49, %v4201_v42  ;;  %4478 = vmatprep.subr.bf16.mxu1 %v5590_v33 }
0x19d4   :  { %v5077_v23 = vpop.f32.mrf.mxu0 }
0x19d5   :  { %v4202_v54 = vadd.f32 %v5076_v3, %v7127_v21  ;;  %4220 = vadd.xlane.f32.xlu1 %v4213_v48  ;;  %v5585_v21 = vld [vmem:[%s7443_s16 + $0xe8] ss:$16 sps:$4 sm:$0xff]  }
0x19d6   :  { %v5078_v10 = vpop.f32.mrf.mxu0  ;;  %4530 = vmatpush1.bf16.msra.mxu0 %v5585_v21  ;;  %4479 = vmatpush1.bf16.msra.mxu1 %v5588_v16 }
0x19d7   :  { %v5079_v61 = vadd.f32 %v5078_v10, %v5077_v23  ;;  %v4214_v28 = vadd.f32 %v4885_v49, %v4202_v54  ;;  %4531 = vmatprep.subr.bf16.mxu0 %v5593_v4  ;;  %4480 = vmatprep.subr.bf16.mxu1 %v5596_v35 }
0x19d9   :  { %v4203_v5 = vadd.f32 %v5079_v61, %v7135_v7  ;;  %4222 = vadd.xlane.f32.xlu0 %v4214_v28 }
0x19da   :  { %4532 = vmatpush1.bf16.msra.mxu0 %v5591_v60  ;;  %4481 = vmatpush1.bf16.msra.mxu1 %v5594_v29 }
0x19db   :  { %v4215_v18 = vadd.f32 %v4885_v49, %v4203_v5  ;;  %4533 = vmatprep.subr.bf16.mxu0 %v5599_v37  ;;  %4482 = vmatprep.subr.bf16.mxu1 %v5602_v53  ;;  %v5624_v49 = vld [vmem:[%s7443_s16] ss:$16 sps:$4 sm:$0xff]  }
0x19dd   :  { %4224 = vadd.xlane.f32.xlu1 %v4215_v18 }
0x19de   :  { %4534 = vmatpush1.bf16.msra.mxu0 %v5597_v40  ;;  %4483 = vmatpush1.bf16.msra.mxu1 %v5600_v2 }
0x19df   :  { %4535 = vmatprep.subr.bf16.mxu0 %v5605_v32  ;;  %4484 = vmatprep.subr.bf16.mxu1 %v5608_v22 }
0x19e2   :  { %4536 = vmatpush1.bf16.msra.mxu0 %v5603_v45  ;;  %4485 = vmatpush1.bf16.msra.mxu1 %v5606_v39 }
0x19e3   :  { %4537 = vmatprep.subr.bf16.mxu0 %v5611_v0  ;;  %4486 = vmatprep.subr.bf16.mxu1 %v5614_v15 }
0x19e6   :  { %4538 = vmatpush1.bf16.msra.mxu0 %v5609_v9  ;;  %4487 = vmatpush1.bf16.msra.mxu1 %v5612_v19 }
0x19e7   :  { %4539 = vmatprep.subr.bf16.mxu0 %v5617_v1  ;;  %4488 = vmatprep.subr.bf16.mxu1 %v5620_v57 }
0x19ea   :  { %4540 = vmatpush1.bf16.msra.mxu0 %v5615_v12  ;;  %4489 = vmatpush1.bf16.msra.mxu1 %v5618_v44 }
0x19eb   :  { %4541 = vmatprep.subr.bf16.mxu0 %v5623_v47  ;;  %4490 = vmatprep.subr.bf16.mxu1 %v5626_v17 }
0x19ee   :  { %4542 = vmatpush1.bf16.msra.mxu0 %v5621_v56  ;;  %4491 = vmatpush1.bf16.msra.mxu1 %v5624_v49 }
0x19ef   :  { %4543 = vmatprep.subr.bf16.mxu0 %v5629_v8 }
0x19f2   :  { %4544 = vmatpush1.bf16.msra.mxu0 %v5627_v25 }
0x1a5a   :  { %v4219_v7 = vpop.xlane.xlu0 %4218 }
0x1a5b   :  { %v4226_v31 = vmul.f32 0.0078125, %v4219_v7 }
0x1a5d   :  { %v7311_v34 = vsub.f32 %v4212_v59, %v4226_v31 }
0x1a5e   :  { %v4221_v26 = vpop.xlane.xlu1 %4220 }
0x1a5f   :  { %v4227_v13 = vmul.f32 0.0078125, %v4221_v26  ;;  %v4234_v20 = vmul.f32 %v7311_v34, %v7311_v34 }
0x1a61   :  { %v7315_v41 = vsub.f32 %v4213_v48, %v4227_v13  ;;  %4238 = vadd.xlane.f32.xlu0 %v4234_v20 }
0x1a62   :  { %v4223_v43 = vpop.xlane.xlu0 %4222 }
0x1a63   :  { %v4228_v24 = vmul.f32 0.0078125, %v4223_v43  ;;  %v4235_v36 = vmul.f32 %v7315_v41, %v7315_v41 }
0x1a65   :  { %v7319_v11 = vsub.f32 %v4214_v28, %v4228_v24  ;;  %4240 = vadd.xlane.f32.xlu1 %v4235_v36 }
0x1a66   :  { %v4225_v50 = vpop.xlane.xlu1 %4224 }
0x1a67   :  { %v4229_v38 = vmul.f32 0.0078125, %v4225_v50  ;;  %v4236_v63 = vmul.f32 %v7319_v11, %v7319_v11 }
0x1a69   :  { %v7323_v62 = vsub.f32 %v4215_v18, %v4229_v38  ;;  %4242 = vadd.xlane.f32.xlu0 %v4236_v63  ;;  %v4886_v18 = vld [vmem:[%s7441_s14] ss:$0 sm:$0xff]  ;;  %s5876_s14 = smov [#allocation2]  }
0x1a6a   :  { %s4603_s15 = sshll.u32 %s5876_s14, 4  ;;  %s4604_s15 = int_to_ptr.vmem [resolvable:$true] %s4603_s15 }
0x1a6b   :  { %v4237_v52 = vmul.f32 %v7323_v62, %v7323_v62  ;;  %s5846_s29 = scalar_lea.vmem %s4604_s15, 2048  ;;  %p5851_p1 = scmp.lt.s32.totalorder %s4604_s15, %s4604_s15 }
0x1a6c   :  { %p5847_p0 = scmp.ne.s32.totalorder %s4604_s15, %s5846_s29  ;;  %p5852_p2 = scmp.lt.s32.totalorder %s5846_s29, %s5846_s29 }
0x1a6d   :  { %4244 = vadd.xlane.f32.xlu1 %v4237_v52 }
0x1a6e   :  { %p5853_p3 = por %p5852_p2, %p5851_p1 }
0x1a70   :  { %p5854_p4 = pnand %p5853_p3, %p5847_p0 }
0x1aea   :  { %v4239_v6 = vpop.xlane.xlu0 %4238 }
0x1aeb   :  { %v4246_v51 = vmul.f32 0.0078125, %v4239_v6 }
0x1aed   :  { %v4250_v59 = vadd.f32 1e-05, %v4246_v51 }
0x1aee   :  { %v4241_v46 = vpop.xlane.xlu1 %4240 }
0x1aef   :  { %5822 = vrsqrt.f32 %v4250_v59  ;;  %v4247_v42 = vmul.f32 0.0078125, %v4241_v46 }
0x1af1   :  { %v4251_v55 = vadd.f32 1e-05, %v4247_v42 }
0x1af2   :  { %v4243_v3 = vpop.xlane.xlu0 %4242 }
0x1af3   :  { %5824 = vrsqrt.f32 %v4251_v55  ;;  %v4248_v48 = vmul.f32 0.0078125, %v4243_v3 }
0x1af5   :  { %v4252_v23 = vadd.f32 1e-05, %v4248_v48 }
0x1af6   :  { %v4245_v54 = vpop.xlane.xlu1 %4244 }
0x1af7   :  { %5826 = vrsqrt.f32 %v4252_v23  ;;  %v4249_v10 = vmul.f32 0.0078125, %v4245_v54 }
0x1af9   :  { %v4253_v61 = vadd.f32 1e-05, %v4249_v10 }
0x1afb   :  { %5828 = vrsqrt.f32 %v4253_v61 }
0x1afc   :  { %v5823_v28 = vpop.eup %5822 }
0x1afd   :  { %v4258_v5 = vmul.f32 %v5823_v28, %v7311_v34 }
0x1aff   :  { %v4268_v21 = vmul.f32 %v4886_v18, %v4258_v5 }
0x1b00   :  { %v5825_v30 = vpop.eup %5824 }
0x1b01   :  { %v4259_v14 = vmul.f32 %v5825_v30, %v7315_v41  ;;  %v4278_v26 = vadd.f32 %v4887_v58, %v4268_v21 }
0x1b03   :  { %v4269_v7 = vmul.f32 %v4886_v18, %v4259_v14 }
0x1b04   :  { %v5827_v31 = vpop.eup %5826 }
0x1b05   :  { %v4279_v13 = vadd.f32 %v4887_v58, %v4269_v7  ;;  %v4260_v20 = vmul.f32 %v5827_v31, %v7319_v11 }
0x1b07   :  { %v4314_v43 = vpack.c.bf16 %v4279_v13, %v4278_v26  ;;  %v4270_v36 = vmul.f32 %v4886_v18, %v4260_v20 }
0x1b08   :  { %v5829_v34 = vpop.eup %5828 }
0x1b09   :  { %4509 = vmatmul.mubr.bf16.vlgmr.msra.gmra.mxu1 %v4314_v43  ;;  %4562 = vmatmul.mubr.bf16.vlgmr.msra.gmra.mxu0 %v4314_v43  ;;  %v4261_v24 = vmul.f32 %v5829_v34, %v7323_v62  ;;  %v4280_v50 = vadd.f32 %v4887_v58, %v4270_v36 }
0x1b0a   :  { %4518 = vmatprep.mubr.bf16.mxu1 %v5868_v27  ;;  %4571 = vmatprep.mubr.bf16.mxu0 %v5868_v27 }
0x1b0b   :  { %v4271_v41 = vmul.f32 %v4886_v18, %v4261_v24 }
0x1b0d   :  { %v4281_v38 = vadd.f32 %v4887_v58, %v4271_v41 }
0x1b0f   :  { %v4315_v63 = vpack.c.bf16 %v4281_v38, %v4280_v50 }
0x1b11   :  { %4519 = vmatmul.mubr.bf16.gmra.mxu1 %v4315_v63  ;;  %4572 = vmatmul.mubr.bf16.gmra.mxu0 %v4315_v63 }
0x1bc9   :  { %v4510_v52 = vpop.f32.mrf.mxu1  ;;  %v4563_v33 = vpop.f32.mrf.mxu0 }
0x1bca   :  { %4582 = vst [vmem:[#allocation2] sm:$0xff] %v4510_v52  ;;  %4584 = vst [vmem:[#allocation2 + $0x10] sm:$0xff] %v4563_v33 }
0x1bcb   :  { %v4512_v11 = vpop.f32.mrf.mxu1  ;;  %v4565_v4 = vpop.f32.mrf.mxu0 }
0x1bcc   :  { %4583 = vst [vmem:[#allocation2 + $0x8] sm:$0xff] %v4512_v11  ;;  %4585 = vst [vmem:[#allocation2 + $0x18] sm:$0xff] %v4565_v4 }
0x1bcd   :  { %v4514_v62 = vpop.f32.mrf.mxu1  ;;  %v4567_v16 = vpop.f32.mrf.mxu0 }
0x1bce   :  { %4586 = vst [vmem:[#allocation2 + $0x20] sm:$0xff] %v4514_v62  ;;  %4588 = vst [vmem:[#allocation2 + $0x30] sm:$0xff] %v4567_v16 }
0x1bcf   :  { %v4516_v60 = vpop.f32.mrf.mxu1  ;;  %v4569_v27 = vpop.f32.mrf.mxu0 }
0x1bd0   :  { %4587 = vst [vmem:[#allocation2 + $0x28] sm:$0xff] %v4516_v60  ;;  %4589 = vst [vmem:[#allocation2 + $0x38] sm:$0xff] %v4569_v27 }
0x1bd1   :  { %v4520_v35 = vpop.f32.mrf.mxu1  ;;  %v4573_v37 = vpop.f32.mrf.mxu0 }
0x1bd2   :  { %4590 = vst [vmem:[#allocation2 + $0x40] sm:$0xff] %v4520_v35  ;;  %4592 = vst [vmem:[#allocation2 + $0x50] sm:$0xff] %v4573_v37 }
0x1bd3   :  { %v4522_v29 = vpop.f32.mrf.mxu1  ;;  %v4575_v40 = vpop.f32.mrf.mxu0 }
0x1bd4   :  { %4591 = vst [vmem:[#allocation2 + $0x48] sm:$0xff] %v4522_v29  ;;  %4593 = vst [vmem:[#allocation2 + $0x58] sm:$0xff] %v4575_v40 }
0x1bd5   :  { %v4524_v53 = vpop.f32.mrf.mxu1  ;;  %v4577_v32 = vpop.f32.mrf.mxu0 }
0x1bd6   :  { %4594 = vst [vmem:[#allocation2 + $0x60] sm:$0xff] %v4524_v53  ;;  %4596 = vst [vmem:[#allocation2 + $0x70] sm:$0xff] %v4577_v32 }
0x1bd7   :  { %v4526_v2 = vpop.f32.mrf.mxu1  ;;  %v4579_v45 = vpop.f32.mrf.mxu0 }
0x1bd8   :  { %4595 = vst [vmem:[#allocation2 + $0x68] sm:$0xff] %v4526_v2  ;;  %4597 = vst [vmem:[#allocation2 + $0x78] sm:$0xff] %v4579_v45 }
0x1bd9   :  { %5857 = shalt.err (!%p5854_p4)
}
0x1bda   :  { %s5877_s28 = smov 512  }
0x1bdb   :  { %4609 = dma.vmem_to_hbm [thread:$0]  %s4604_s15, 2048, %s7444_s17, [#allocation3], %s5877_s28, %s5877_s28, %s7457_s2  }
0x1bdc   :  { %5866 = dma.done.wait [#allocation3], 2048  }
0x1bdd   :  { %5867 = vsyncadd [#allocation3], 4294965248 }
0x1bde   :  { %4613 = vsyncpa [#allocation3], 1 }

</bundles_post_ra>
